<compile_context>
chip_gen: v7x
topology: tpu7x:2x2x1
jax: 0.10.0
libtpu: 0.0.40
codegen_flags: <defaults>
</compile_context>

<pallas_src>
import functools

import jax
import jax.numpy as jnp
import numpy as np
from jax.experimental import pallas as pl
from jax.experimental.pallas import tpu as pltpu


def _scsa_kernel(x_ref, w1t_ref, b1_ref, w2_ref, b2_ref, wtap_ref, mask_ref,
                 bnb_ref, o_ref, pad_ref, *, H, W, BT, PAD, CH, is_res):
    """One grid step = BT batch elements, fully fused SCSA forward."""
    HW = H * W
    bn_bias = bnb_ref[0]                         # folded BN bias (SMEM scalar)

    # Grid-step-invariant parameters: load once.
    w1t = w1t_ref[...]                           # (C, Cr)  == w1.T
    b1 = b1_ref[...]                             # (1, Cr)
    w2 = w2_ref[...]                             # (C, Cr)
    b2 = b2_ref[...]                             # (C, 1)

    # Zero the padded conv scratch once per grid step; the interior is fully
    # overwritten per batch element, the pad strips stay zero.
    pad_ref[...] = jnp.zeros(pad_ref.shape, jnp.float32)

    for b in range(BT):                          # static unroll over batch tile
        x = x_ref[b]                             # (C, HW) lane-dense, f32

        # ---- channel attention: SE block entirely on the VPU ----------------
        avg_c = jnp.mean(x, axis=1, keepdims=True)                  # (C, 1)
        max_c = jnp.max(x, axis=1, keepdims=True)                   # (C, 1)
        h = (jnp.maximum(jnp.sum(w1t * avg_c, axis=0, keepdims=True) + b1, 0.0)
             + jnp.maximum(jnp.sum(w1t * max_c, axis=0, keepdims=True) + b1, 0.0))
        s = jnp.sum(w2 * h, axis=1, keepdims=True) + 2.0 * b2       # (C, 1)
        gate_c = jnp.exp(jax.nn.sigmoid(s))                         # (C, 1)

        # ---- channel-wise mean / max maps (ch_att is NOT stored) ------------
        ch_att = x * gate_c                                         # (C, HW)
        pad_ref[0:1, PAD:PAD + HW] = jnp.mean(ch_att, axis=0, keepdims=True)
        pad_ref[1:2, PAD:PAD + HW] = jnp.max(ch_att, axis=0, keepdims=True)

        # ---- 7x7 conv (2->1 ch) + folded BN + spatial gate + output ---------
        # Flat layout: tap (ky,kx) reads the padded maps shifted by
        # (ky-3)*W + (kx-3); vertical out-of-range reads hit the zero pads,
        # horizontal out-of-range reads are killed by the per-kx mask.
        for off in range(0, HW, CH):
            ch = min(CH, HW - off)
            acc = jnp.zeros((2, ch), jnp.float32)
            for kx in range(7):
                dx = kx - 3
                part = jnp.zeros((2, ch), jnp.float32)
                for ky in range(7):
                    s0 = PAD + off + (ky - 3) * W + dx
                    part = part + wtap_ref[ky * 7 + kx] * pad_ref[:, s0:s0 + ch]
                if dx != 0:
                    part = part * mask_ref[kx:kx + 1, off:off + ch]
                acc = acc + part
            conv = acc[0:1, :] + acc[1:2, :] + bn_bias              # (1, ch)
            gate_sp = jnp.exp(jax.nn.sigmoid(conv))                 # (1, ch)

            xc = x[:, off:off + ch]                                 # (C, ch)
            outc = xc * gate_c * gate_sp
            if is_res:
                outc = outc + xc
            o_ref[b, :, off:off + ch] = outc.astype(o_ref.dtype)


def _pick_batch_tile(B, C, HW):
    """Largest divisor of B whose in+out (double-buffered) blocks stay under
    ~8 MiB while keeping the grid length >= 2 when possible (v7x megacore)."""
    per_elem = C * HW * 4 * 4            # in + out, double-buffered, f32 bytes
    cap = max(1, (8 << 20) // per_elem)
    divs = [d for d in range(1, B + 1) if B % d == 0 and d <= cap]
    pref = [d for d in divs if B // d >= 2]
    return max(pref) if pref else max(divs)


def scsa_block(x, params, *, is_res=True):
    """Pallas SCSABlock forward.  x: (B, C, H, W) float32, NCHW."""
    B, C, H, W = x.shape
    w1, b1, w2, b2, sp_w, bn_gamma, bn_beta, bn_mean, bn_var = params
    Cr = w1.shape[0]
    HW = H * W
    eps = 1e-5

    # Fold eval-mode BatchNorm(1) into the 7x7 conv: y = scale*conv + bias.
    scale = bn_gamma / jnp.sqrt(bn_var + eps)
    wtap = (jnp.transpose(sp_w * scale, (1, 2, 0))
            .reshape(49, 2, 1).astype(jnp.float32))        # [ky*7+kx, cc, 1]
    bn_bias = jnp.reshape(bn_beta - bn_mean * scale, (1,)).astype(jnp.float32)

    # Per-kx horizontal validity masks, precomputed host-side (avoids in-kernel
    # iota/mod and any captured array constants).
    xcol = (jnp.arange(HW, dtype=jnp.int32) % W)[None, :]
    masks = jnp.concatenate(
        [((xcol + (kx - 3) >= 0) & (xcol + (kx - 3) < W)).astype(jnp.float32)
         for kx in range(7)], axis=0)                      # (7, HW)

    BT = _pick_batch_tile(B, C, HW)
    assert B % BT == 0
    PAD = ((3 * W + 3 + 127) // 128) * 128   # lane-aligned left pad, >= 3W+3
    assert PAD >= 3 * W + 3
    PADW = PAD + HW + (3 * W + 3)            # every tap slice stays in-bounds
    CH = HW if HW <= 1024 else 1024          # conv/output chunk (bounds vregs)

    x_flat = x.reshape(B, C, HW).astype(jnp.float32)

    kernel = functools.partial(_scsa_kernel, H=H, W=W, BT=BT, PAD=PAD, CH=CH,
                               is_res=is_res)

    flops = int(B * (10 * C * HW + 4 * 49 * HW + 8 * C * Cr))
    transcendentals = int(B * (2 * C + 2 * HW))
    bytes_accessed = int(B * 2 * C * HW * 4)

    out_flat = pl.pallas_call(
        kernel,
        out_shape=jax.ShapeDtypeStruct((B, C, HW), jnp.float32),
        grid_spec=pltpu.PrefetchScalarGridSpec(
            num_scalar_prefetch=0,
            grid=(B // BT,),
            in_specs=[
                pl.BlockSpec((BT, C, HW), lambda i: (i, 0, 0)),   # x (lane-dense)
                pl.BlockSpec((C, Cr), lambda i: (0, 0)),          # w1.T
                pl.BlockSpec((1, Cr), lambda i: (0, 0)),          # b1
                pl.BlockSpec((C, Cr), lambda i: (0, 0)),          # w2
                pl.BlockSpec((C, 1), lambda i: (0, 0)),           # b2
                pl.BlockSpec((49, 2, 1), lambda i: (0, 0, 0)),    # folded conv w
                pl.BlockSpec((7, HW), lambda i: (0, 0)),          # kx masks
                pl.BlockSpec(memory_space=pltpu.SMEM),            # folded BN bias
            ],
            out_specs=pl.BlockSpec((BT, C, HW), lambda i: (i, 0, 0)),
            scratch_shapes=[
                pltpu.VMEM((2, PADW), jnp.float32),               # padded maps
            ],
        ),
        compiler_params=pltpu.CompilerParams(
            # Batch grid axis shards across v7x's two TensorCores; near-no-op
            # on single-TC v5e/v6e.
            dimension_semantics=("parallel",),
            # Blocks are capped (~8 MiB double-buffered) by _pick_batch_tile,
            # so 32 MiB is safe on v5e/v6e (128 MiB) and v7x (64 MiB).
            vmem_limit_bytes=32 * 1024 * 1024,
        ),
        cost_estimate=pl.CostEstimate(
            flops=flops, transcendentals=transcendentals,
            bytes_accessed=bytes_accessed),
    )(x_flat,
      jnp.transpose(w1).astype(jnp.float32),     # (C, Cr)
      b1.reshape(1, Cr).astype(jnp.float32),
      w2.astype(jnp.float32),                    # (C, Cr)
      b2.reshape(C, 1).astype(jnp.float32),
      wtap, masks, bn_bias)
    return out_flat.reshape(B, C, H, W)


def scsa_reference(x, params, *, is_res=True):
    """Pure-JAX reference matching the PyTorch forward (BatchNorm in eval mode)."""
    w1, b1, w2, b2, sp_w, bn_gamma, bn_beta, bn_mean, bn_var = params
    eps = 1e-5
    hi = jax.lax.Precision.HIGHEST

    avg = jnp.mean(x, axis=(2, 3))                      # (B, C)
    mx = jnp.max(x, axis=(2, 3))                        # (B, C)

    def se(v):
        h = jnp.maximum(jnp.dot(v, w1.T, precision=hi) + b1[None, :], 0.0)
        return jnp.dot(h, w2.T, precision=hi) + b2[None, :]

    gate_c = jnp.exp(jax.nn.sigmoid(se(avg) + se(mx)))  # (B, C)
    ch_att = x * gate_c[:, :, None, None]
    ch_avg = jnp.mean(ch_att, axis=1, keepdims=True)
    ch_max = jnp.max(ch_att, axis=1, keepdims=True)
    sp_in = jnp.concatenate([ch_avg, ch_max], axis=1)   # (B, 2, H, W)
    conv = jax.lax.conv_general_dilated(
        sp_in, sp_w[None], window_strides=(1, 1),
        padding=((3, 3), (3, 3)),
        dimension_numbers=("NCHW", "OIHW", "NCHW"),
        precision=hi)
    bn = (conv - bn_mean) / jnp.sqrt(bn_var + eps) * bn_gamma + bn_beta
    out = ch_att * jnp.exp(jax.nn.sigmoid(bn))
    if is_res:
        out = out + x
    return out


if __name__ == "__main__":
    # Small shapes consistent with the module (reduct_ratio=16 => C >= 16).
    B, C, H, W = 2, 32, 16, 16
    reduct_ratio = 16
    Cr = C // reduct_ratio

    key = jax.random.PRNGKey(0)
    kx, k1, k2, k3, k4, k5 = jax.random.split(key, 6)
    x = jax.random.normal(kx, (B, C, H, W), jnp.float32)

    # Deterministic synthetic parameters (shapes from SCSABlock.__init__).
    w1 = 0.3 * jax.random.normal(k1, (Cr, C), jnp.float32)      # 1x1 conv C->C/r
    b1 = 0.1 * jax.random.normal(k2, (Cr,), jnp.float32)
    w2 = 0.3 * jax.random.normal(k3, (C, Cr), jnp.float32)      # 1x1 conv C/r->C
    b2 = 0.1 * jax.random.normal(k4, (C,), jnp.float32)
    sp_w = 0.2 * jax.random.normal(k5, (2, 7, 7), jnp.float32)  # 7x7 conv, no bias
    bn_gamma = jnp.array(1.2, jnp.float32)
    bn_beta = jnp.array(-0.1, jnp.float32)
    bn_mean = jnp.array(0.05, jnp.float32)
    bn_var = jnp.array(0.9, jnp.float32)
    params = (w1, b1, w2, b2, sp_w, bn_gamma, bn_beta, bn_mean, bn_var)

    out = scsa_block(x, params, is_res=True)
    out = jax.block_until_ready(out)

    ref = scsa_reference(x, params, is_res=True)
    np.testing.assert_allclose(np.asarray(out), np.asarray(ref),
                               atol=2e-3, rtol=2e-3)
    print("KERNEL_OK")
</pallas_src>

<mosaic_0001>
module attributes {stable_mosaic.version = 11 : i64} {
  func.func @_scsa_kernel(%arg0: i32, %arg1: memref<1x32x256xf32, #tpu.memory_space<vmem>>, %arg2: memref<32x2xf32, #tpu.memory_space<vmem>>, %arg3: memref<1x2xf32, #tpu.memory_space<vmem>>, %arg4: memref<32x2xf32, #tpu.memory_space<vmem>>, %arg5: memref<32x1xf32, #tpu.memory_space<vmem>>, %arg6: memref<49x2x1xf32, #tpu.memory_space<vmem>>, %arg7: memref<7x256xf32, #tpu.memory_space<vmem>>, %arg8: memref<1xf32, #tpu.memory_space<smem>>, %arg9: memref<1x32x256xf32, #tpu.memory_space<vmem>>, %arg10: memref<2x435xf32, #tpu.memory_space<vmem>>) attributes {dimension_semantics = [#tpu.dimension_semantics<parallel>], iteration_bounds = array<i64: 2>, scalar_prefetch = 0 : i64, scratch_operands = 1 : i64, tpu.core_type = #tpu.core_type<tc>, window_params = [{transform_indices = @transform_0, window_bounds = array<i64: 1, 32, 256>}, {pipeline_mode = #tpu.pipeline_mode<synchronous>, transform_indices = @transform_1, window_bounds = array<i64: 32, 2>}, {pipeline_mode = #tpu.pipeline_mode<synchronous>, transform_indices = @transform_2, window_bounds = array<i64: 1, 2>}, {pipeline_mode = #tpu.pipeline_mode<synchronous>, transform_indices = @transform_3, window_bounds = array<i64: 32, 2>}, {pipeline_mode = #tpu.pipeline_mode<synchronous>, transform_indices = @transform_4, window_bounds = array<i64: 32, 1>}, {pipeline_mode = #tpu.pipeline_mode<synchronous>, transform_indices = @transform_5, window_bounds = array<i64: 49, 2, 1>}, {pipeline_mode = #tpu.pipeline_mode<synchronous>, transform_indices = @transform_6, window_bounds = array<i64: 7, 256>}, {transform_indices = @transform_7, window_bounds = array<i64: 1>}, {transform_indices = @transform_8, window_bounds = array<i64: 1, 32, 256>}]} {
    %c0 = arith.constant 0 : index
    %0 = memref.load %arg8[%c0] : memref<1xf32, #tpu.memory_space<smem>>
    %c0_0 = arith.constant 0 : index
    %c0_1 = arith.constant 0 : index
    %1 = vector.load %arg2[%c0_0, %c0_1] : memref<32x2xf32, #tpu.memory_space<vmem>>, vector<32x2xf32>
    %c0_2 = arith.constant 0 : index
    %c0_3 = arith.constant 0 : index
    %2 = vector.load %arg3[%c0_2, %c0_3] : memref<1x2xf32, #tpu.memory_space<vmem>>, vector<1x2xf32>
    %c0_4 = arith.constant 0 : index
    %c0_5 = arith.constant 0 : index
    %3 = vector.load %arg4[%c0_4, %c0_5] : memref<32x2xf32, #tpu.memory_space<vmem>>, vector<32x2xf32>
    %c0_6 = arith.constant 0 : index
    %c0_7 = arith.constant 0 : index
    %4 = vector.load %arg5[%c0_6, %c0_7] : memref<32x1xf32, #tpu.memory_space<vmem>>, vector<32x1xf32>
    %cst = arith.constant 0.000000e+00 : f32
    %5 = vector.broadcast %cst : f32 to vector<2x435xf32>
    %c0_8 = arith.constant 0 : index
    %c0_9 = arith.constant 0 : index
    %6 = vector.load %arg10[%c0_8, %c0_9] : memref<2x435xf32, #tpu.memory_space<vmem>>, vector<2x435xf32>
    tpu.vector_store %arg10[%c0_8, %c0_9], %5 {strides = array<i32>} : memref<2x435xf32, #tpu.memory_space<vmem>>, vector<2x435xf32>,
    %c0_10 = arith.constant 0 : index
    %c0_11 = arith.constant 0 : index
    %c0_12 = arith.constant 0 : index
    %7 = vector.load %arg1[%c0_10, %c0_11, %c0_12] : memref<1x32x256xf32, #tpu.memory_space<vmem>>, vector<1x32x256xf32>
    %8 = vector.shape_cast %7 : vector<1x32x256xf32> to vector<32x256xf32>
    %cst_13 = arith.constant dense<0.000000e+00> : vector<32xf32>
    %9 = vector.multi_reduction <add>, %8, %cst_13 [1] : vector<32x256xf32> to vector<32xf32>
    %10 = vector.shape_cast %9 : vector<32xf32> to vector<32x1xf32>
    %cst_14 = arith.constant 2.560000e+02 : f32
    %11 = vector.broadcast %cst_14 : f32 to vector<32x1xf32>
    %12 = arith.divf %10, %11 : vector<32x1xf32>
    %cst_15 = arith.constant dense<0xFF800000> : vector<32xf32>
    %13 = vector.multi_reduction <maximumf>, %8, %cst_15 [1] : vector<32x256xf32> to vector<32xf32>
    %14 = vector.shape_cast %13 : vector<32xf32> to vector<32x1xf32>
    %15 = vector.broadcast %12 : vector<32x1xf32> to vector<32x2xf32>
    %16 = arith.mulf %1, %15 : vector<32x2xf32>
    %cst_16 = arith.constant dense<0.000000e+00> : vector<2xf32>
    %17 = vector.multi_reduction <add>, %16, %cst_16 [0] : vector<32x2xf32> to vector<2xf32>
    %18 = vector.shape_cast %17 : vector<2xf32> to vector<1x2xf32>
    %19 = arith.addf %18, %2 : vector<1x2xf32>
    %cst_17 = arith.constant 0.000000e+00 : f32
    %20 = vector.broadcast %cst_17 : f32 to vector<1x2xf32>
    %21 = arith.maximumf %19, %20 : vector<1x2xf32>
    %22 = vector.broadcast %14 : vector<32x1xf32> to vector<32x2xf32>
    %23 = arith.mulf %1, %22 : vector<32x2xf32>
    %cst_18 = arith.constant dense<0.000000e+00> : vector<2xf32>
    %24 = vector.multi_reduction <add>, %23, %cst_18 [0] : vector<32x2xf32> to vector<2xf32>
    %25 = vector.shape_cast %24 : vector<2xf32> to vector<1x2xf32>
    %26 = arith.addf %25, %2 : vector<1x2xf32>
    %cst_19 = arith.constant 0.000000e+00 : f32
    %27 = vector.broadcast %cst_19 : f32 to vector<1x2xf32>
    %28 = arith.maximumf %26, %27 : vector<1x2xf32>
    %29 = arith.addf %21, %28 : vector<1x2xf32>
    %30 = vector.broadcast %29 : vector<1x2xf32> to vector<32x2xf32>
    %31 = arith.mulf %3, %30 : vector<32x2xf32>
    %cst_20 = arith.constant dense<0.000000e+00> : vector<32xf32>
    %32 = vector.multi_reduction <add>, %31, %cst_20 [1] : vector<32x2xf32> to vector<32xf32>
    %33 = vector.shape_cast %32 : vector<32xf32> to vector<32x1xf32>
    %cst_21 = arith.constant 2.000000e+00 : f32
    %34 = vector.broadcast %cst_21 : f32 to vector<32x1xf32>
    %35 = arith.mulf %34, %4 : vector<32x1xf32>
    %36 = arith.addf %33, %35 : vector<32x1xf32>
    %37 = arith.negf %36 : vector<32x1xf32>
    %38 = math.exp %37 : vector<32x1xf32>
    %cst_22 = arith.constant 1.000000e+00 : f32
    %39 = vector.broadcast %cst_22 : f32 to vector<32x1xf32>
    %40 = arith.addf %39, %38 : vector<32x1xf32>
    %41 = arith.divf %39, %40 : vector<32x1xf32>
    %42 = math.exp %41 : vector<32x1xf32>
    %43 = vector.broadcast %42 : vector<32x1xf32> to vector<32x256xf32>
    %44 = arith.mulf %8, %43 : vector<32x256xf32>
    %cst_23 = arith.constant dense<0.000000e+00> : vector<256xf32>
    %45 = vector.multi_reduction <add>, %44, %cst_23 [0] : vector<32x256xf32> to vector<256xf32>
    %46 = vector.shape_cast %45 : vector<256xf32> to vector<1x256xf32>
    %cst_24 = arith.constant 3.200000e+01 : f32
    %47 = vector.broadcast %cst_24 : f32 to vector<1x256xf32>
    %48 = arith.divf %46, %47 : vector<1x256xf32>
    %c0_25 = arith.constant 0 : index
    %c128 = arith.constant 128 : index
    %49 = vector.load %arg10[%c0_25, %c128] : memref<2x435xf32, #tpu.memory_space<vmem>>, vector<1x256xf32>
    tpu.vector_store %arg10[%c0_25, %c128], %48 {strides = array<i32>} : memref<2x435xf32, #tpu.memory_space<vmem>>, vector<1x256xf32>,
    %cst_26 = arith.constant dense<0xFF800000> : vector<256xf32>
    %50 = vector.multi_reduction <maximumf>, %44, %cst_26 [0] : vector<32x256xf32> to vector<256xf32>
    %51 = vector.shape_cast %50 : vector<256xf32> to vector<1x256xf32>
    %c1 = arith.constant 1 : index
    %c128_27 = arith.constant 128 : index
    %52 = vector.load %arg10[%c1, %c128_27] : memref<2x435xf32, #tpu.memory_space<vmem>>, vector<1x256xf32>
    tpu.vector_store %arg10[%c1, %c128_27], %51 {strides = array<i32>} : memref<2x435xf32, #tpu.memory_space<vmem>>, vector<1x256xf32>,
    %cst_28 = arith.constant 0.000000e+00 : f32
    %53 = vector.broadcast %cst_28 : f32 to vector<2x256xf32>
    %cst_29 = arith.constant 0.000000e+00 : f32
    %54 = vector.broadcast %cst_29 : f32 to vector<2x256xf32>
    %c0_30 = arith.constant 0 : index
    %c0_31 = arith.constant 0 : index
    %c0_32 = arith.constant 0 : index
    %55 = vector.load %arg6[%c0_30, %c0_31, %c0_32] : memref<49x2x1xf32, #tpu.memory_space<vmem>>, vector<1x2x1xf32>
    %56 = vector.shape_cast %55 : vector<1x2x1xf32> to vector<2x1xf32>
    %c0_33 = arith.constant 0 : index
    %c77 = arith.constant 77 : index
    %57 = vector.load %arg10[%c0_33, %c77] : memref<2x435xf32, #tpu.memory_space<vmem>>, vector<2x256xf32>
    %58 = vector.broadcast %56 : vector<2x1xf32> to vector<2x256xf32>
    %59 = arith.mulf %58, %57 : vector<2x256xf32>
    %60 = arith.addf %54, %59 : vector<2x256xf32>
    %c7 = arith.constant 7 : index
    %c0_34 = arith.constant 0 : index
    %c0_35 = arith.constant 0 : index
    %61 = vector.load %arg6[%c7, %c0_34, %c0_35] : memref<49x2x1xf32, #tpu.memory_space<vmem>>, vector<1x2x1xf32>
    %62 = vector.shape_cast %61 : vector<1x2x1xf32> to vector<2x1xf32>
    %c0_36 = arith.constant 0 : index
    %c93 = arith.constant 93 : index
    %63 = vector.load %arg10[%c0_36, %c93] : memref<2x435xf32, #tpu.memory_space<vmem>>, vector<2x256xf32>
    %64 = vector.broadcast %62 : vector<2x1xf32> to vector<2x256xf32>
    %65 = arith.mulf %64, %63 : vector<2x256xf32>
    %66 = arith.addf %60, %65 : vector<2x256xf32>
    %c14 = arith.constant 14 : index
    %c0_37 = arith.constant 0 : index
    %c0_38 = arith.constant 0 : index
    %67 = vector.load %arg6[%c14, %c0_37, %c0_38] : memref<49x2x1xf32, #tpu.memory_space<vmem>>, vector<1x2x1xf32>
    %68 = vector.shape_cast %67 : vector<1x2x1xf32> to vector<2x1xf32>
    %c0_39 = arith.constant 0 : index
    %c109 = arith.constant 109 : index
    %69 = vector.load %arg10[%c0_39, %c109] : memref<2x435xf32, #tpu.memory_space<vmem>>, vector<2x256xf32>
    %70 = vector.broadcast %68 : vector<2x1xf32> to vector<2x256xf32>
    %71 = arith.mulf %70, %69 : vector<2x256xf32>
    %72 = arith.addf %66, %71 : vector<2x256xf32>
    %c21 = arith.constant 21 : index
    %c0_40 = arith.constant 0 : index
    %c0_41 = arith.constant 0 : index
    %73 = vector.load %arg6[%c21, %c0_40, %c0_41] : memref<49x2x1xf32, #tpu.memory_space<vmem>>, vector<1x2x1xf32>
    %74 = vector.shape_cast %73 : vector<1x2x1xf32> to vector<2x1xf32>
    %c0_42 = arith.constant 0 : index
    %c125 = arith.constant 125 : index
    %75 = vector.load %arg10[%c0_42, %c125] : memref<2x435xf32, #tpu.memory_space<vmem>>, vector<2x256xf32>
    %76 = vector.broadcast %74 : vector<2x1xf32> to vector<2x256xf32>
    %77 = arith.mulf %76, %75 : vector<2x256xf32>
    %78 = arith.addf %72, %77 : vector<2x256xf32>
    %c28 = arith.constant 28 : index
    %c0_43 = arith.constant 0 : index
    %c0_44 = arith.constant 0 : index
    %79 = vector.load %arg6[%c28, %c0_43, %c0_44] : memref<49x2x1xf32, #tpu.memory_space<vmem>>, vector<1x2x1xf32>
    %80 = vector.shape_cast %79 : vector<1x2x1xf32> to vector<2x1xf32>
    %c0_45 = arith.constant 0 : index
    %c141 = arith.constant 141 : index
    %81 = vector.load %arg10[%c0_45, %c141] : memref<2x435xf32, #tpu.memory_space<vmem>>, vector<2x256xf32>
    %82 = vector.broadcast %80 : vector<2x1xf32> to vector<2x256xf32>
    %83 = arith.mulf %82, %81 : vector<2x256xf32>
    %84 = arith.addf %78, %83 : vector<2x256xf32>
    %c35 = arith.constant 35 : index
    %c0_46 = arith.constant 0 : index
    %c0_47 = arith.constant 0 : index
    %85 = vector.load %arg6[%c35, %c0_46, %c0_47] : memref<49x2x1xf32, #tpu.memory_space<vmem>>, vector<1x2x1xf32>
    %86 = vector.shape_cast %85 : vector<1x2x1xf32> to vector<2x1xf32>
    %c0_48 = arith.constant 0 : index
    %c157 = arith.constant 157 : index
    %87 = vector.load %arg10[%c0_48, %c157] : memref<2x435xf32, #tpu.memory_space<vmem>>, vector<2x256xf32>
    %88 = vector.broadcast %86 : vector<2x1xf32> to vector<2x256xf32>
    %89 = arith.mulf %88, %87 : vector<2x256xf32>
    %90 = arith.addf %84, %89 : vector<2x256xf32>
    %c42 = arith.constant 42 : index
    %c0_49 = arith.constant 0 : index
    %c0_50 = arith.constant 0 : index
    %91 = vector.load %arg6[%c42, %c0_49, %c0_50] : memref<49x2x1xf32, #tpu.memory_space<vmem>>, vector<1x2x1xf32>
    %92 = vector.shape_cast %91 : vector<1x2x1xf32> to vector<2x1xf32>
    %c0_51 = arith.constant 0 : index
    %c173 = arith.constant 173 : index
    %93 = vector.load %arg10[%c0_51, %c173] : memref<2x435xf32, #tpu.memory_space<vmem>>, vector<2x256xf32>
    %94 = vector.broadcast %92 : vector<2x1xf32> to vector<2x256xf32>
    %95 = arith.mulf %94, %93 : vector<2x256xf32>
    %96 = arith.addf %90, %95 : vector<2x256xf32>
    %c0_52 = arith.constant 0 : index
    %c0_53 = arith.constant 0 : index
    %97 = vector.load %arg7[%c0_52, %c0_53] : memref<7x256xf32, #tpu.memory_space<vmem>>, vector<1x256xf32>
    %98 = vector.broadcast %97 : vector<1x256xf32> to vector<2x256xf32>
    %99 = arith.mulf %96, %98 : vector<2x256xf32>
    %100 = arith.addf %53, %99 : vector<2x256xf32>
    %cst_54 = arith.constant 0.000000e+00 : f32
    %101 = vector.broadcast %cst_54 : f32 to vector<2x256xf32>
    %c1_55 = arith.constant 1 : index
    %c0_56 = arith.constant 0 : index
    %c0_57 = arith.constant 0 : index
    %102 = vector.load %arg6[%c1_55, %c0_56, %c0_57] : memref<49x2x1xf32, #tpu.memory_space<vmem>>, vector<1x2x1xf32>
    %103 = vector.shape_cast %102 : vector<1x2x1xf32> to vector<2x1xf32>
    %c0_58 = arith.constant 0 : index
    %c78 = arith.constant 78 : index
    %104 = vector.load %arg10[%c0_58, %c78] : memref<2x435xf32, #tpu.memory_space<vmem>>, vector<2x256xf32>
    %105 = vector.broadcast %103 : vector<2x1xf32> to vector<2x256xf32>
    %106 = arith.mulf %105, %104 : vector<2x256xf32>
    %107 = arith.addf %101, %106 : vector<2x256xf32>
    %c8 = arith.constant 8 : index
    %c0_59 = arith.constant 0 : index
    %c0_60 = arith.constant 0 : index
    %108 = vector.load %arg6[%c8, %c0_59, %c0_60] : memref<49x2x1xf32, #tpu.memory_space<vmem>>, vector<1x2x1xf32>
    %109 = vector.shape_cast %108 : vector<1x2x1xf32> to vector<2x1xf32>
    %c0_61 = arith.constant 0 : index
    %c94 = arith.constant 94 : index
    %110 = vector.load %arg10[%c0_61, %c94] : memref<2x435xf32, #tpu.memory_space<vmem>>, vector<2x256xf32>
    %111 = vector.broadcast %109 : vector<2x1xf32> to vector<2x256xf32>
    %112 = arith.mulf %111, %110 : vector<2x256xf32>
    %113 = arith.addf %107, %112 : vector<2x256xf32>
    %c15 = arith.constant 15 : index
    %c0_62 = arith.constant 0 : index
    %c0_63 = arith.constant 0 : index
    %114 = vector.load %arg6[%c15, %c0_62, %c0_63] : memref<49x2x1xf32, #tpu.memory_space<vmem>>, vector<1x2x1xf32>
    %115 = vector.shape_cast %114 : vector<1x2x1xf32> to vector<2x1xf32>
    %c0_64 = arith.constant 0 : index
    %c110 = arith.constant 110 : index
    %116 = vector.load %arg10[%c0_64, %c110] : memref<2x435xf32, #tpu.memory_space<vmem>>, vector<2x256xf32>
    %117 = vector.broadcast %115 : vector<2x1xf32> to vector<2x256xf32>
    %118 = arith.mulf %117, %116 : vector<2x256xf32>
    %119 = arith.addf %113, %118 : vector<2x256xf32>
    %c22 = arith.constant 22 : index
    %c0_65 = arith.constant 0 : index
    %c0_66 = arith.constant 0 : index
    %120 = vector.load %arg6[%c22, %c0_65, %c0_66] : memref<49x2x1xf32, #tpu.memory_space<vmem>>, vector<1x2x1xf32>
    %121 = vector.shape_cast %120 : vector<1x2x1xf32> to vector<2x1xf32>
    %c0_67 = arith.constant 0 : index
    %c126 = arith.constant 126 : index
    %122 = vector.load %arg10[%c0_67, %c126] : memref<2x435xf32, #tpu.memory_space<vmem>>, vector<2x256xf32>
    %123 = vector.broadcast %121 : vector<2x1xf32> to vector<2x256xf32>
    %124 = arith.mulf %123, %122 : vector<2x256xf32>
    %125 = arith.addf %119, %124 : vector<2x256xf32>
    %c29 = arith.constant 29 : index
    %c0_68 = arith.constant 0 : index
    %c0_69 = arith.constant 0 : index
    %126 = vector.load %arg6[%c29, %c0_68, %c0_69] : memref<49x2x1xf32, #tpu.memory_space<vmem>>, vector<1x2x1xf32>
    %127 = vector.shape_cast %126 : vector<1x2x1xf32> to vector<2x1xf32>
    %c0_70 = arith.constant 0 : index
    %c142 = arith.constant 142 : index
    %128 = vector.load %arg10[%c0_70, %c142] : memref<2x435xf32, #tpu.memory_space<vmem>>, vector<2x256xf32>
    %129 = vector.broadcast %127 : vector<2x1xf32> to vector<2x256xf32>
    %130 = arith.mulf %129, %128 : vector<2x256xf32>
    %131 = arith.addf %125, %130 : vector<2x256xf32>
    %c36 = arith.constant 36 : index
    %c0_71 = arith.constant 0 : index
    %c0_72 = arith.constant 0 : index
    %132 = vector.load %arg6[%c36, %c0_71, %c0_72] : memref<49x2x1xf32, #tpu.memory_space<vmem>>, vector<1x2x1xf32>
    %133 = vector.shape_cast %132 : vector<1x2x1xf32> to vector<2x1xf32>
    %c0_73 = arith.constant 0 : index
    %c158 = arith.constant 158 : index
    %134 = vector.load %arg10[%c0_73, %c158] : memref<2x435xf32, #tpu.memory_space<vmem>>, vector<2x256xf32>
    %135 = vector.broadcast %133 : vector<2x1xf32> to vector<2x256xf32>
    %136 = arith.mulf %135, %134 : vector<2x256xf32>
    %137 = arith.addf %131, %136 : vector<2x256xf32>
    %c43 = arith.constant 43 : index
    %c0_74 = arith.constant 0 : index
    %c0_75 = arith.constant 0 : index
    %138 = vector.load %arg6[%c43, %c0_74, %c0_75] : memref<49x2x1xf32, #tpu.memory_space<vmem>>, vector<1x2x1xf32>
    %139 = vector.shape_cast %138 : vector<1x2x1xf32> to vector<2x1xf32>
    %c0_76 = arith.constant 0 : index
    %c174 = arith.constant 174 : index
    %140 = vector.load %arg10[%c0_76, %c174] : memref<2x435xf32, #tpu.memory_space<vmem>>, vector<2x256xf32>
    %141 = vector.broadcast %139 : vector<2x1xf32> to vector<2x256xf32>
    %142 = arith.mulf %141, %140 : vector<2x256xf32>
    %143 = arith.addf %137, %142 : vector<2x256xf32>
    %c1_77 = arith.constant 1 : index
    %c0_78 = arith.constant 0 : index
    %144 = vector.load %arg7[%c1_77, %c0_78] : memref<7x256xf32, #tpu.memory_space<vmem>>, vector<1x256xf32>
    %145 = vector.broadcast %144 : vector<1x256xf32> to vector<2x256xf32>
    %146 = arith.mulf %143, %145 : vector<2x256xf32>
    %147 = arith.addf %100, %146 : vector<2x256xf32>
    %cst_79 = arith.constant 0.000000e+00 : f32
    %148 = vector.broadcast %cst_79 : f32 to vector<2x256xf32>
    %c2 = arith.constant 2 : index
    %c0_80 = arith.constant 0 : index
    %c0_81 = arith.constant 0 : index
    %149 = vector.load %arg6[%c2, %c0_80, %c0_81] : memref<49x2x1xf32, #tpu.memory_space<vmem>>, vector<1x2x1xf32>
    %150 = vector.shape_cast %149 : vector<1x2x1xf32> to vector<2x1xf32>
    %c0_82 = arith.constant 0 : index
    %c79 = arith.constant 79 : index
    %151 = vector.load %arg10[%c0_82, %c79] : memref<2x435xf32, #tpu.memory_space<vmem>>, vector<2x256xf32>
    %152 = vector.broadcast %150 : vector<2x1xf32> to vector<2x256xf32>
    %153 = arith.mulf %152, %151 : vector<2x256xf32>
    %154 = arith.addf %148, %153 : vector<2x256xf32>
    %c9 = arith.constant 9 : index
    %c0_83 = arith.constant 0 : index
    %c0_84 = arith.constant 0 : index
    %155 = vector.load %arg6[%c9, %c0_83, %c0_84] : memref<49x2x1xf32, #tpu.memory_space<vmem>>, vector<1x2x1xf32>
    %156 = vector.shape_cast %155 : vector<1x2x1xf32> to vector<2x1xf32>
    %c0_85 = arith.constant 0 : index
    %c95 = arith.constant 95 : index
    %157 = vector.load %arg10[%c0_85, %c95] : memref<2x435xf32, #tpu.memory_space<vmem>>, vector<2x256xf32>
    %158 = vector.broadcast %156 : vector<2x1xf32> to vector<2x256xf32>
    %159 = arith.mulf %158, %157 : vector<2x256xf32>
    %160 = arith.addf %154, %159 : vector<2x256xf32>
    %c16 = arith.constant 16 : index
    %c0_86 = arith.constant 0 : index
    %c0_87 = arith.constant 0 : index
    %161 = vector.load %arg6[%c16, %c0_86, %c0_87] : memref<49x2x1xf32, #tpu.memory_space<vmem>>, vector<1x2x1xf32>
    %162 = vector.shape_cast %161 : vector<1x2x1xf32> to vector<2x1xf32>
    %c0_88 = arith.constant 0 : index
    %c111 = arith.constant 111 : index
    %163 = vector.load %arg10[%c0_88, %c111] : memref<2x435xf32, #tpu.memory_space<vmem>>, vector<2x256xf32>
    %164 = vector.broadcast %162 : vector<2x1xf32> to vector<2x256xf32>
    %165 = arith.mulf %164, %163 : vector<2x256xf32>
    %166 = arith.addf %160, %165 : vector<2x256xf32>
    %c23 = arith.constant 23 : index
    %c0_89 = arith.constant 0 : index
    %c0_90 = arith.constant 0 : index
    %167 = vector.load %arg6[%c23, %c0_89, %c0_90] : memref<49x2x1xf32, #tpu.memory_space<vmem>>, vector<1x2x1xf32>
    %168 = vector.shape_cast %167 : vector<1x2x1xf32> to vector<2x1xf32>
    %c0_91 = arith.constant 0 : index
    %c127 = arith.constant 127 : index
    %169 = vector.load %arg10[%c0_91, %c127] : memref<2x435xf32, #tpu.memory_space<vmem>>, vector<2x256xf32>
    %170 = vector.broadcast %168 : vector<2x1xf32> to vector<2x256xf32>
    %171 = arith.mulf %170, %169 : vector<2x256xf32>
    %172 = arith.addf %166, %171 : vector<2x256xf32>
    %c30 = arith.constant 30 : index
    %c0_92 = arith.constant 0 : index
    %c0_93 = arith.constant 0 : index
    %173 = vector.load %arg6[%c30, %c0_92, %c0_93] : memref<49x2x1xf32, #tpu.memory_space<vmem>>, vector<1x2x1xf32>
    %174 = vector.shape_cast %173 : vector<1x2x1xf32> to vector<2x1xf32>
    %c0_94 = arith.constant 0 : index
    %c143 = arith.constant 143 : index
    %175 = vector.load %arg10[%c0_94, %c143] : memref<2x435xf32, #tpu.memory_space<vmem>>, vector<2x256xf32>
    %176 = vector.broadcast %174 : vector<2x1xf32> to vector<2x256xf32>
    %177 = arith.mulf %176, %175 : vector<2x256xf32>
    %178 = arith.addf %172, %177 : vector<2x256xf32>
    %c37 = arith.constant 37 : index
    %c0_95 = arith.constant 0 : index
    %c0_96 = arith.constant 0 : index
    %179 = vector.load %arg6[%c37, %c0_95, %c0_96] : memref<49x2x1xf32, #tpu.memory_space<vmem>>, vector<1x2x1xf32>
    %180 = vector.shape_cast %179 : vector<1x2x1xf32> to vector<2x1xf32>
    %c0_97 = arith.constant 0 : index
    %c159 = arith.constant 159 : index
    %181 = vector.load %arg10[%c0_97, %c159] : memref<2x435xf32, #tpu.memory_space<vmem>>, vector<2x256xf32>
    %182 = vector.broadcast %180 : vector<2x1xf32> to vector<2x256xf32>
    %183 = arith.mulf %182, %181 : vector<2x256xf32>
    %184 = arith.addf %178, %183 : vector<2x256xf32>
    %c44 = arith.constant 44 : index
    %c0_98 = arith.constant 0 : index
    %c0_99 = arith.constant 0 : index
    %185 = vector.load %arg6[%c44, %c0_98, %c0_99] : memref<49x2x1xf32, #tpu.memory_space<vmem>>, vector<1x2x1xf32>
    %186 = vector.shape_cast %185 : vector<1x2x1xf32> to vector<2x1xf32>
    %c0_100 = arith.constant 0 : index
    %c175 = arith.constant 175 : index
    %187 = vector.load %arg10[%c0_100, %c175] : memref<2x435xf32, #tpu.memory_space<vmem>>, vector<2x256xf32>
    %188 = vector.broadcast %186 : vector<2x1xf32> to vector<2x256xf32>
    %189 = arith.mulf %188, %187 : vector<2x256xf32>
    %190 = arith.addf %184, %189 : vector<2x256xf32>
    %c2_101 = arith.constant 2 : index
    %c0_102 = arith.constant 0 : index
    %191 = vector.load %arg7[%c2_101, %c0_102] : memref<7x256xf32, #tpu.memory_space<vmem>>, vector<1x256xf32>
    %192 = vector.broadcast %191 : vector<1x256xf32> to vector<2x256xf32>
    %193 = arith.mulf %190, %192 : vector<2x256xf32>
    %194 = arith.addf %147, %193 : vector<2x256xf32>
    %cst_103 = arith.constant 0.000000e+00 : f32
    %195 = vector.broadcast %cst_103 : f32 to vector<2x256xf32>
    %c3 = arith.constant 3 : index
    %c0_104 = arith.constant 0 : index
    %c0_105 = arith.constant 0 : index
    %196 = vector.load %arg6[%c3, %c0_104, %c0_105] : memref<49x2x1xf32, #tpu.memory_space<vmem>>, vector<1x2x1xf32>
    %197 = vector.shape_cast %196 : vector<1x2x1xf32> to vector<2x1xf32>
    %c0_106 = arith.constant 0 : index
    %c80 = arith.constant 80 : index
    %198 = vector.load %arg10[%c0_106, %c80] : memref<2x435xf32, #tpu.memory_space<vmem>>, vector<2x256xf32>
    %199 = vector.broadcast %197 : vector<2x1xf32> to vector<2x256xf32>
    %200 = arith.mulf %199, %198 : vector<2x256xf32>
    %201 = arith.addf %195, %200 : vector<2x256xf32>
    %c10 = arith.constant 10 : index
    %c0_107 = arith.constant 0 : index
    %c0_108 = arith.constant 0 : index
    %202 = vector.load %arg6[%c10, %c0_107, %c0_108] : memref<49x2x1xf32, #tpu.memory_space<vmem>>, vector<1x2x1xf32>
    %203 = vector.shape_cast %202 : vector<1x2x1xf32> to vector<2x1xf32>
    %c0_109 = arith.constant 0 : index
    %c96 = arith.constant 96 : index
    %204 = vector.load %arg10[%c0_109, %c96] : memref<2x435xf32, #tpu.memory_space<vmem>>, vector<2x256xf32>
    %205 = vector.broadcast %203 : vector<2x1xf32> to vector<2x256xf32>
    %206 = arith.mulf %205, %204 : vector<2x256xf32>
    %207 = arith.addf %201, %206 : vector<2x256xf32>
    %c17 = arith.constant 17 : index
    %c0_110 = arith.constant 0 : index
    %c0_111 = arith.constant 0 : index
    %208 = vector.load %arg6[%c17, %c0_110, %c0_111] : memref<49x2x1xf32, #tpu.memory_space<vmem>>, vector<1x2x1xf32>
    %209 = vector.shape_cast %208 : vector<1x2x1xf32> to vector<2x1xf32>
    %c0_112 = arith.constant 0 : index
    %c112 = arith.constant 112 : index
    %210 = vector.load %arg10[%c0_112, %c112] : memref<2x435xf32, #tpu.memory_space<vmem>>, vector<2x256xf32>
    %211 = vector.broadcast %209 : vector<2x1xf32> to vector<2x256xf32>
    %212 = arith.mulf %211, %210 : vector<2x256xf32>
    %213 = arith.addf %207, %212 : vector<2x256xf32>
    %c24 = arith.constant 24 : index
    %c0_113 = arith.constant 0 : index
    %c0_114 = arith.constant 0 : index
    %214 = vector.load %arg6[%c24, %c0_113, %c0_114] : memref<49x2x1xf32, #tpu.memory_space<vmem>>, vector<1x2x1xf32>
    %215 = vector.shape_cast %214 : vector<1x2x1xf32> to vector<2x1xf32>
    %c0_115 = arith.constant 0 : index
    %c128_116 = arith.constant 128 : index
    %216 = vector.load %arg10[%c0_115, %c128_116] : memref<2x435xf32, #tpu.memory_space<vmem>>, vector<2x256xf32>
    %217 = vector.broadcast %215 : vector<2x1xf32> to vector<2x256xf32>
    %218 = arith.mulf %217, %216 : vector<2x256xf32>
    %219 = arith.addf %213, %218 : vector<2x256xf32>
    %c31 = arith.constant 31 : index
    %c0_117 = arith.constant 0 : index
    %c0_118 = arith.constant 0 : index
    %220 = vector.load %arg6[%c31, %c0_117, %c0_118] : memref<49x2x1xf32, #tpu.memory_space<vmem>>, vector<1x2x1xf32>
    %221 = vector.shape_cast %220 : vector<1x2x1xf32> to vector<2x1xf32>
    %c0_119 = arith.constant 0 : index
    %c144 = arith.constant 144 : index
    %222 = vector.load %arg10[%c0_119, %c144] : memref<2x435xf32, #tpu.memory_space<vmem>>, vector<2x256xf32>
    %223 = vector.broadcast %221 : vector<2x1xf32> to vector<2x256xf32>
    %224 = arith.mulf %223, %222 : vector<2x256xf32>
    %225 = arith.addf %219, %224 : vector<2x256xf32>
    %c38 = arith.constant 38 : index
    %c0_120 = arith.constant 0 : index
    %c0_121 = arith.constant 0 : index
    %226 = vector.load %arg6[%c38, %c0_120, %c0_121] : memref<49x2x1xf32, #tpu.memory_space<vmem>>, vector<1x2x1xf32>
    %227 = vector.shape_cast %226 : vector<1x2x1xf32> to vector<2x1xf32>
    %c0_122 = arith.constant 0 : index
    %c160 = arith.constant 160 : index
    %228 = vector.load %arg10[%c0_122, %c160] : memref<2x435xf32, #tpu.memory_space<vmem>>, vector<2x256xf32>
    %229 = vector.broadcast %227 : vector<2x1xf32> to vector<2x256xf32>
    %230 = arith.mulf %229, %228 : vector<2x256xf32>
    %231 = arith.addf %225, %230 : vector<2x256xf32>
    %c45 = arith.constant 45 : index
    %c0_123 = arith.constant 0 : index
    %c0_124 = arith.constant 0 : index
    %232 = vector.load %arg6[%c45, %c0_123, %c0_124] : memref<49x2x1xf32, #tpu.memory_space<vmem>>, vector<1x2x1xf32>
    %233 = vector.shape_cast %232 : vector<1x2x1xf32> to vector<2x1xf32>
    %c0_125 = arith.constant 0 : index
    %c176 = arith.constant 176 : index
    %234 = vector.load %arg10[%c0_125, %c176] : memref<2x435xf32, #tpu.memory_space<vmem>>, vector<2x256xf32>
    %235 = vector.broadcast %233 : vector<2x1xf32> to vector<2x256xf32>
    %236 = arith.mulf %235, %234 : vector<2x256xf32>
    %237 = arith.addf %231, %236 : vector<2x256xf32>
    %238 = arith.addf %194, %237 : vector<2x256xf32>
    %cst_126 = arith.constant 0.000000e+00 : f32
    %239 = vector.broadcast %cst_126 : f32 to vector<2x256xf32>
    %c4 = arith.constant 4 : index
    %c0_127 = arith.constant 0 : index
    %c0_128 = arith.constant 0 : index
    %240 = vector.load %arg6[%c4, %c0_127, %c0_128] : memref<49x2x1xf32, #tpu.memory_space<vmem>>, vector<1x2x1xf32>
    %241 = vector.shape_cast %240 : vector<1x2x1xf32> to vector<2x1xf32>
    %c0_129 = arith.constant 0 : index
    %c81 = arith.constant 81 : index
    %242 = vector.load %arg10[%c0_129, %c81] : memref<2x435xf32, #tpu.memory_space<vmem>>, vector<2x256xf32>
    %243 = vector.broadcast %241 : vector<2x1xf32> to vector<2x256xf32>
    %244 = arith.mulf %243, %242 : vector<2x256xf32>
    %245 = arith.addf %239, %244 : vector<2x256xf32>
    %c11 = arith.constant 11 : index
    %c0_130 = arith.constant 0 : index
    %c0_131 = arith.constant 0 : index
    %246 = vector.load %arg6[%c11, %c0_130, %c0_131] : memref<49x2x1xf32, #tpu.memory_space<vmem>>, vector<1x2x1xf32>
    %247 = vector.shape_cast %246 : vector<1x2x1xf32> to vector<2x1xf32>
    %c0_132 = arith.constant 0 : index
    %c97 = arith.constant 97 : index
    %248 = vector.load %arg10[%c0_132, %c97] : memref<2x435xf32, #tpu.memory_space<vmem>>, vector<2x256xf32>
    %249 = vector.broadcast %247 : vector<2x1xf32> to vector<2x256xf32>
    %250 = arith.mulf %249, %248 : vector<2x256xf32>
    %251 = arith.addf %245, %250 : vector<2x256xf32>
    %c18 = arith.constant 18 : index
    %c0_133 = arith.constant 0 : index
    %c0_134 = arith.constant 0 : index
    %252 = vector.load %arg6[%c18, %c0_133, %c0_134] : memref<49x2x1xf32, #tpu.memory_space<vmem>>, vector<1x2x1xf32>
    %253 = vector.shape_cast %252 : vector<1x2x1xf32> to vector<2x1xf32>
    %c0_135 = arith.constant 0 : index
    %c113 = arith.constant 113 : index
    %254 = vector.load %arg10[%c0_135, %c113] : memref<2x435xf32, #tpu.memory_space<vmem>>, vector<2x256xf32>
    %255 = vector.broadcast %253 : vector<2x1xf32> to vector<2x256xf32>
    %256 = arith.mulf %255, %254 : vector<2x256xf32>
    %257 = arith.addf %251, %256 : vector<2x256xf32>
    %c25 = arith.constant 25 : index
    %c0_136 = arith.constant 0 : index
    %c0_137 = arith.constant 0 : index
    %258 = vector.load %arg6[%c25, %c0_136, %c0_137] : memref<49x2x1xf32, #tpu.memory_space<vmem>>, vector<1x2x1xf32>
    %259 = vector.shape_cast %258 : vector<1x2x1xf32> to vector<2x1xf32>
    %c0_138 = arith.constant 0 : index
    %c129 = arith.constant 129 : index
    %260 = vector.load %arg10[%c0_138, %c129] : memref<2x435xf32, #tpu.memory_space<vmem>>, vector<2x256xf32>
    %261 = vector.broadcast %259 : vector<2x1xf32> to vector<2x256xf32>
    %262 = arith.mulf %261, %260 : vector<2x256xf32>
    %263 = arith.addf %257, %262 : vector<2x256xf32>
    %c32 = arith.constant 32 : index
    %c0_139 = arith.constant 0 : index
    %c0_140 = arith.constant 0 : index
    %264 = vector.load %arg6[%c32, %c0_139, %c0_140] : memref<49x2x1xf32, #tpu.memory_space<vmem>>, vector<1x2x1xf32>
    %265 = vector.shape_cast %264 : vector<1x2x1xf32> to vector<2x1xf32>
    %c0_141 = arith.constant 0 : index
    %c145 = arith.constant 145 : index
    %266 = vector.load %arg10[%c0_141, %c145] : memref<2x435xf32, #tpu.memory_space<vmem>>, vector<2x256xf32>
    %267 = vector.broadcast %265 : vector<2x1xf32> to vector<2x256xf32>
    %268 = arith.mulf %267, %266 : vector<2x256xf32>
    %269 = arith.addf %263, %268 : vector<2x256xf32>
    %c39 = arith.constant 39 : index
    %c0_142 = arith.constant 0 : index
    %c0_143 = arith.constant 0 : index
    %270 = vector.load %arg6[%c39, %c0_142, %c0_143] : memref<49x2x1xf32, #tpu.memory_space<vmem>>, vector<1x2x1xf32>
    %271 = vector.shape_cast %270 : vector<1x2x1xf32> to vector<2x1xf32>
    %c0_144 = arith.constant 0 : index
    %c161 = arith.constant 161 : index
    %272 = vector.load %arg10[%c0_144, %c161] : memref<2x435xf32, #tpu.memory_space<vmem>>, vector<2x256xf32>
    %273 = vector.broadcast %271 : vector<2x1xf32> to vector<2x256xf32>
    %274 = arith.mulf %273, %272 : vector<2x256xf32>
    %275 = arith.addf %269, %274 : vector<2x256xf32>
    %c46 = arith.constant 46 : index
    %c0_145 = arith.constant 0 : index
    %c0_146 = arith.constant 0 : index
    %276 = vector.load %arg6[%c46, %c0_145, %c0_146] : memref<49x2x1xf32, #tpu.memory_space<vmem>>, vector<1x2x1xf32>
    %277 = vector.shape_cast %276 : vector<1x2x1xf32> to vector<2x1xf32>
    %c0_147 = arith.constant 0 : index
    %c177 = arith.constant 177 : index
    %278 = vector.load %arg10[%c0_147, %c177] : memref<2x435xf32, #tpu.memory_space<vmem>>, vector<2x256xf32>
    %279 = vector.broadcast %277 : vector<2x1xf32> to vector<2x256xf32>
    %280 = arith.mulf %279, %278 : vector<2x256xf32>
    %281 = arith.addf %275, %280 : vector<2x256xf32>
    %c4_148 = arith.constant 4 : index
    %c0_149 = arith.constant 0 : index
    %282 = vector.load %arg7[%c4_148, %c0_149] : memref<7x256xf32, #tpu.memory_space<vmem>>, vector<1x256xf32>
    %283 = vector.broadcast %282 : vector<1x256xf32> to vector<2x256xf32>
    %284 = arith.mulf %281, %283 : vector<2x256xf32>
    %285 = arith.addf %238, %284 : vector<2x256xf32>
    %cst_150 = arith.constant 0.000000e+00 : f32
    %286 = vector.broadcast %cst_150 : f32 to vector<2x256xf32>
    %c5 = arith.constant 5 : index
    %c0_151 = arith.constant 0 : index
    %c0_152 = arith.constant 0 : index
    %287 = vector.load %arg6[%c5, %c0_151, %c0_152] : memref<49x2x1xf32, #tpu.memory_space<vmem>>, vector<1x2x1xf32>
    %288 = vector.shape_cast %287 : vector<1x2x1xf32> to vector<2x1xf32>
    %c0_153 = arith.constant 0 : index
    %c82 = arith.constant 82 : index
    %289 = vector.load %arg10[%c0_153, %c82] : memref<2x435xf32, #tpu.memory_space<vmem>>, vector<2x256xf32>
    %290 = vector.broadcast %288 : vector<2x1xf32> to vector<2x256xf32>
    %291 = arith.mulf %290, %289 : vector<2x256xf32>
    %292 = arith.addf %286, %291 : vector<2x256xf32>
    %c12 = arith.constant 12 : index
    %c0_154 = arith.constant 0 : index
    %c0_155 = arith.constant 0 : index
    %293 = vector.load %arg6[%c12, %c0_154, %c0_155] : memref<49x2x1xf32, #tpu.memory_space<vmem>>, vector<1x2x1xf32>
    %294 = vector.shape_cast %293 : vector<1x2x1xf32> to vector<2x1xf32>
    %c0_156 = arith.constant 0 : index
    %c98 = arith.constant 98 : index
    %295 = vector.load %arg10[%c0_156, %c98] : memref<2x435xf32, #tpu.memory_space<vmem>>, vector<2x256xf32>
    %296 = vector.broadcast %294 : vector<2x1xf32> to vector<2x256xf32>
    %297 = arith.mulf %296, %295 : vector<2x256xf32>
    %298 = arith.addf %292, %297 : vector<2x256xf32>
    %c19 = arith.constant 19 : index
    %c0_157 = arith.constant 0 : index
    %c0_158 = arith.constant 0 : index
    %299 = vector.load %arg6[%c19, %c0_157, %c0_158] : memref<49x2x1xf32, #tpu.memory_space<vmem>>, vector<1x2x1xf32>
    %300 = vector.shape_cast %299 : vector<1x2x1xf32> to vector<2x1xf32>
    %c0_159 = arith.constant 0 : index
    %c114 = arith.constant 114 : index
    %301 = vector.load %arg10[%c0_159, %c114] : memref<2x435xf32, #tpu.memory_space<vmem>>, vector<2x256xf32>
    %302 = vector.broadcast %300 : vector<2x1xf32> to vector<2x256xf32>
    %303 = arith.mulf %302, %301 : vector<2x256xf32>
    %304 = arith.addf %298, %303 : vector<2x256xf32>
    %c26 = arith.constant 26 : index
    %c0_160 = arith.constant 0 : index
    %c0_161 = arith.constant 0 : index
    %305 = vector.load %arg6[%c26, %c0_160, %c0_161] : memref<49x2x1xf32, #tpu.memory_space<vmem>>, vector<1x2x1xf32>
    %306 = vector.shape_cast %305 : vector<1x2x1xf32> to vector<2x1xf32>
    %c0_162 = arith.constant 0 : index
    %c130 = arith.constant 130 : index
    %307 = vector.load %arg10[%c0_162, %c130] : memref<2x435xf32, #tpu.memory_space<vmem>>, vector<2x256xf32>
    %308 = vector.broadcast %306 : vector<2x1xf32> to vector<2x256xf32>
    %309 = arith.mulf %308, %307 : vector<2x256xf32>
    %310 = arith.addf %304, %309 : vector<2x256xf32>
    %c33 = arith.constant 33 : index
    %c0_163 = arith.constant 0 : index
    %c0_164 = arith.constant 0 : index
    %311 = vector.load %arg6[%c33, %c0_163, %c0_164] : memref<49x2x1xf32, #tpu.memory_space<vmem>>, vector<1x2x1xf32>
    %312 = vector.shape_cast %311 : vector<1x2x1xf32> to vector<2x1xf32>
    %c0_165 = arith.constant 0 : index
    %c146 = arith.constant 146 : index
    %313 = vector.load %arg10[%c0_165, %c146] : memref<2x435xf32, #tpu.memory_space<vmem>>, vector<2x256xf32>
    %314 = vector.broadcast %312 : vector<2x1xf32> to vector<2x256xf32>
    %315 = arith.mulf %314, %313 : vector<2x256xf32>
    %316 = arith.addf %310, %315 : vector<2x256xf32>
    %c40 = arith.constant 40 : index
    %c0_166 = arith.constant 0 : index
    %c0_167 = arith.constant 0 : index
    %317 = vector.load %arg6[%c40, %c0_166, %c0_167] : memref<49x2x1xf32, #tpu.memory_space<vmem>>, vector<1x2x1xf32>
    %318 = vector.shape_cast %317 : vector<1x2x1xf32> to vector<2x1xf32>
    %c0_168 = arith.constant 0 : index
    %c162 = arith.constant 162 : index
    %319 = vector.load %arg10[%c0_168, %c162] : memref<2x435xf32, #tpu.memory_space<vmem>>, vector<2x256xf32>
    %320 = vector.broadcast %318 : vector<2x1xf32> to vector<2x256xf32>
    %321 = arith.mulf %320, %319 : vector<2x256xf32>
    %322 = arith.addf %316, %321 : vector<2x256xf32>
    %c47 = arith.constant 47 : index
    %c0_169 = arith.constant 0 : index
    %c0_170 = arith.constant 0 : index
    %323 = vector.load %arg6[%c47, %c0_169, %c0_170] : memref<49x2x1xf32, #tpu.memory_space<vmem>>, vector<1x2x1xf32>
    %324 = vector.shape_cast %323 : vector<1x2x1xf32> to vector<2x1xf32>
    %c0_171 = arith.constant 0 : index
    %c178 = arith.constant 178 : index
    %325 = vector.load %arg10[%c0_171, %c178] : memref<2x435xf32, #tpu.memory_space<vmem>>, vector<2x256xf32>
    %326 = vector.broadcast %324 : vector<2x1xf32> to vector<2x256xf32>
    %327 = arith.mulf %326, %325 : vector<2x256xf32>
    %328 = arith.addf %322, %327 : vector<2x256xf32>
    %c5_172 = arith.constant 5 : index
    %c0_173 = arith.constant 0 : index
    %329 = vector.load %arg7[%c5_172, %c0_173] : memref<7x256xf32, #tpu.memory_space<vmem>>, vector<1x256xf32>
    %330 = vector.broadcast %329 : vector<1x256xf32> to vector<2x256xf32>
    %331 = arith.mulf %328, %330 : vector<2x256xf32>
    %332 = arith.addf %285, %331 : vector<2x256xf32>
    %cst_174 = arith.constant 0.000000e+00 : f32
    %333 = vector.broadcast %cst_174 : f32 to vector<2x256xf32>
    %c6 = arith.constant 6 : index
    %c0_175 = arith.constant 0 : index
    %c0_176 = arith.constant 0 : index
    %334 = vector.load %arg6[%c6, %c0_175, %c0_176] : memref<49x2x1xf32, #tpu.memory_space<vmem>>, vector<1x2x1xf32>
    %335 = vector.shape_cast %334 : vector<1x2x1xf32> to vector<2x1xf32>
    %c0_177 = arith.constant 0 : index
    %c83 = arith.constant 83 : index
    %336 = vector.load %arg10[%c0_177, %c83] : memref<2x435xf32, #tpu.memory_space<vmem>>, vector<2x256xf32>
    %337 = vector.broadcast %335 : vector<2x1xf32> to vector<2x256xf32>
    %338 = arith.mulf %337, %336 : vector<2x256xf32>
    %339 = arith.addf %333, %338 : vector<2x256xf32>
    %c13 = arith.constant 13 : index
    %c0_178 = arith.constant 0 : index
    %c0_179 = arith.constant 0 : index
    %340 = vector.load %arg6[%c13, %c0_178, %c0_179] : memref<49x2x1xf32, #tpu.memory_space<vmem>>, vector<1x2x1xf32>
    %341 = vector.shape_cast %340 : vector<1x2x1xf32> to vector<2x1xf32>
    %c0_180 = arith.constant 0 : index
    %c99 = arith.constant 99 : index
    %342 = vector.load %arg10[%c0_180, %c99] : memref<2x435xf32, #tpu.memory_space<vmem>>, vector<2x256xf32>
    %343 = vector.broadcast %341 : vector<2x1xf32> to vector<2x256xf32>
    %344 = arith.mulf %343, %342 : vector<2x256xf32>
    %345 = arith.addf %339, %344 : vector<2x256xf32>
    %c20 = arith.constant 20 : index
    %c0_181 = arith.constant 0 : index
    %c0_182 = arith.constant 0 : index
    %346 = vector.load %arg6[%c20, %c0_181, %c0_182] : memref<49x2x1xf32, #tpu.memory_space<vmem>>, vector<1x2x1xf32>
    %347 = vector.shape_cast %346 : vector<1x2x1xf32> to vector<2x1xf32>
    %c0_183 = arith.constant 0 : index
    %c115 = arith.constant 115 : index
    %348 = vector.load %arg10[%c0_183, %c115] : memref<2x435xf32, #tpu.memory_space<vmem>>, vector<2x256xf32>
    %349 = vector.broadcast %347 : vector<2x1xf32> to vector<2x256xf32>
    %350 = arith.mulf %349, %348 : vector<2x256xf32>
    %351 = arith.addf %345, %350 : vector<2x256xf32>
    %c27 = arith.constant 27 : index
    %c0_184 = arith.constant 0 : index
    %c0_185 = arith.constant 0 : index
    %352 = vector.load %arg6[%c27, %c0_184, %c0_185] : memref<49x2x1xf32, #tpu.memory_space<vmem>>, vector<1x2x1xf32>
    %353 = vector.shape_cast %352 : vector<1x2x1xf32> to vector<2x1xf32>
    %c0_186 = arith.constant 0 : index
    %c131 = arith.constant 131 : index
    %354 = vector.load %arg10[%c0_186, %c131] : memref<2x435xf32, #tpu.memory_space<vmem>>, vector<2x256xf32>
    %355 = vector.broadcast %353 : vector<2x1xf32> to vector<2x256xf32>
    %356 = arith.mulf %355, %354 : vector<2x256xf32>
    %357 = arith.addf %351, %356 : vector<2x256xf32>
    %c34 = arith.constant 34 : index
    %c0_187 = arith.constant 0 : index
    %c0_188 = arith.constant 0 : index
    %358 = vector.load %arg6[%c34, %c0_187, %c0_188] : memref<49x2x1xf32, #tpu.memory_space<vmem>>, vector<1x2x1xf32>
    %359 = vector.shape_cast %358 : vector<1x2x1xf32> to vector<2x1xf32>
    %c0_189 = arith.constant 0 : index
    %c147 = arith.constant 147 : index
    %360 = vector.load %arg10[%c0_189, %c147] : memref<2x435xf32, #tpu.memory_space<vmem>>, vector<2x256xf32>
    %361 = vector.broadcast %359 : vector<2x1xf32> to vector<2x256xf32>
    %362 = arith.mulf %361, %360 : vector<2x256xf32>
    %363 = arith.addf %357, %362 : vector<2x256xf32>
    %c41 = arith.constant 41 : index
    %c0_190 = arith.constant 0 : index
    %c0_191 = arith.constant 0 : index
    %364 = vector.load %arg6[%c41, %c0_190, %c0_191] : memref<49x2x1xf32, #tpu.memory_space<vmem>>, vector<1x2x1xf32>
    %365 = vector.shape_cast %364 : vector<1x2x1xf32> to vector<2x1xf32>
    %c0_192 = arith.constant 0 : index
    %c163 = arith.constant 163 : index
    %366 = vector.load %arg10[%c0_192, %c163] : memref<2x435xf32, #tpu.memory_space<vmem>>, vector<2x256xf32>
    %367 = vector.broadcast %365 : vector<2x1xf32> to vector<2x256xf32>
    %368 = arith.mulf %367, %366 : vector<2x256xf32>
    %369 = arith.addf %363, %368 : vector<2x256xf32>
    %c48 = arith.constant 48 : index
    %c0_193 = arith.constant 0 : index
    %c0_194 = arith.constant 0 : index
    %370 = vector.load %arg6[%c48, %c0_193, %c0_194] : memref<49x2x1xf32, #tpu.memory_space<vmem>>, vector<1x2x1xf32>
    %371 = vector.shape_cast %370 : vector<1x2x1xf32> to vector<2x1xf32>
    %c0_195 = arith.constant 0 : index
    %c179 = arith.constant 179 : index
    %372 = vector.load %arg10[%c0_195, %c179] : memref<2x435xf32, #tpu.memory_space<vmem>>, vector<2x256xf32>
    %373 = vector.broadcast %371 : vector<2x1xf32> to vector<2x256xf32>
    %374 = arith.mulf %373, %372 : vector<2x256xf32>
    %375 = arith.addf %369, %374 : vector<2x256xf32>
    %c6_196 = arith.constant 6 : index
    %c0_197 = arith.constant 0 : index
    %376 = vector.load %arg7[%c6_196, %c0_197] : memref<7x256xf32, #tpu.memory_space<vmem>>, vector<1x256xf32>
    %377 = vector.broadcast %376 : vector<1x256xf32> to vector<2x256xf32>
    %378 = arith.mulf %375, %377 : vector<2x256xf32>
    %379 = arith.addf %332, %378 : vector<2x256xf32>
    %380 = vector.extract_strided_slice %379 {offsets = [0, 0], sizes = [1, 256], strides = [1, 1]} : vector<2x256xf32> to vector<1x256xf32>
    %381 = vector.extract_strided_slice %379 {offsets = [1, 0], sizes = [1, 256], strides = [1, 1]} : vector<2x256xf32> to vector<1x256xf32>
    %382 = arith.addf %380, %381 : vector<1x256xf32>
    %383 = vector.broadcast %0 : f32 to vector<1x256xf32>
    %384 = arith.addf %382, %383 : vector<1x256xf32>
    %385 = arith.negf %384 : vector<1x256xf32>
    %386 = math.exp %385 : vector<1x256xf32>
    %cst_198 = arith.constant 1.000000e+00 : f32
    %387 = vector.broadcast %cst_198 : f32 to vector<1x256xf32>
    %388 = arith.addf %387, %386 : vector<1x256xf32>
    %389 = arith.divf %387, %388 : vector<1x256xf32>
    %390 = math.exp %389 : vector<1x256xf32>
    %391 = vector.broadcast %42 : vector<32x1xf32> to vector<32x256xf32>
    %392 = arith.mulf %8, %391 : vector<32x256xf32>
    %393 = vector.broadcast %390 : vector<1x256xf32> to vector<32x256xf32>
    %394 = arith.mulf %392, %393 : vector<32x256xf32>
    %395 = arith.addf %394, %8 : vector<32x256xf32>
    %c0_199 = arith.constant 0 : index
    %c0_200 = arith.constant 0 : index
    %c0_201 = arith.constant 0 : index
    %396 = vector.load %arg9[%c0_199, %c0_200, %c0_201] : memref<1x32x256xf32, #tpu.memory_space<vmem>>, vector<1x32x256xf32>
    %397 = vector.shape_cast %396 : vector<1x32x256xf32> to vector<32x256xf32>
    %398 = vector.shape_cast %395 : vector<32x256xf32> to vector<1x32x256xf32>
    tpu.vector_store %arg9[%c0_199, %c0_200, %c0_201], %398 {strides = array<i32>} : memref<1x32x256xf32, #tpu.memory_space<vmem>>, vector<1x32x256xf32>,
    return
  }
  func.func @transform_0(%arg0: i32) -> (i32, i32, i32) {
    %c0_i32 = arith.constant 0 : i32
    %c0_i32_0 = arith.constant 0 : i32
    %c0_i32_1 = arith.constant 0 : i32
    return %arg0, %c0_i32, %c0_i32_0 : i32, i32, i32
  }
  func.func @transform_1(%arg0: i32) -> (i32, i32) {
    %c0_i32 = arith.constant 0 : i32
    %c0_i32_0 = arith.constant 0 : i32
    %c0_i32_1 = arith.constant 0 : i32
    return %c0_i32, %c0_i32_0 : i32, i32
  }
  func.func @transform_2(%arg0: i32) -> (i32, i32) {
    %c0_i32 = arith.constant 0 : i32
    %c0_i32_0 = arith.constant 0 : i32
    %c0_i32_1 = arith.constant 0 : i32
    return %c0_i32, %c0_i32_0 : i32, i32
  }
  func.func @transform_3(%arg0: i32) -> (i32, i32) {
    %c0_i32 = arith.constant 0 : i32
    %c0_i32_0 = arith.constant 0 : i32
    %c0_i32_1 = arith.constant 0 : i32
    return %c0_i32, %c0_i32_0 : i32, i32
  }
  func.func @transform_4(%arg0: i32) -> (i32, i32) {
    %c0_i32 = arith.constant 0 : i32
    %c0_i32_0 = arith.constant 0 : i32
    %c0_i32_1 = arith.constant 0 : i32
    return %c0_i32, %c0_i32_0 : i32, i32
  }
  func.func @transform_5(%arg0: i32) -> (i32, i32, i32) {
    %c0_i32 = arith.constant 0 : i32
    %c0_i32_0 = arith.constant 0 : i32
    %c0_i32_1 = arith.constant 0 : i32
    %c0_i32_2 = arith.constant 0 : i32
    return %c0_i32, %c0_i32_0, %c0_i32_1 : i32, i32, i32
  }
  func.func @transform_6(%arg0: i32) -> (i32, i32) {
    %c0_i32 = arith.constant 0 : i32
    %c0_i32_0 = arith.constant 0 : i32
    %c0_i32_1 = arith.constant 0 : i32
    return %c0_i32, %c0_i32_0 : i32, i32
  }
  func.func @transform_7(%arg0: i32) -> i32 {
    %c0_i32 = arith.constant 0 : i32
    %c0_i32_0 = arith.constant 0 : i32
    return %c0_i32 : i32
  }
  func.func @transform_8(%arg0: i32) -> (i32, i32, i32) {
    %c0_i32 = arith.constant 0 : i32
    %c0_i32_0 = arith.constant 0 : i32
    %c0_i32_1 = arith.constant 0 : i32
    return %arg0, %c0_i32, %c0_i32_0 : i32, i32, i32
  }
}

</mosaic_0001>

<bundles_post_ra>
// kernel: tpu_custom_call.1
= control target key start
LH: loop header
LB: loop body
LE: loop exit
PB: predicated region body
PF: predicated region fallthrough
CT: control target
= control target key end

     0   :  { %s5134_s0 = inlined_call_operand.vmem [shape: f32[2,32,256], index: 0, kind: input, shape index: {}]   ;;  %s5135_s1 = inlined_call_operand.vmem [shape: f32[32,2], index: 1, kind: input, shape index: {}]   ;;  %s5136_s2 = inlined_call_operand.vmem [shape: f32[1,2], index: 2, kind: input, shape index: {}]   ;;  %s5137_s3 = inlined_call_operand.vmem [shape: f32[32,2], index: 3, kind: input, shape index: {}]   ;;  %s5138_s4 = inlined_call_operand.vmem [shape: f32[32,1], index: 4, kind: input, shape index: {}]   ;;  %s5139_s5 = inlined_call_operand.vmem [shape: f32[49,2,1], index: 5, kind: input, shape index: {}]   ;;  %s5140_s6 = inlined_call_operand.vmem [shape: f32[7,256], index: 6, kind: input, shape index: {}]   ;;  %s5141_s7 = inlined_call_operand.<no memory space> [shape: f32[1], index: 7, kind: input, shape index: {}]   ;;  %s5142_s8 = inlined_call_operand.hbm [shape: f32[2,32,256], index: 8, kind: output, shape index: {}]  }
   0x1   :  { %5294 = sst [smem:[#allocation117_spill]] %s5134_s0 }
   0x2   :  { %5295 = sst [smem:[#allocation118_spill]] %s5135_s1 }
   0x3   :  { %5296 = sst [smem:[#allocation119_spill]] %s5136_s2 }
   0x4   :  { %13 = sst [smem:[#allocation3]] %s5141_s7 }
   0x5   :  { %14 = vsyncpa [#allocation5], 0 }
   0x6   :  { %16 = vsyncpa [#allocation5 + $0x1], 0  ;;  %s3180_s29 = smov 0   ;;  %s3182_s30 = smov 0  }
   0x7   :  { %s3184_s9 = smov 0   ;;  %s3186_s10 = smov 0  }
   0x8 LB: > { %s3201_s7 = sadd.s32 4294967295, %s3076_s10   ;;  %s2754_s11 = sadd.s32 4294967294, %s3076_s10   ;;  %s3076_s10 = sphi %s3186_s10, %s5600_s10   ;;  %s3072_s9 = sphi %s3184_s9, %s5599_s9   ;;  %s3068_s30 = sphi %s3182_s30, %s5598_s30   ;;  %s3064_s29 = sphi %s3180_s29, %s5597_s29  }
   0x9   : > { %s3205_s12 = sadd.s32 1, %s3076_s10   ;;  %s202_s13 = sadd.s32 1, %s3072_s9 }
   0xa   : > { %s199_s14 = ssub.s32 %s3076_s10, %s3205_s12  ;;  %p212_p0 = scmp.ne.s32.totalorder %s3072_s9, %s3068_s30 }
   0xb   : > { %p200_p1 = scmp.eq.s32.totalorder %s199_s14, 0  ;;  %p213_p2 = scmp.eq.s32.totalorder %s3201_s7, 1 }
   0xc   : > { %p218_p3 = scmp.ne.s32.totalorder %s3068_s30, %s3064_s29  ;;  %p219_p4 = scmp.eq.s32.totalorder %s2754_s11, 1 }
   0xd   : > { %s3216_s15 = scalar_select %p200_p1, %s3072_s9, %s202_s13  }
   0xe   : > { %p3218_p5 = por %p213_p2, %p212_p0  ;;  %p3222_p6 = por %p219_p4, %p218_p3 }
   0xf   : > { %p2757_p7 = scmp.ge.s32.totalorder %s3076_s10, 1  ;;  %p266_p8 = scmp.lt.s32.totalorder %s3076_s10, 3 }
  0x11   : > { %p267_p9 = pnand %p2757_p7, %p266_p8 }
  0x13   : > { %270 = sbr.rel (%p267_p9) target bundleno = 1077 (0x435), region = 52 }
  0x1a   : > { %p300_p10 = scmp.lt.s32.totalorder %s3201_s7, 1  ;;  %v3078_v0 = vmov 0   ;;  %s5299_s0 = sld [smem:[#allocation117_spill]]  ;;  %v575_v17 = vld [vmem:[%s5139_s5] sm:$0x3]  ;;  %vm368_vm0 = vcmask 15360  }
  0x1b   : > { %2920 = vset.pattern.permute.xlu1 %v3078_v0  ;;  %2921 = vset.pattern.permute.xlu0 %v3078_v0  ;;  %v2765_v18 = vld [vmem:[%s5139_s5 + $0xe] sm:$0x3]  ;;  %v2792_v19 = vld [vmem:[%s5139_s5 + $0x3e] sm:$0x3]  ;;  %v2766_v20 = vld [vmem:[%s5139_s5 + $0x1c] sm:$0x3] }
  0x1c   : > { %s301_s18 = scalar_select %p300_p10, %s3201_s7, 1  ;;  %v2793_v21 = vld [vmem:[%s5139_s5 + $0x4c] sm:$0x3]  ;;  %v2767_v22 = vld [vmem:[%s5139_s5 + $0x2a] sm:$0x3]  ;;  %vm319_vm1 = vcmask 1041408  }
  0x1d   : > { %v2794_v23 = vld [vmem:[%s5139_s5 + $0x5a] sm:$0x3]  ;;  %v2768_v24 = vld [vmem:[%s5139_s5 + $0x38] sm:$0x3]  ;;  %v2795_v25 = vld [vmem:[%s5139_s5 + $0x8] sm:$0x3] }
  0x1e   : > { %s2826_s19 = sshll.u32 %s301_s18, 6  ;;  %v2769_v26 = vld [vmem:[%s5139_s5 + $0x46] sm:$0x3]  ;;  %v2796_v27 = vld [vmem:[%s5139_s5 + $0x16] sm:$0x3]  ;;  %s5300_s1 = sld [smem:[#allocation118_spill]] }
  0x1f   : > { %v2770_v28 = vld [vmem:[%s5139_s5 + $0x54] sm:$0x3]  ;;  %v2797_v29 = vld [vmem:[%s5139_s5 + $0x24] sm:$0x3]  ;;  %v2771_v30 = vld [vmem:[%s5139_s5 + $0x2] sm:$0x3] }
  0x20   : > { %s3233_s22 = scalar_lea.vmem %s5299_s0, %s2826_s19  ;;  %v2798_v31 = vld [vmem:[%s5139_s5 + $0x32] sm:$0x3]  ;;  %v2772_v32 = vld [vmem:[%s5139_s5 + $0x10] sm:$0x3]  ;;  %v2799_v33 = vld [vmem:[%s5139_s5 + $0x40] sm:$0x3] }
  0x21   : > { %v3236_v1 = vld [vmem:[%s3233_s22 + $0x20] sm:$0xff]  ;;  %v3239_v2 = vld [vmem:[%s3233_s22 + $0x28] sm:$0xff]  ;;  %v3250_v6 = vld [vmem:[%s3233_s22 + $0x30] sm:$0xff]  ;;  %s5304_s2 = sld [smem:[#allocation119_spill]]  ;;  %vm320_vm2 = vcmask 1043458   ;;  %vm322_vm3 = vcmask 1045508  }
  0x22   : > { %v3242_v3 = vld [vmem:[%s3233_s22] sm:$0xff]  ;;  %v341_v4 = vadd.f32 %v3239_v2, %v3236_v1  ;;  %v3247_v5 = vld [vmem:[%s3233_s22 + $0x8] sm:$0xff]  ;;  %v3253_v7 = vld [vmem:[%s3233_s22 + $0x38] sm:$0xff]  ;;  %v358_v16 = vmax.f32 %v3236_v1, %v3239_v2  ;;  %vm324_vm4 = vcmask 416774   ;;  %s3082_s13 = smov 35   ;;  %s3083_s14 = smov 51  }
  0x23   : > { %v335_v8 = vadd.f32 %v3247_v5, %v3242_v3  ;;  %v3258_v9 = vld [vmem:[%s3233_s22 + $0x10] sm:$0xff]  ;;  %v3261_v10 = vld [vmem:[%s3233_s22 + $0x18] sm:$0xff]  ;;  %v344_v11 = vadd.f32 %v3253_v7, %v3250_v6  ;;  %v352_v14 = vmax.f32 %v3242_v3, %v3247_v5  ;;  %v361_v15 = vmax.f32 %v3250_v6, %v3253_v7  ;;  %v2800_v35 = vld [vmem:[%s5139_s5 + $0x4e] sm:$0x3]  ;;  %s3084_s18 = smov 19   ;;  %s5232_s19 = smov 112  }
  0x24   : > { %342 = vadd.xlane.f32.xlu1 %v341_v4  ;;  %v338_v12 = vadd.f32 %v3261_v10, %v3258_v9  ;;  %v355_v13 = vmax.f32 %v3258_v9, %v3261_v10  ;;  %v2773_v34 = vld [vmem:[%s5139_s5 + $0x1e] sm:$0x3]  ;;  %v2774_v36 = vld [vmem:[%s5139_s5 + $0x2c] sm:$0x3]  ;;  %v2801_v37 = vld [vmem:[%s5139_s5 + $0x5c] sm:$0x3] }
  0x25   : > { %336 = vadd.xlane.f32.xlu0 %v335_v8  ;;  %v2775_v38 = vld [vmem:[%s5139_s5 + $0x3a] sm:$0x3]  ;;  %v2803_v39 = vld [vmem:[%s5139_s5 + $0xa] sm:$0x3]  ;;  %v2776_v40 = vld [vmem:[%s5139_s5 + $0x48] sm:$0x3] }
  0x26   : > { %v2805_v41 = vld [vmem:[%s5139_s5 + $0x26] sm:$0x3]  ;;  %v2777_v42 = vld [vmem:[%s5139_s5 + $0x56] sm:$0x3]  ;;  %v2812_v43 = vld [vmem:[%s5139_s5 + $0x1a] sm:$0x3] }
  0x27   : > { %v2779_v44 = vld [vmem:[%s5139_s5 + $0x4] sm:$0x3]  ;;  %v2813_v45 = vld [vmem:[%s5139_s5 + $0x28] sm:$0x3]  ;;  %v2780_v46 = vld [vmem:[%s5139_s5 + $0x12] sm:$0x3] }
  0x28   : > { %345 = vadd.xlane.f32.xlu1 %v344_v11  ;;  %v2814_v47 = vld [vmem:[%s5139_s5 + $0x36] sm:$0x3]  ;;  %v2781_v48 = vld [vmem:[%s5139_s5 + $0x20] sm:$0x3]  ;;  %v2808_v49 = vld [vmem:[%s5139_s5 + $0x50] sm:$0x3] }
  0x29   : > { %339 = vadd.xlane.f32.xlu0 %v338_v12  ;;  %v2782_v50 = vld [vmem:[%s5139_s5 + $0x2e] sm:$0x3]  ;;  %v2817_v51 = vld [vmem:[%s5139_s5 + $0x60] sm:$0x3]  ;;  %v2783_v52 = vld [vmem:[%s5139_s5 + $0x3c] sm:$0x3] }
  0x2a   : > { %v2784_v53 = vld [vmem:[%s5139_s5 + $0x4a] sm:$0x3]  ;;  %v2785_v54 = vld [vmem:[%s5139_s5 + $0x58] sm:$0x3]  ;;  %v2787_v55 = vld [vmem:[%s5139_s5 + $0x6] sm:$0x3] }
  0x2b   : > { %v2788_v56 = vld [vmem:[%s5139_s5 + $0x14] sm:$0x3]  ;;  %v2789_v57 = vld [vmem:[%s5139_s5 + $0x22] sm:$0x3]  ;;  %v2790_v58 = vld [vmem:[%s5139_s5 + $0x30] sm:$0x3] }
  0x2c   : > { %356 = vmax.xlane.f32.xlu1 %v355_v13  ;;  %v2804_v59 = vld [vmem:[%s5139_s5 + $0x18] sm:$0x3]  ;;  %v2811_v60 = vld [vmem:[%s5139_s5 + $0xc] sm:$0x3]  ;;  %v2806_v61 = vld [vmem:[%s5139_s5 + $0x34] sm:$0x3] }
  0x2d   : > { %353 = vmax.xlane.f32.xlu0 %v352_v14  ;;  %v2807_v62 = vld [vmem:[%s5139_s5 + $0x42] sm:$0x3]  ;;  %v2815_v4 = vld [vmem:[%s5139_s5 + $0x44] sm:$0x3]  ;;  %vm321_vm5 = vmor %vm320_vm2, %vm319_vm1  ;;  %s3086_s20 = smov 3   ;;  %s5227_s21 = smov 96  }
  0x2e   : > { %v306_v8 = vld [vmem:[%s5300_s1] sm:$0xff]  ;;  %vm323_vm6 = vmor %vm322_vm3, %vm321_vm5  ;;  %s3088_s23 = smov 115   ;;  %s5222_s24 = smov 80   ;;  %vm605_vm9 = vcmask 416768   ;;  %vm645_vm10 = vcmask 285696   ;;  %vm685_vm11 = vcmask 154624  }
  0x2f   : > { %vm325_vm7 = vmor %vm324_vm4, %vm323_vm6  ;;  %s3090_s25 = smov 99   ;;  %s5217_s26 = smov 47   ;;  %vm725_vm12 = vcmask 23552   ;;  %vm765_vm13 = vcmask 941056   ;;  %vm805_vm14 = vcmask 809984   ;;  %vm845_vm15 = vcmask 678912  }
  0x30   : > { %362 = vmax.xlane.f32.xlu1 %v361_v15  ;;  %s3092_s27 = smov 83   ;;  %s5197_s28 = smov 31   ;;  %vm901_vm1 = vcmask 408576   ;;  %vm941_vm2 = vcmask 277504   ;;  %vm981_vm3 = vcmask 146432   ;;  %vm1060_vm4 = vcmask 932864  }
  0x31   : > { %359 = vmax.xlane.f32.xlu0 %v358_v16  ;;  %v2809_v16 = vld [vmem:[%s5139_s5 + $0x5e] sm:$0x3]  ;;  %s3094_s11 = smov 50   ;;  %vm1100_vm5 = vcmask 801792   ;;  %vm1140_vm6 = vcmask 670720   ;;  %s5515_s0 = smov 125  }
  0x41   : > { %579 = vperm.xlu1 %2920, %v575_v17   ;;  %v307_v17 = vld [vmem:[%s5300_s1 + $0x8] sm:$0xff] }
  0x45   : > { %619 = vperm.xlu1 %2920, %v2765_v18   ;;  %v308_v18 = vld [vmem:[%s5300_s1 + $0x10] sm:$0xff] }
  0x47   : > { %1611 = vperm.xlu0 %2921, %v2792_v19  }
  0x49   : > { %659 = vperm.xlu1 %2920, %v2766_v20  }
  0x4b   : > { %1651 = vperm.xlu0 %2921, %v2793_v21   ;;  %v309_v21 = vld [vmem:[%s5300_s1 + $0x18] sm:$0xff]  ;;  %s5518_s1 = smov 94  }
  0x4d   : > { %699 = vperm.xlu1 %2920, %v2767_v22  }
  0x4f   : > { %1691 = vperm.xlu0 %2921, %v2794_v23  }
  0x51   : > { %739 = vperm.xlu1 %2920, %v2768_v24  }
  0x53   : > { %1733 = vperm.xlu0 %2921, %v2795_v25  }
  0x55   : > { %779 = vperm.xlu1 %2920, %v2769_v26  }
  0x57   : > { %1773 = vperm.xlu0 %2921, %v2796_v27  }
  0x59   : > { %819 = vperm.xlu1 %2920, %v2770_v28   ;;  %v2816_v28 = vld [vmem:[%s5139_s5 + $0x52] sm:$0x3] }
  0x5b   : > { %1813 = vperm.xlu0 %2921, %v2797_v29  }
  0x5d   : > { %875 = vperm.xlu1 %2920, %v2771_v30  }
  0x5f   : > { %1853 = vperm.xlu0 %2921, %v2798_v31  }
  0x61   : > { %915 = vperm.xlu1 %2920, %v2772_v32  }
  0x63   : > { %1893 = vperm.xlu0 %2921, %v2799_v33  }
  0x65   : > { %955 = vperm.xlu1 %2920, %v2773_v34  }
  0x67   : > { %1933 = vperm.xlu0 %2921, %v2800_v35  }
  0x69   : > { %995 = vperm.xlu1 %2920, %v2774_v36  }
  0x6b   : > { %1973 = vperm.xlu0 %2921, %v2801_v37  }
  0x6d   : > { %1034 = vperm.xlu1 %2920, %v2775_v38  }
  0x6f   : > { %2030 = vperm.xlu0 %2921, %v2803_v39  }
  0x71   : > { %1074 = vperm.xlu1 %2920, %v2776_v40  }
  0x73   : > { %2110 = vperm.xlu0 %2921, %v2805_v41  }
  0x75   : > { %1114 = vperm.xlu1 %2920, %v2777_v42  }
  0x77   : > { %2367 = vperm.xlu0 %2921, %v2812_v43  }
  0x79   : > { %1171 = vperm.xlu1 %2920, %v2779_v44  }
  0x7b   : > { %2407 = vperm.xlu0 %2921, %v2813_v45  }
  0x7d   : > { %1211 = vperm.xlu1 %2920, %v2780_v46  }
  0x7f   : > { %2447 = vperm.xlu0 %2921, %v2814_v47  }
  0x81   : > { %1251 = vperm.xlu1 %2920, %v2781_v48  }
  0x83   : > { %2230 = vperm.xlu0 %2921, %v2808_v49  }
  0x85   : > { %1291 = vperm.xlu1 %2920, %v2782_v50  }
  0x87   : > { %2567 = vperm.xlu0 %2921, %v2817_v51  }
  0x89   : > { %1331 = vperm.xlu1 %2920, %v2783_v52  }
  0x8d   : > { %1371 = vperm.xlu1 %2920, %v2784_v53  }
  0x91   : > { %1411 = vperm.xlu1 %2920, %v2785_v54  }
  0x95   : > { %1468 = vperm.xlu1 %2920, %v2787_v55  }
  0x99   : > { %1508 = vperm.xlu1 %2920, %v2788_v56  }
  0x9d   : > { %1548 = vperm.xlu1 %2920, %v2789_v57  }
  0xa1   : > { %1588 = vperm.xlu1 %2920, %v2790_v58  }
  0xa5   : > { %2070 = vperm.xlu1 %2920, %v2804_v59  }
  0xa9   : > { %2327 = vperm.xlu1 %2920, %v2811_v60  }
  0xad   : > { %2150 = vperm.xlu1 %2920, %v2806_v61   ;;  %v5143_v61 = vlaneseq }
  0xb1   : > { %v343_v63 = vpop.xlane.xlu1 %342  ;;  %2190 = vperm.xlu1 %2920, %v2807_v62   ;;  %v310_v62 = vld [vmem:[%s5304_s2] sm:$0x1]  ;;  %s5522_s2 = smov 109  }
  0xb2   : > { %v337_v0 = vpop.xlane.xlu0 %336  ;;  %v350_v12 = vmul.f32 0.00390625, %v343_v63 }
  0xb3   : > { %v348_v11 = vmul.f32 0.00390625, %v337_v0 }
  0xb4   : > { %v366_v25 = vmul.f32 %v350_v12, %v308_v18 }
  0xb5   : > { %v346_v13 = vpop.xlane.xlu1 %345  ;;  %2487 = vperm.xlu1 %2920, %v2815_v4   ;;  %v364_v14 = vmul.f32 %v348_v11, %v306_v8  ;;  %v3454_v11 = vshrl.u32 %v5143_v61, 7 }
  0xb6   : > { %v340_v15 = vpop.xlane.xlu0 %339  ;;  %v351_v19 = vmul.f32 0.00390625, %v346_v13  ;;  %v372_v36 = vsel %vm368_vm0, %v366_v25, 0.0 }
  0xb7   : > { %v349_v20 = vmul.f32 0.00390625, %v340_v15  ;;  %v369_v24 = vsel %vm368_vm0, %v364_v14, 0.0  ;;  %5306 = vst [vmem:[#allocation11_spill] sm:$0xff] %v3454_v11 }
  0xb8   : > { %v367_v31 = vmul.f32 %v351_v19, %v309_v21  ;;  %v311_v19 = vld [vmem:[%s5137_s3] sm:$0xff] }
  0xb9   : > { %2270 = vperm.xlu1 %2920, %v2809_v16   ;;  %v357_v22 = vpop.xlane.xlu1 %356  ;;  %v365_v23 = vmul.f32 %v349_v20, %v307_v17  ;;  %v3459_v16 = vsub.s32 0, %v3454_v11 }
  0xba   : > { %v385_v26 = vmul.f32 %v357_v22, %v307_v17  ;;  %v354_v27 = vpop.xlane.xlu0 %353  ;;  %v374_v39 = vsel %vm368_vm0, %v367_v31, 0.0  ;;  %v313_v22 = vld [vmem:[%s5137_s3 + $0x10] sm:$0xff] }
  0xbb   : > { %v370_v29 = vsel %vm368_vm0, %v365_v23, 0.0  ;;  %v384_v30 = vmul.f32 %v354_v27, %v306_v8  ;;  %5308 = vst [vmem:[#allocation13_spill] sm:$0xff] %v3459_v16  ;;  %v312_v23 = vld [vmem:[%s5137_s3 + $0x8] sm:$0xff] }
  0xbc   : > { %v371_v32 = vadd.f32 %v370_v29, %v369_v24  ;;  %v389_v33 = vsel %vm368_vm0, %v385_v26, 0.0  ;;  %v314_v29 = vld [vmem:[%s5137_s3 + $0x18] sm:$0xff] }
  0xbd   : > { %v388_v34 = vsel %vm368_vm0, %v384_v30, 0.0  ;;  %2527 = vperm.xlu1 %2920, %v2816_v28   ;;  %v363_v35 = vpop.xlane.xlu1 %362 }
  0xbe   : > { %v373_v37 = vadd.f32 %v372_v36, %v371_v32  ;;  %v360_v38 = vpop.xlane.xlu0 %359  ;;  %v387_v40 = vmul.f32 %v363_v35, %v309_v21  ;;  %v390_v42 = vadd.f32 %v389_v33, %v388_v34 }
  0xbf   : > { %v386_v41 = vmul.f32 %v360_v38, %v308_v18 }
  0xc0   : > { %v375_v43 = vadd.f32 %v374_v39, %v373_v37  ;;  %v393_v48 = vsel %vm368_vm0, %v387_v40, 0.0 }
  0xc1   : > { %v391_v44 = vsel %vm368_vm0, %v386_v41, 0.0  ;;  %v3441_v45 = vpop.permute.xlu1 %579 }
  0xc2   : > { %5301 = vst [vmem:[#allocation7_spill] sm:$0xff] %v3441_v45  ;;  %v376_v46 = vrot.slane %v375_v43, 4  ;;  %v392_v47 = vadd.f32 %v391_v44, %v390_v42 }
  0xc4   : > { %v377_v49 = vadd.f32 %v376_v46, %v375_v43  ;;  %v394_v50 = vadd.f32 %v393_v48, %v392_v47 }
  0xc5   : > { %v3444_v51 = vpop.permute.xlu1 %619 }
  0xc6   : > { %5302 = vst [vmem:[#allocation8_spill] sm:$0xff] %v3444_v51  ;;  %v378_v52 = vrot.slane %v377_v49, 2  ;;  %v395_v53 = vrot.slane %v394_v50, 4  ;;  %v3498_v41 = vpop.permute.xlu0 %1611 }
  0xc7   : > { %5319 = vst [vmem:[#allocation24_spill] sm:$0xff] %v3498_v41 }
  0xc8   : > { %v379_v54 = vadd.f32 %v378_v52, %v377_v49  ;;  %v396_v55 = vadd.f32 %v395_v53, %v394_v50 }
  0xc9   : > { %v3446_v56 = vpop.permute.xlu1 %659 }
  0xca   : > { %5303 = vst [vmem:[#allocation9_spill] sm:$0xff] %v3446_v56  ;;  %v380_v57 = vrot.slane %v379_v54, 1  ;;  %v397_v58 = vrot.slane %v396_v55, 2  ;;  %v3502_v43 = vpop.permute.xlu0 %1651 }
  0xcb   : > { %5321 = vst [vmem:[#allocation26_spill] sm:$0xff] %v3502_v43 }
  0xcc   : > { %v381_v59 = vadd.f32 %v380_v57, %v379_v54  ;;  %v398_v60 = vadd.f32 %v397_v58, %v396_v55 }
  0xcd   : > { %v3451_v63 = vpop.permute.xlu1 %699 }
  0xce   : > { %5305 = vst [vmem:[#allocation10_spill] sm:$0xff] %v3451_v63  ;;  %v399_v0 = vrot.slane %v398_v60, 1  ;;  %v382_v8 = vadd.f32 %v381_v59, %v310_v62  ;;  %v3506_v46 = vpop.permute.xlu0 %1691 }
  0xcf   : > { %5323 = vst [vmem:[#allocation28_spill] sm:$0xff] %v3506_v46 }
  0xd0   : > { %v400_v4 = vadd.f32 %v399_v0, %v398_v60  ;;  %v383_v14 = vmax.f32 %v382_v8, 0.0 }
  0xd1   : > { %v3456_v12 = vpop.permute.xlu1 %739 }
  0xd2   : > { %5307 = vst [vmem:[#allocation12_spill] sm:$0xff] %v3456_v12  ;;  %v401_v13 = vadd.f32 %v400_v4, %v310_v62  ;;  %v3510_v48 = vpop.permute.xlu0 %1733 }
  0xd3   : > { %5325 = vst [vmem:[#allocation30_spill] sm:$0xff] %v3510_v48 }
  0xd4   : > { %v402_v15 = vmax.f32 %v401_v13, 0.0 }
  0xd5   : > { %v3461_v17 = vpop.permute.xlu1 %779 }
  0xd6   : > { %5309 = vst [vmem:[#allocation14_spill] sm:$0xff] %v3461_v17  ;;  %v403_v18 = vadd.f32 %v402_v15, %v383_v14  ;;  %v3514_v50 = vpop.permute.xlu0 %1773 }
  0xd7   : > { %5327 = vst [vmem:[#allocation32_spill] sm:$0xff] %v3514_v50 }
  0xd8   : > { %v407_v20 = vrot.slane %v403_v18, %v3459_v16 }
  0xd9   : > { %v3467_v21 = vpop.permute.xlu1 %819 }
  0xda   : > { %5310 = vst [vmem:[#allocation15_spill] sm:$0xff] %v3467_v21  ;;  %v408_v24 = vmul.f32 %v407_v20, %v311_v19  ;;  %v410_v26 = vmul.f32 %v407_v20, %v313_v22  ;;  %v409_v27 = vmul.f32 %v407_v20, %v312_v23  ;;  %v411_v32 = vmul.f32 %v407_v20, %v314_v29  ;;  %v3518_v53 = vpop.permute.xlu0 %1813 }
  0xdb   : > { %5329 = vst [vmem:[#allocation34_spill] sm:$0xff] %v3518_v53 }
  0xdc   : > { %v412_v25 = vsel %vm368_vm0, %v408_v24, 0.0  ;;  %v418_v30 = vsel %vm368_vm0, %v410_v26, 0.0  ;;  %v415_v31 = vsel %vm368_vm0, %v409_v27, 0.0  ;;  %v421_v34 = vsel %vm368_vm0, %v411_v32, 0.0  ;;  %v315_v27 = vld [vmem:[%s5138_s4] sm:$0xff]  ;;  %v316_v32 = vld [vmem:[%s5138_s4 + $0x8] sm:$0xff] }
  0xdd   : > { %413 = vadd.xlane.f32.xlu0 %v412_v25  ;;  %v3476_v28 = vpop.permute.xlu1 %875 }
  0xde   : > { %5311 = vst [vmem:[#allocation16_spill] sm:$0xff] %v3476_v28  ;;  %v3522_v55 = vpop.permute.xlu0 %1853 }
  0xdf   : > { %5331 = vst [vmem:[#allocation36_spill] sm:$0xff] %v3522_v55 }
  0xe1   : > { %419 = vadd.xlane.f32.xlu0 %v418_v30  ;;  %v3483_v33 = vpop.permute.xlu1 %915  ;;  %416 = vadd.xlane.f32.xlu1 %v415_v31  ;;  %v424_v30 = vmul.f32 2.0, %v315_v27  ;;  %v317_v31 = vld [vmem:[%s5138_s4 + $0x10] sm:$0xff] }
  0xe2   : > { %5312 = vst [vmem:[#allocation17_spill] sm:$0xff] %v3483_v33  ;;  %v3526_v58 = vpop.permute.xlu0 %1893 }
  0xe3   : > { %5333 = vst [vmem:[#allocation38_spill] sm:$0xff] %v3526_v58 }
  0xe5   : > { %422 = vadd.xlane.f32.xlu1 %v421_v34  ;;  %v3486_v35 = vpop.permute.xlu1 %955 }
  0xe6   : > { %5313 = vst [vmem:[#allocation18_spill] sm:$0xff] %v3486_v35  ;;  %v3530_v60 = vpop.permute.xlu0 %1933 }
  0xe7   : > { %5335 = vst [vmem:[#allocation40_spill] sm:$0xff] %v3530_v60 }
  0xe9   : > { %v3488_v36 = vpop.permute.xlu1 %995 }
  0xea   : > { %5314 = vst [vmem:[#allocation19_spill] sm:$0xff] %v3488_v36  ;;  %v3534_v0 = vpop.permute.xlu0 %1973 }
  0xeb   : > { %5337 = vst [vmem:[#allocation42_spill] sm:$0xff] %v3534_v0 }
  0xed   : > { %v3490_v37 = vpop.permute.xlu1 %1034 }
  0xee   : > { %5315 = vst [vmem:[#allocation20_spill] sm:$0xff] %v3490_v37  ;;  %v3538_v8 = vpop.permute.xlu0 %2030 }
  0xef   : > { %5339 = vst [vmem:[#allocation44_spill] sm:$0xff] %v3538_v8 }
  0xf1   : > { %v3492_v38 = vpop.permute.xlu1 %1074 }
  0xf2   : > { %5316 = vst [vmem:[#allocation21_spill] sm:$0xff] %v3492_v38  ;;  %v3542_v14 = vpop.permute.xlu0 %2110 }
  0xf3   : > { %5341 = vst [vmem:[#allocation46_spill] sm:$0xff] %v3542_v14 }
  0xf5   : > { %v3494_v39 = vpop.permute.xlu1 %1114 }
  0xf6   : > { %5317 = vst [vmem:[#allocation22_spill] sm:$0xff] %v3494_v39  ;;  %v3546_v18 = vpop.permute.xlu0 %2367 }
  0xf7   : > { %5343 = vst [vmem:[#allocation48_spill] sm:$0xff] %v3546_v18 }
  0xf9   : > { %v3496_v40 = vpop.permute.xlu1 %1171 }
  0xfa   : > { %5318 = vst [vmem:[#allocation23_spill] sm:$0xff] %v3496_v40  ;;  %v3550_v20 = vpop.permute.xlu0 %2407 }
  0xfb   : > { %5345 = vst [vmem:[#allocation50_spill] sm:$0xff] %v3550_v20 }
  0xfd   : > { %v3500_v42 = vpop.permute.xlu1 %1211 }
  0xfe   : > { %5320 = vst [vmem:[#allocation25_spill] sm:$0xff] %v3500_v42  ;;  %v3554_v23 = vpop.permute.xlu0 %2447 }
  0xff   : > { %5347 = vst [vmem:[#allocation52_spill] sm:$0xff] %v3554_v23  ;;  %v318_v23 = vld [vmem:[%s5138_s4 + $0x18] sm:$0xff] }
 0x100   : > { %v427_v18 = vmul.f32 2.0, %v318_v23 }
 0x101   : > { %v3504_v44 = vpop.permute.xlu1 %1251 }
 0x102   : > { %5322 = vst [vmem:[#allocation27_spill] sm:$0xff] %v3504_v44  ;;  %v3558_v25 = vpop.permute.xlu0 %2230 }
 0x103   : > { %5349 = vst [vmem:[#allocation54_spill] sm:$0xff] %v3558_v25  ;;  %v425_v25 = vmul.f32 2.0, %v316_v32 }
 0x105   : > { %v3508_v47 = vpop.permute.xlu1 %1291 }
 0x106   : > { %5324 = vst [vmem:[#allocation29_spill] sm:$0xff] %v3508_v47  ;;  %v3565_v29 = vpop.permute.xlu0 %2567 }
 0x107   : > { %5351 = vst [vmem:[#allocation56_spill] sm:$0xff] %v3565_v29 }
 0x109   : > { %v3512_v49 = vpop.permute.xlu1 %1331 }
 0x10a   : > { %5326 = vst [vmem:[#allocation31_spill] sm:$0xff] %v3512_v49 }
 0x10d   : > { %v3516_v52 = vpop.permute.xlu1 %1371 }
 0x10e   : > { %5328 = vst [vmem:[#allocation33_spill] sm:$0xff] %v3516_v52 }
 0x111   : > { %v3520_v54 = vpop.permute.xlu1 %1411 }
 0x112   : > { %5330 = vst [vmem:[#allocation35_spill] sm:$0xff] %v3520_v54 }
 0x115   : > { %v3524_v57 = vpop.permute.xlu1 %1468 }
 0x116   : > { %5332 = vst [vmem:[#allocation37_spill] sm:$0xff] %v3524_v57 }
 0x119   : > { %v3528_v59 = vpop.permute.xlu1 %1508 }
 0x11a   : > { %5334 = vst [vmem:[#allocation39_spill] sm:$0xff] %v3528_v59 }
 0x11d   : > { %v3532_v62 = vpop.permute.xlu1 %1548 }
 0x11e   : > { %5336 = vst [vmem:[#allocation41_spill] sm:$0xff] %v3532_v62 }
 0x121   : > { %v3536_v4 = vpop.permute.xlu1 %1588 }
 0x122   : > { %5338 = vst [vmem:[#allocation43_spill] sm:$0xff] %v3536_v4 }
 0x125   : > { %v3540_v13 = vpop.permute.xlu1 %2070 }
 0x126   : > { %5340 = vst [vmem:[#allocation45_spill] sm:$0xff] %v3540_v13 }
 0x129   : > { %v3544_v15 = vpop.permute.xlu1 %2327 }
 0x12a   : > { %5342 = vst [vmem:[#allocation47_spill] sm:$0xff] %v3544_v15 }
 0x12d   : > { %v3548_v19 = vpop.permute.xlu1 %2150 }
 0x12e   : > { %5344 = vst [vmem:[#allocation49_spill] sm:$0xff] %v3548_v19 }
 0x131   : > { %v3552_v22 = vpop.permute.xlu1 %2190 }
 0x132   : > { %5346 = vst [vmem:[#allocation51_spill] sm:$0xff] %v3552_v22 }
 0x135   : > { %v3556_v24 = vpop.permute.xlu1 %2487 }
 0x136   : > { %5348 = vst [vmem:[#allocation53_spill] sm:$0xff] %v3556_v24 }
 0x139   : > { %v3560_v26 = vpop.permute.xlu1 %2270 }
 0x13a   : > { %5350 = vst [vmem:[#allocation55_spill] sm:$0xff] %v3560_v26  ;;  %v426_v26 = vmul.f32 2.0, %v317_v31 }
 0x13d   : > { %v3573_v34 = vpop.permute.xlu1 %2527 }
 0x13e   : > { %5352 = vst [vmem:[#allocation57_spill] sm:$0xff] %v3573_v34 }
 0x16a   : > { %v414_v61 = vpop.xlane.xlu0 %413 }
 0x16b   : > { %v428_v24 = vadd.f32 %v424_v30, %v414_v61 }
 0x16d   : > { %v2761_v29 = vmul.f32 -1.442695, %v428_v24 }
 0x16e   : > { %v420_v27 = vpop.xlane.xlu0 %419  ;;  %v417_v22 = vpop.xlane.xlu1 %416 }
 0x16f   : > { %2970 = vpow2.f32 %v2761_v29  ;;  %v430_v20 = vadd.f32 %v426_v26, %v420_v27  ;;  %v429_v19 = vadd.f32 %v425_v25, %v417_v22  ;;  %v3079_v27 = vmov 0.0  }
 0x170   : > { %326 = vst.msk [vmem:[#allocation2] sm:$0xff] %vm325_vm7, %v3079_v27  ;;  %vm1197_vm7 = vcmask 400384  }
 0x171   : > { %v2763_v15 = vmul.f32 -1.442695, %v430_v20  ;;  %v2762_v14 = vmul.f32 -1.442695, %v429_v19 }
 0x172   : > { %v423_v13 = vpop.xlane.xlu1 %422 }
 0x173   : > { %2972 = vpow2.f32 %v2763_v15  ;;  %v431_v34 = vadd.f32 %v427_v18, %v423_v13 }
 0x174   : > { %2974 = vpow2.f32 %v2762_v14 }
 0x175   : > { %v2764_v61 = vmul.f32 -1.442695, %v431_v34 }
 0x177   : > { %2976 = vpow2.f32 %v2764_v61 }
 0x179   : > { %v2971_v30 = vpop.eup %2970 }
 0x17a   : > { %v444_v31 = vadd.f32 1.0, %v2971_v30 }
 0x17c   : > { %2978 = vrcp.f32 %v444_v31 }
 0x17d   : > { %v2973_v32 = vpop.eup %2972 }
 0x17e   : > { %v2975_v8 = vpop.eup %2974  ;;  %v446_v24 = vadd.f32 1.0, %v2973_v32 }
 0x17f   : > { %v445_v0 = vadd.f32 1.0, %v2975_v8 }
 0x180   : > { %2980 = vrcp.f32 %v446_v24 }
 0x181   : > { %v2977_v29 = vpop.eup %2976  ;;  %2982 = vrcp.f32 %v445_v0 }
 0x182   : > { %v447_v22 = vadd.f32 1.0, %v2977_v29 }
 0x184   : > { %2984 = vrcp.f32 %v447_v22 }
 0x186   : > { %v2979_v20 = vpop.eup %2978 }
 0x187   : > { %v456_v19 = vmul.f32 1.442695, %v2979_v20 }
 0x189   : > { %2986 = vpow2.f32 %v456_v19 }
 0x18a   : > { %v2981_v15 = vpop.eup %2980 }
 0x18b   : > { %v2983_v13 = vpop.eup %2982  ;;  %v460_v18 = vmul.f32 1.442695, %v2981_v15 }
 0x18c   : > { %v458_v14 = vmul.f32 1.442695, %v2983_v13 }
 0x18e   : > { %2988 = vpow2.f32 %v458_v14  ;;  %v2985_v23 = vpop.eup %2984 }
 0x18f   : > { %2990 = vpow2.f32 %v460_v18  ;;  %v462_v25 = vmul.f32 1.442695, %v2985_v23 }
 0x191   : > { %2992 = vpow2.f32 %v462_v25 }
 0x193   : > { %v2987_v26 = vpop.eup %2986 }
 0x194   : > { %466 = vperm.xlu0 %2921, %v2987_v26  }
 0x198   : > { %v2989_v8 = vpop.eup %2988 }
 0x199   : > { %471 = vperm.xlu1 %2920, %v2989_v8   ;;  %v2991_v34 = vpop.eup %2990 }
 0x19b   : > { %v2993_v0 = vpop.eup %2992 }
 0x19d   : > { %476 = vperm.xlu1 %2920, %v2991_v34  }
 0x1a1   : > { %481 = vperm.xlu1 %2920, %v2993_v0  }
 0x213   : > { %v467_v30 = vpop.permute.xlu0 %466 }
 0x214   : > { %v3585_v29 = vmul.f32 %v467_v30, %v3242_v3  ;;  %v3588_v22 = vmul.f32 %v467_v30, %v3247_v5 }
 0x216   : > { %5355 = vst [vmem:[#allocation60_spill] sm:$0xff] %v3585_v29  ;;  %5356 = vst [vmem:[#allocation61_spill] sm:$0xff] %v3588_v22 }
 0x218   : > { %v472_v61 = vpop.permute.xlu1 %471 }
 0x219   : > { %v3579_v31 = vmul.f32 %v472_v61, %v3258_v9  ;;  %v3582_v32 = vmul.f32 %v472_v61, %v3261_v10 }
 0x21b   : > { %5353 = vst [vmem:[#allocation58_spill] sm:$0xff] %v3579_v31  ;;  %5354 = vst [vmem:[#allocation59_spill] sm:$0xff] %v3582_v32  ;;  %v492_v9 = vadd.f32 %v3579_v31, %v3585_v29  ;;  %v501_v10 = vadd.f32 %v3582_v32, %v3588_v22 }
 0x21c   : > { %v477_v24 = vpop.permute.xlu1 %476 }
 0x21d   : > { %v3591_v20 = vmul.f32 %v477_v24, %v3236_v1  ;;  %v3594_v19 = vmul.f32 %v477_v24, %v3239_v2  ;;  %v3080_v24 = vmov 1966171168  }
 0x21f   : > { %5357 = vst [vmem:[#allocation62_spill] sm:$0xff] %v3591_v20  ;;  %5358 = vst [vmem:[#allocation63_spill] sm:$0xff] %v3594_v19  ;;  %v493_v13 = vadd.f32 %v492_v9, %v3591_v20  ;;  %v502_v3 = vadd.f32 %v501_v10, %v3594_v19  ;;  %v537_v2 = vmax.f32 %v3585_v29, %v3591_v20  ;;  %v517_v9 = vunpack.c.l.s4 %v3080_v24 }
 0x220   : > { %v482_v15 = vpop.permute.xlu1 %481  ;;  %v546_v14 = vmax.f32 %v3588_v22, %v3594_v19 }
 0x221   : > { %v3603_v5 = vmul.f32 %v482_v15, %v3250_v6  ;;  %v3606_v1 = vmul.f32 %v482_v15, %v3253_v7 }
 0x223   : > { %5359 = vst [vmem:[#allocation64_spill] sm:$0xff] %v3603_v5  ;;  %5360 = vst [vmem:[#allocation65_spill] sm:$0xff] %v3606_v1  ;;  %v494_v18 = vadd.f32 %v493_v13, %v3603_v5  ;;  %v503_v23 = vadd.f32 %v502_v3, %v3606_v1  ;;  %v538_v25 = vmax.f32 %v3579_v31, %v3603_v5  ;;  %v518_v31 = vunpack.c.0.s8 %v517_v9 }
 0x224   : > { %v547_v6 = vmax.f32 %v3582_v32, %v3606_v1 }
 0x225   : > { %v495_v26 = vrot.slane %v494_v18, 4  ;;  %v504_v8 = vrot.slane %v503_v23, 4  ;;  %v539_v7 = vmax.f32 %v537_v2, %v538_v25 }
 0x226   : > { %v548_v34 = vmax.f32 %v546_v14, %v547_v6  ;;  %v521_v6 = vsub.s32 %v518_v31, %v3454_v11 }
 0x227   : > { %v496_v0 = vadd.f32 %v495_v26, %v494_v18  ;;  %v505_v27 = vadd.f32 %v504_v8, %v503_v23  ;;  %v540_v61 = vrot.slane %v539_v7, 4 }
 0x228   : > { %v549_v30 = vrot.slane %v548_v34, 4 }
 0x229   : > { %v497_v10 = vrot.slane %v496_v0, 2  ;;  %v506_v15 = vrot.slane %v505_v27, 2  ;;  %v541_v13 = vmax.f32 %v539_v7, %v540_v61 }
 0x22a   : > { %v550_v3 = vmax.f32 %v548_v34, %v549_v30 }
 0x22b   : > { %v498_v19 = vadd.f32 %v497_v10, %v496_v0  ;;  %v507_v22 = vadd.f32 %v506_v15, %v505_v27  ;;  %v542_v5 = vrot.slane %v541_v13, 2  ;;  %v3081_v27 = vmov 1983009808  }
 0x22c   : > { %v551_v20 = vrot.slane %v550_v3, 2  ;;  %v585_v61 = vunpack.c.l.s4 %v3081_v27  ;;  %v5361_v10 = vlaneseq }
 0x22d   : > { %v499_v1 = vrot.slane %v498_v19, 1  ;;  %v508_v32 = vrot.slane %v507_v22, 1  ;;  %v543_v29 = vmax.f32 %v541_v13, %v542_v5 }
 0x22e   : > { %v552_v2 = vmax.f32 %v550_v3, %v551_v20  ;;  %vm533_vm8 = vcmp.lt.s32.totalorder %v5361_v10, 256 }
 0x22f   : > { %v500_v14 = vadd.f32 %v499_v1, %v498_v19  ;;  %v509_v18 = vadd.f32 %v508_v32, %v507_v22  ;;  %v544_v23 = vrot.slane %v543_v29, 1  ;;  %v586_v19 = vunpack.c.0.s8 %v585_v61 }
 0x230   : > { %v553_v25 = vrot.slane %v552_v2, 1 }
 0x231   : > { %v511_v26 = vmul.f32 0.03125, %v500_v14  ;;  %v512_v8 = vmul.f32 0.03125, %v509_v18  ;;  %v545_v24 = vmax.f32 %v543_v29, %v544_v23  ;;  %v3621_v32 = vsub.s32 %v586_v19, %v3454_v11 }
 0x232   : > { %v554_v7 = vmax.f32 %v552_v2, %v553_v25 }
 0x233   : > { %v515_v34 = vcombine.low %v511_v26, %v512_v8 }
 0x234   : > { %v557_v0 = vcombine.low %v545_v24, %v554_v7 }
 0x235   : > { %v522_v30 = vrot.slane %v515_v34, %v521_v6 }
 0x236   : > { %v564_v9 = vrot.slane %v557_v0, %v521_v6 }
 0x237   : > { %v529_v5 = vrot.slane %v522_v30, %v521_v6 }
 0x238   : > { %v571_v20 = vrot.slane %v564_v9, %v521_v6 }
 0x239   : > { %536 = vst.msk [vmem:[#allocation2 + $0x2] ss:$2 sm:$0x3] %vm533_vm8, %v529_v5 }
 0x23a   : > { %574 = vst.msk [vmem:[#allocation2 + $0x3] ss:$2 sm:$0x3] %vm533_vm8, %v571_v20  ;;  %vm1237_vm8 = vcmask 269312  }
 0x241   : > { %v3623_v31 = vld [vmem:[#allocation2] sm:$0x3f] }
 0x242   : > { %v3627_v29 = vrot.slane %v3623_v31, %v3621_v32  ;;  %v3629_v22 = vld [vmem:[#allocation2] sm:$0x3f]  ;;  %v5374_v56 = vcombine.high %v3623_v31, %v3623_v31 }
 0x243   : > { %v3633_v1 = vrot.slane %v3629_v22, %v3621_v32  ;;  %v3635_v15 = vld [vmem:[#allocation2] sm:$0x3f]  ;;  %v583_v10 = vcombine.high %v3629_v22, %v3629_v22 }
 0x244   : > { %639 = vrot.lane.b32.xlu0 %v3627_v29, %s3082_s13  ;;  %v3639_v13 = vld [vmem:[#allocation2 + $0x2] sm:$0x3f]  ;;  %v3645_v3 = vrot.slane %v3635_v15, %v3621_v32  ;;  %v3866_v51 = vrot.slane %v5374_v56, %v3621_v32  ;;  %v5375_v45 = vcombine.high %v3635_v15, %v3635_v15 }
 0x245   : > { %599 = vrot.lane.b32.xlu1 %v3633_v1, %s3083_s14  ;;  %v3649_v2 = vrot.slane %v3639_v13, %v3621_v32  ;;  %v3651_v14 = vld [vmem:[#allocation2] sm:$0x3f]  ;;  %v3784_v54 = vrot.slane %v583_v10, %v3621_v32 }
 0x246   : > { %v3655_v18 = vld [vmem:[#allocation2 + $0x2] sm:$0x3f]  ;;  %v3661_v23 = vrot.slane %v3651_v14, %v3621_v32 }
 0x247   : > { %5362 = vst [vmem:[#allocation66_spill] sm:$0xff] %v3649_v2  ;;  %v3665_v25 = vrot.slane %v3655_v18, %v3621_v32  ;;  %v3667_v6 = vld [vmem:[#allocation2 + $0x2] sm:$0x3f] }
 0x248   : > { %679 = vrot.lane.b32.xlu0 %v3645_v3, %s3084_s18  ;;  %v3671_v26 = vld [vmem:[#allocation2 + $0x2] sm:$0x3f]  ;;  %v3677_v8 = vrot.slane %v3667_v6, %v3621_v32  ;;  %v5378_v56 = vcombine.high %v3667_v6, %v3667_v6 }
 0x249   : > { %1631 = vrot.lane.b32.xlu1 %v3649_v2, %s5232_s19  ;;  %5363 = vst [vmem:[#allocation67_spill] sm:$0xff] %v3665_v25  ;;  %v3681_v24 = vrot.slane %v3671_v26, %v3621_v32  ;;  %v3683_v7 = vld [vmem:[#allocation2 + $0x2] sm:$0x3f]  ;;  %s5235_s19 = smov 79  }
 0x24a   : > { %v3687_v34 = vld [vmem:[#allocation2] sm:$0x3f]  ;;  %v3693_v0 = vrot.slane %v3683_v7, %v3621_v32  ;;  %v3886_v31 = vrot.slane %v5378_v56, %v3621_v32 }
 0x24b   : > { %5364 = vst [vmem:[#allocation68_spill] sm:$0xff] %v3681_v24  ;;  %v3697_v27 = vrot.slane %v3687_v34, %v3621_v32  ;;  %v3699_v61 = vld [vmem:[#allocation2 + $0x2] sm:$0x3f] }
 0x24c   : > { %719 = vrot.lane.b32.xlu0 %v3661_v23, %s3086_s20  ;;  %5365 = vst [vmem:[#allocation69_spill] sm:$0xff] %v3693_v0  ;;  %v3703_v30 = vld [vmem:[#allocation2] sm:$0x3f]  ;;  %v3725_v5 = vrot.slane %v3699_v61, %v3621_v32  ;;  %v823_v43 = vcombine.high %v3699_v61, %v3699_v61 }
 0x24d   : > { %1671 = vrot.lane.b32.xlu1 %v3665_v25, %s5227_s21  ;;  %5366 = vst [vmem:[#allocation70_spill] sm:$0xff] %v3697_v27  ;;  %v3715_v19 = vld [vmem:[#allocation2] sm:$0x3f]  ;;  %v3741_v22 = vrot.slane %v3703_v30, %v3621_v32  ;;  %s5230_s21 = smov 95  }
 0x24e   : > { %5367 = vst [vmem:[#allocation71_spill] sm:$0xff] %v3725_v5  ;;  %v3727_v20 = vld [vmem:[#allocation2] sm:$0x3f]  ;;  %v879_v53 = vcombine.high %v3715_v19, %v3715_v19  ;;  %v3759_v60 = vrot.slane %v3715_v19, %v3621_v32 }
 0x24f   : > { %v3729_v58 = vld [vmem:[#allocation2] sm:$0x3f]  ;;  %5368 = vst [vmem:[#allocation72_spill] sm:$0xff] %v3741_v22  ;;  %v3773_v9 = vrot.slane %v3727_v20, %v3621_v32 }
 0x250   : > { %759 = vrot.lane.b32.xlu0 %v3677_v8, %s3088_s23  ;;  %v3731_v55 = vld [vmem:[#allocation2 + $0x2] sm:$0x3f]  ;;  %5369 = vst [vmem:[#allocation73_spill] sm:$0xff] %v3759_v60  ;;  %v919_v19 = vcombine.high %v3729_v58, %v3729_v58  ;;  %v3788_v52 = vrot.slane %v3729_v58, %v3621_v32 }
 0x251   : > { %1711 = vrot.lane.b32.xlu1 %v3681_v24, %s5222_s24  ;;  %v3743_v48 = vld [vmem:[#allocation2] sm:$0x3f]  ;;  %5370 = vst [vmem:[#allocation74_spill] sm:$0xff] %v3773_v9  ;;  %v3794_v49 = vrot.slane %v3731_v55, %v3621_v32  ;;  %s5225_s24 = smov 111  }
 0x252   : > { %v3745_v50 = vld [vmem:[#allocation2 + $0x2] sm:$0x3f]  ;;  %v959_v47 = vcombine.high %v3743_v48, %v3743_v48  ;;  %v3806_v58 = vrot.slane %v3743_v48, %v3621_v32  ;;  %v3903_v6 = vrot.slane %v919_v19, %v3621_v32 }
 0x253   : > { %v3747_v46 = vld [vmem:[#allocation2] sm:$0x3f]  ;;  %5371 = vst [vmem:[#allocation75_spill] sm:$0xff] %v3794_v49  ;;  %v3810_v61 = vrot.slane %v3745_v50, %v3621_v32 }
 0x254   : > { %799 = vrot.lane.b32.xlu0 %v3693_v0, %s3090_s25  ;;  %v3761_v41 = vld [vmem:[#allocation2 + $0x2] sm:$0x3f]  ;;  %v999_v40 = vcombine.high %v3747_v46, %v3747_v46  ;;  %v3816_v39 = vrot.slane %v3747_v46, %v3621_v32 }
 0x255   : > { %1753 = vrot.lane.b32.xlu1 %v3697_v27, %s5217_s26  ;;  %v3763_v4 = vld [vmem:[#allocation2 + $0x2] sm:$0x3f]  ;;  %5372 = vst [vmem:[#allocation76_spill] sm:$0xff] %v3810_v61  ;;  %v3828_v48 = vrot.slane %v3761_v41, %v3621_v32  ;;  %s5219_s26 = smov 127  }
 0x256   : > { %v3765_v62 = vld [vmem:[#allocation2 + $0x2] sm:$0x3f]  ;;  %v1038_v36 = vcombine.high %v3763_v4, %v3763_v4 }
 0x257   : > { %v3777_v59 = vld [vmem:[#allocation2 + $0x2] sm:$0x3f]  ;;  %5373 = vst [vmem:[#allocation77_spill] sm:$0xff] %v3828_v48  ;;  %v1078_v46 = vcombine.high %v3765_v62, %v3765_v62 }
 0x258   : > { %839 = vrot.lane.b32.xlu0 %v3725_v5, %s3092_s27  ;;  %v3779_v57 = vld [vmem:[#allocation2] sm:$0x3f]  ;;  %v1118_v35 = vcombine.high %v3777_v59, %v3777_v59  ;;  %v5377_v5 = vcombine.high %v3651_v14, %v3651_v14  ;;  %v3900_v14 = vrot.slane %v879_v53, %v3621_v32  ;;  %v3912_v56 = vrot.slane %v1038_v36, %v3621_v32 }
 0x259   : > { %1793 = vrot.lane.b32.xlu1 %v3741_v22, %s5197_s28  ;;  %v3781_v11 = vld [vmem:[#allocation2] sm:$0x3f]  ;;  %s5213_s28 = smov 15   ;;  %v1175_v28 = vcombine.high %v3779_v57, %v3779_v57  ;;  %v5381_v36 = vcombine.high %v3655_v18, %v3655_v18  ;;  %v5385_v18 = vcombine.high %v3687_v34, %v3687_v34 }
 0x25a   : > { %v3798_v44 = vld [vmem:[#allocation2] sm:$0x3f]  ;;  %v1215_v27 = vcombine.high %v3781_v11, %v3781_v11  ;;  %v3880_v0 = vrot.slane %v5377_v5, %v3621_v32  ;;  %v3906_v5 = vrot.slane %v959_v47, %v3621_v32  ;;  %v5380_v47 = vcombine.high %v3639_v13, %v3639_v13 }
 0x25b   : > { %v3800_v42 = vld [vmem:[#allocation2] sm:$0x3f]  ;;  %v1255_v24 = vcombine.high %v3798_v44, %v3798_v44  ;;  %v3921_v53 = vrot.slane %v1175_v28, %v3621_v32 }
 0x25c   : > { %v3802_v10 = vld [vmem:[#allocation2 + $0x2] sm:$0x3f]  ;;  %895 = vrot.lane.b32.xlu0 %v3759_v60, %s3094_s11  ;;  %v1295_v21 = vcombine.high %v3800_v42, %v3800_v42  ;;  %v3872_v60 = vrot.slane %v5375_v45, %v3621_v32  ;;  %v5379_v45 = vcombine.high %v3683_v7, %v3683_v7  ;;  %v3909_v7 = vrot.slane %v999_v40, %v3621_v32 }
 0x25d   : > { %v3818_v16 = vld [vmem:[#allocation2 + $0x2] sm:$0x3f]  ;;  %1833 = vrot.lane.b32.xlu1 %v3773_v9, %s5213_s28  ;;  %v1335_v25 = vcombine.high %v3802_v10, %v3802_v10  ;;  %s3096_s28 = smov 34   ;;  %v3927_v19 = vrot.slane %v5380_v47, %v3621_v32  ;;  %v3930_v40 = vrot.slane %v1215_v27, %v3621_v32  ;;  %v5383_v27 = vcombine.high %v3671_v26, %v3671_v26 }
 0x25e   : > { %v3820_v38 = vld [vmem:[#allocation2 + $0x2] sm:$0x3f]  ;;  %v1375_v17 = vcombine.high %v3818_v16, %v3818_v16  ;;  %5376 = vst [vmem:[#allocation78_spill] sm:$0xff] %v3872_v60  ;;  %v3892_v15 = vrot.slane %v5379_v45, %v3621_v32  ;;  %v3895_v60 = vrot.slane %v823_v43, %v3621_v32  ;;  %v3915_v43 = vrot.slane %v1078_v46, %v3621_v32 }
 0x25f   : > { %v3822_v37 = vld [vmem:[#allocation2] sm:$0x3f]  ;;  %v1415_v9 = vcombine.high %v3820_v38, %v3820_v38  ;;  %v3918_v45 = vrot.slane %v1118_v35, %v3621_v32  ;;  %v3936_v46 = vrot.slane %v5381_v36, %v3621_v32  ;;  %v3939_v35 = vrot.slane %v1255_v24, %v3621_v32 }
 0x260   : > { %v3836_v22 = vld [vmem:[#allocation2] sm:$0x3f]  ;;  %v1472_v2 = vcombine.high %v3822_v37, %v3822_v37  ;;  %935 = vrot.lane.b32.xlu0 %v3788_v52, %s3096_s28  ;;  %v3947_v47 = vrot.slane %v5383_v27, %v3621_v32  ;;  %v3956_v24 = vrot.slane %v5385_v18, %v3621_v32  ;;  %v3959_v36 = vrot.slane %v1335_v25, %v3621_v32 }
 0x261   : > { %v3838_v33 = vld [vmem:[#allocation2] sm:$0x3f]  ;;  %v1512_v12 = vcombine.high %v3836_v22, %v3836_v22  ;;  %1873 = vrot.lane.b32.xlu1 %v3794_v49, %s5219_s26  ;;  %5382 = vst [vmem:[#allocation79_spill] sm:$0xff] %v3939_v35  ;;  %s5245_s26 = smov 18   ;;  %v3950_v49 = vrot.slane %v1295_v21, %v3621_v32  ;;  %v5388_v21 = vcombine.high %v3703_v30, %v3703_v30 }
 0x262   : > { %v1552_v63 = vcombine.high %v3838_v33, %v3838_v33  ;;  %v1970_v28 = vld [vmem:[#allocation2 + $0x2] sm:$0x3f]  ;;  %5386 = vst [vmem:[#allocation81_spill] sm:$0xff] %v3956_v24  ;;  %5387 = vst [vmem:[#allocation82_spill] sm:$0xff] %v3959_v36  ;;  %v3976_v18 = vrot.slane %v1375_v17, %v3621_v32  ;;  %v5391_v25 = vcombine.high %v3727_v20, %v3727_v20 }
 0x263   : > { %v2027_v13 = vld [vmem:[#allocation2] sm:$0x3f]  ;;  %5384 = vst [vmem:[#allocation80_spill] sm:$0xff] %v3950_v49  ;;  %v3973_v34 = vrot.slane %v5388_v21, %v3621_v32  ;;  %v3985_v36 = vrot.slane %v1415_v9, %v3621_v32  ;;  %v5394_v24 = vcombine.high %v3731_v55, %v3731_v55  ;;  %v3994_v30 = vrot.slane %v1472_v2, %v3621_v32 }
 0x264   : > { %975 = vrot.lane.b32.xlu0 %v3806_v58, %s5245_s26  ;;  %v3963_v35 = vld [vmem:[#allocation2] sm:$0x3f]  ;;  %5390 = vst [vmem:[#allocation84_spill] sm:$0xff] %v3976_v18  ;;  %v1897_v17 = vcombine.high %v3745_v50, %v3745_v50  ;;  %v3999_v21 = vrot.slane %v1512_v12, %v3621_v32  ;;  %v1937_v9 = vcombine.high %v3761_v41, %v3761_v41  ;;  %s5251_s26 = smov 45  }
 0x265   : > { %1913 = vrot.lane.b32.xlu1 %v3810_v61, %s5225_s24  ;;  %v3965_v26 = vld [vmem:[#allocation2] sm:$0x3f]  ;;  %5389 = vst [vmem:[#allocation83_spill] sm:$0xff] %v3973_v34  ;;  %v3982_v61 = vrot.slane %v5391_v25, %v3621_v32  ;;  %5393 = vst [vmem:[#allocation86_spill] sm:$0xff] %v3985_v36  ;;  %v3991_v49 = vrot.slane %v5394_v24, %v3621_v32  ;;  %v4006_v25 = vrot.slane %v1552_v63, %v3621_v32  ;;  %s5243_s24 = smov 2  }
 0x266   : > { %v3967_v27 = vld [vmem:[#allocation2] sm:$0x3f]  ;;  %5396 = vst [vmem:[#allocation88_spill] sm:$0xff] %v3994_v30  ;;  %5397 = vst [vmem:[#allocation89_spill] sm:$0xff] %v3999_v21  ;;  %v1977_v55 = vcombine.high %v1970_v28, %v1970_v28  ;;  %v2034_v24 = vcombine.high %v2027_v13, %v2027_v13  ;;  %v4017_v21 = vrot.slane %v1897_v17, %v3621_v32 }
 0x267   : > { %5392 = vst [vmem:[#allocation85_spill] sm:$0xff] %v3982_v61  ;;  %5395 = vst [vmem:[#allocation87_spill] sm:$0xff] %v3991_v49  ;;  %v4001_v20 = vld [vmem:[#allocation2] sm:$0x3f]  ;;  %v2074_v12 = vcombine.high %v3967_v27, %v3967_v27  ;;  %v2114_v63 = vcombine.high %v3963_v35, %v3963_v35  ;;  %v2331_v41 = vcombine.high %v3965_v26, %v3965_v26 }
 0x268   : > { %5398 = vst [vmem:[#allocation90_spill] sm:$0xff] %v4006_v25  ;;  %1015 = vrot.lane.b32.xlu0 %v3816_v39, %s5243_s24  ;;  %v4010_v2 = vld [vmem:[#allocation2 + $0x2] sm:$0x3f]  ;;  %5399 = vst [vmem:[#allocation91_spill] sm:$0xff] %v4017_v21  ;;  %v4028_v30 = vrot.slane %v1937_v9, %v3621_v32  ;;  %v4031_v49 = vrot.slane %v1977_v55, %v3621_v32  ;;  %v4034_v17 = vrot.slane %v2034_v24, %v3621_v32  ;;  %s5253_s24 = smov 49  }
 0x269   : > { %v4012_v50 = vld [vmem:[#allocation2 + $0x2] sm:$0x3f]  ;;  %1953 = vrot.lane.b32.xlu1 %v3828_v48, %s5230_s21  ;;  %v4038_v21 = vrot.slane %v3763_v4, %v3621_v32  ;;  %v2371_v36 = vcombine.high %v4001_v20, %v4001_v20  ;;  %v4043_v48 = vrot.slane %v2114_v63, %v3621_v32  ;;  %v4046_v61 = vrot.slane %v2331_v41, %v3621_v32  ;;  %s5237_s21 = smov 114  }
 0x26a   : > { %v4025_v25 = vld [vmem:[#allocation2 + $0x2] sm:$0x3f]  ;;  %5400 = vst [vmem:[#allocation92_spill] sm:$0xff] %v4028_v30  ;;  %5401 = vst [vmem:[#allocation93_spill] sm:$0xff] %v4031_v49  ;;  %v4049_v9 = vrot.slane %v1970_v28, %v3621_v32  ;;  %v2451_v24 = vcombine.high %v4010_v2, %v4010_v2  ;;  %v2234_v4 = vcombine.high %v4012_v50, %v4012_v50 }
 0x26b   : > { %5402 = vst [vmem:[#allocation94_spill] sm:$0xff] %v4034_v17  ;;  %5403 = vst [vmem:[#allocation95_spill] sm:$0xff] %v4043_v48  ;;  %v4051_v55 = vld [vmem:[#allocation2 + $0x2] sm:$0x3f]  ;;  %v4066_v28 = vrot.slane %v2074_v12, %v3621_v32  ;;  %v4082_v18 = vrot.slane %v3765_v62, %v3621_v32  ;;  %v4092_v34 = vrot.slane %v2371_v36, %v3621_v32 }
 0x26c   : > { %5404 = vst [vmem:[#allocation96_spill] sm:$0xff] %v4046_v61  ;;  %5405 = vst [vmem:[#allocation97_spill] sm:$0xff] %v4049_v9  ;;  %1054 = vrot.lane.b32.xlu0 %v4038_v21, %s5237_s21  ;;  %v4059_v63 = vld [vmem:[#allocation2 + $0x2] sm:$0x3f]  ;;  %v2274_v61 = vcombine.high %v4025_v25, %v4025_v25  ;;  %v4075_v49 = vrot.slane %v2451_v24, %v3621_v32  ;;  %v4078_v30 = vrot.slane %v2234_v4, %v3621_v32  ;;  %s5239_s21 = smov 46  }
 0x26d   : > { %v4061_v48 = vld [vmem:[#allocation2] sm:$0x3f]  ;;  %5406 = vst [vmem:[#allocation98_spill] sm:$0xff] %v4066_v28  ;;  %1993 = vrot.lane.b32.xlu1 %v4049_v9, %s5235_s19  ;;  %v2571_v9 = vcombine.high %v4051_v55, %v4051_v55  ;;  %5410 = vst [vmem:[#allocation102_spill] sm:$0xff] %v4092_v34  ;;  %v4095_v24 = vrot.slane %v2027_v13, %v3621_v32  ;;  %v2154_v4 = vcombine.high %v4059_v63, %v4059_v63  ;;  %s5241_s19 = smov 98  }
 0x26e   : > { %v4063_v41 = vld [vmem:[#allocation2 + $0x2] sm:$0x3f]  ;;  %5407 = vst [vmem:[#allocation99_spill] sm:$0xff] %v4075_v49  ;;  %5408 = vst [vmem:[#allocation100_spill] sm:$0xff] %v4078_v30  ;;  %v4087_v28 = vrot.slane %v2274_v61, %v3621_v32  ;;  %v2411_v62 = vcombine.high %v4061_v48, %v4061_v48 }
 0x26f   : > { %v4072_v17 = vld [vmem:[#allocation2 + $0x2] sm:$0x3f]  ;;  %v2194_v30 = vcombine.high %v4063_v41, %v4063_v41  ;;  %v4106_v61 = vrot.slane %v2571_v9, %v3621_v32  ;;  %v4113_v36 = vrot.slane %v2154_v4, %v3621_v32  ;;  %v4132_v4 = vrot.slane %v3963_v35, %v3621_v32 }
 0x270   : > { %v4084_v12 = vld [vmem:[#allocation2 + $0x2] sm:$0x3f]  ;;  %5409 = vst [vmem:[#allocation101_spill] sm:$0xff] %v4087_v28  ;;  %1094 = vrot.lane.b32.xlu0 %v4082_v18, %s5241_s19  ;;  %v2491_v13 = vcombine.high %v4072_v17, %v4072_v17  ;;  %v4116_v34 = vrot.slane %v2411_v62, %v3621_v32  ;;  %s5247_s19 = smov 14   ;;  %v4155_v35 = vrot.slane %v3781_v11, %v3621_v32 }
 0x271   : > { %5411 = vst [vmem:[#allocation103_spill] sm:$0xff] %v4106_v61  ;;  %2050 = vrot.lane.b32.xlu1 %v4095_v24, %s5239_s21  ;;  %v4119_v28 = vrot.slane %v2194_v30, %v3621_v32  ;;  %v2531_v9 = vcombine.high %v4084_v12, %v4084_v12  ;;  %v4125_v61 = vrot.slane %v3777_v59, %v3621_v32  ;;  %s5249_s21 = smov 82  }
 0x272   : > { %v4128_v49 = vrot.slane %v2491_v13, %v3621_v32  ;;  %v4143_v59 = vrot.slane %v3779_v57, %v3621_v32  ;;  %v4147_v30 = vrot.slane %v3965_v26, %v3621_v32  ;;  %v4159_v57 = vrot.slane %v4010_v2, %v3621_v32 }
 0x273   : > { %v4135_v62 = vrot.slane %v2531_v9, %v3621_v32  ;;  %v4167_v26 = vrot.slane %v3798_v44, %v3621_v32  ;;  %v4171_v11 = vrot.slane %v4012_v50, %v3621_v32  ;;  %v4179_v2 = vrot.slane %v3800_v42, %v3621_v32 }
 0x274   : > { %1134 = vrot.lane.b32.xlu0 %v4125_v61, %s5249_s21  ;;  %s5255_s21 = smov 125   ;;  %v4183_v44 = vrot.slane %v4025_v25, %v3621_v32  ;;  %v4191_v50 = vrot.slane %v3802_v10, %v3621_v32  ;;  %v4195_v42 = vrot.slane %v4051_v55, %v3621_v32  ;;  %v4203_v25 = vrot.slane %v3818_v16, %v3621_v32 }
 0x275   : > { %2130 = vrot.lane.b32.xlu1 %v4132_v4, %s5247_s19  ;;  %s5257_s19 = smov 33   ;;  %v598_v10 = vcombine.high %v3633_v1, %v3633_v1  ;;  %v4212_v55 = vrot.slane %v3820_v38, %v3621_v32  ;;  %v4220_v16 = vrot.slane %v3822_v37, %v3621_v32  ;;  %v638_v1 = vcombine.high %v3627_v29, %v3627_v29 }
 0x276   : > { %5412 = vst [vmem:[#allocation104_spill] sm:$0xff] %v4195_v42  ;;  %v4229_v38 = vrot.slane %v3836_v22, %v3621_v32  ;;  %v4238_v37 = vrot.slane %v3838_v33, %v3621_v32  ;;  %v718_v29 = vcombine.high %v3661_v23, %v3661_v23  ;;  %v758_v22 = vcombine.high %v3677_v8, %v3677_v8  ;;  %v5413_v23 = vld [vmem:[#allocation69_spill] sm:$0xff] }
 0x277   : > { %v4256_v33 = vrot.slane %v4001_v20, %v3621_v32  ;;  %v798_v13 = vcombine.high %v5413_v23, %v5413_v23  ;;  %v4265_v8 = vrot.slane %v4059_v63, %v3621_v32  ;;  %v4274_v20 = vrot.slane %v4061_v48, %v3621_v32 }
 0x278   : > { %1191 = vrot.lane.b32.xlu0 %v4143_v59, %s5253_s24  ;;  %s5259_s24 = smov 94   ;;  %v4283_v63 = vrot.slane %v4063_v41, %v3621_v32  ;;  %v4292_v48 = vrot.slane %v4072_v17, %v3621_v32  ;;  %v4303_v41 = vrot.slane %v4084_v12, %v3621_v32  ;;  %v1053_v23 = vcombine.high %v4038_v21, %v4038_v21 }
 0x279   : > { %2347 = vrot.lane.b32.xlu1 %v4147_v30, %s5251_s26  ;;  %s5261_s26 = smov 17  }
 0x27c   : > { %1231 = vrot.lane.b32.xlu0 %v4155_v35, %s5257_s19  ;;  %s5263_s19 = smov 78  }
 0x27d   : > { %2467 = vrot.lane.b32.xlu1 %v4159_v57, %s5255_s21  ;;  %s3114_s21 = smov 1  }
 0x280   : > { %1271 = vrot.lane.b32.xlu0 %v4167_v26, %s5261_s26  ;;  %s5267_s26 = smov 77  }
 0x281   : > { %2250 = vrot.lane.b32.xlu1 %v4171_v11, %s5259_s24  ;;  %s5265_s24 = smov 113  }
 0x284   : > { %1311 = vrot.lane.b32.xlu0 %v4179_v2, %s3114_s21 }
 0x285   : > { %2290 = vrot.lane.b32.xlu1 %v4183_v44, %s5263_s19  ;;  %s5287_s19 = smov 97  }
 0x288   : > { %1351 = vrot.lane.b32.xlu0 %v4191_v50, %s5265_s24  ;;  %s5283_s24 = smov 81  }
 0x289   : > { %2587 = vrot.lane.b32.xlu1 %v4195_v42, %s5267_s26  ;;  %s5269_s26 = smov 48  }
 0x28c   : > { %1391 = vrot.lane.b32.xlu0 %v4203_v25, %s5287_s19  ;;  %s5417_s19 = smov 2  }
 0x28d   : > { %601 = vrot.lane.b32.xlu1 %v598_v10, %s3083_s14  ;;  %v5415_v10 = vld [vmem:[#allocation73_spill] sm:$0xff] }
 0x290   : > { %1431 = vrot.lane.b32.xlu0 %v4212_v55, %s5283_s24  ;;  %s5416_s24 = smov 18  }
 0x291   : > { %603 = vrot.lane.b32.xlu1 %v3784_v54, %s3083_s14  ;;  %v678_v54 = vcombine.high %v3645_v3, %v3645_v3  ;;  %s5271_s14 = smov 32   ;;  %v4247_v3 = vrot.slane %v3967_v27, %v3621_v32  ;;  %v5414_v27 = vld [vmem:[#allocation71_spill] sm:$0xff]  ;;  %v1093_v32 = vcombine.high %v4082_v18, %v4082_v18 }
 0x292   : > { %v838_v9 = vcombine.high %v5414_v27, %v5414_v27  ;;  %v5421_v27 = vld [vmem:[#allocation78_spill] sm:$0xff] }
 0x294   : > { %1488 = vrot.lane.b32.xlu0 %v4220_v16, %s5269_s26  ;;  %s5273_s26 = smov 16  }
 0x295   : > { %641 = vrot.lane.b32.xlu1 %v638_v1, %s3082_s13  ;;  %v894_v1 = vcombine.high %v5415_v10, %v5415_v10  ;;  %v1190_v10 = vcombine.high %v4143_v59, %v4143_v59 }
 0x298   : > { %1528 = vrot.lane.b32.xlu0 %v4229_v38, %s5271_s14  ;;  %s5275_s14 = smov 30  }
 0x299   : > { %681 = vrot.lane.b32.xlu1 %v678_v54, %s3084_s18  ;;  %v934_v54 = vcombine.high %v3788_v52, %v3788_v52 }
 0x29c   : > { %1568 = vrot.lane.b32.xlu0 %v4238_v37, %s5273_s26  ;;  %s5277_s26 = smov 29  }
 0x29d   : > { %721 = vrot.lane.b32.xlu1 %v718_v29, %s3086_s20  ;;  %v974_v29 = vcombine.high %v3806_v58, %v3806_v58 }
 0x2a0   : > { %2090 = vrot.lane.b32.xlu0 %v4247_v3, %s5275_s14  ;;  %s5279_s14 = smov 126  }
 0x2a1   : > { %761 = vrot.lane.b32.xlu1 %v758_v22, %s3088_s23  ;;  %v1014_v22 = vcombine.high %v3816_v39, %v3816_v39 }
 0x2a4   : > { %2387 = vrot.lane.b32.xlu0 %v4256_v33, %s5277_s26  ;;  %s5281_s26 = smov 13  }
 0x2a5   : > { %801 = vrot.lane.b32.xlu1 %v798_v13, %s3090_s25 }
 0x2a8   : > { %2170 = vrot.lane.b32.xlu0 %v4265_v8, %s5279_s14  ;;  %s5285_s14 = smov 110  }
 0x2a9   : > { %841 = vrot.lane.b32.xlu1 %v838_v9, %s3092_s27  ;;  %v1133_v9 = vcombine.high %v4125_v61, %v4125_v61 }
 0x2ac   : > { %2427 = vrot.lane.b32.xlu0 %v4274_v20, %s5281_s26  ;;  %s5289_s26 = smov 109  }
 0x2ad   : > { %897 = vrot.lane.b32.xlu1 %v894_v1, %s3094_s11 }
 0x2b0   : > { %2210 = vrot.lane.b32.xlu0 %v4283_v63, %s5285_s14  ;;  %s5291_s14 = smov 93  }
 0x2b1   : > { %937 = vrot.lane.b32.xlu1 %v934_v54, %s3096_s28  ;;  %v1230_v54 = vcombine.high %v4155_v35, %v4155_v35 }
 0x2b4   : > { %2507 = vrot.lane.b32.xlu0 %v4292_v48, %s5289_s26  ;;  %s5419_s26 = smov 114  }
 0x2b5   : > { %977 = vrot.lane.b32.xlu1 %v974_v29, %s5416_s24  ;;  %v1270_v29 = vcombine.high %v4167_v26, %v4167_v26 }
 0x2b6   : > { %v4299_v52 = vpop.permute.xlu0 %639 }
 0x2b7   : > { %v4307_v17 = vpop.permute.xlu1 %599 }
 0x2b8   : > { %2547 = vrot.lane.b32.xlu0 %v4303_v41, %s5291_s14  ;;  %s5422_s14 = smov 98  }
 0x2b9   : > { %1017 = vrot.lane.b32.xlu1 %v1014_v22, %s5417_s19  ;;  %v1310_v22 = vcombine.high %v4179_v2, %v4179_v2 }
 0x2ba   : > { %v4312_v58 = vpop.permute.xlu0 %679 }
 0x2bb   : > { %v4316_v13 = vpop.permute.xlu1 %1631 }
 0x2bc   : > { %5418 = vst [vmem:[#allocation69_spill] sm:$0xff] %v4316_v13  ;;  %643 = vrot.lane.b32.xlu0 %v3866_v51, %s3082_s13  ;;  %s5424_s13 = smov 82  }
 0x2bd   : > { %1056 = vrot.lane.b32.xlu1 %v1053_v23, %s5419_s26  ;;  %v1350_v23 = vcombine.high %v4191_v50, %v4191_v50 }
 0x2be   : > { %v4321_v39 = vpop.permute.xlu0 %719 }
 0x2bf   : > { %v4325_v12 = vpop.permute.xlu1 %1671 }
 0x2c0   : > { %5420 = vst [vmem:[#allocation71_spill] sm:$0xff] %v4325_v12  ;;  %683 = vrot.lane.b32.xlu0 %v5421_v27, %s3084_s18  ;;  %s5426_s18 = smov 49   ;;  %v1430_v27 = vcombine.high %v4212_v55, %v4212_v55  ;;  %v2386_v12 = vcombine.high %v4256_v33, %v4256_v33 }
 0x2c1   : > { %1096 = vrot.lane.b32.xlu1 %v1093_v32, %s5422_s14  ;;  %v1390_v32 = vcombine.high %v4203_v25, %v4203_v25 }
 0x2c2   : > { %v4330_v21 = vpop.permute.xlu0 %759 }
 0x2c3   : > { %v4334_v51 = vpop.permute.xlu1 %1711 }
 0x2c4   : > { %5423 = vst [vmem:[#allocation73_spill] sm:$0xff] %v4334_v51  ;;  %723 = vrot.lane.b32.xlu0 %v3880_v0, %s3086_s20  ;;  %s5428_s20 = smov 33  }
 0x2c5   : > { %1136 = vrot.lane.b32.xlu1 %v1133_v9, %s5424_s13  ;;  %v1487_v9 = vcombine.high %v4220_v16, %v4220_v16 }
 0x2c6   : > { %v4339_v18 = vpop.permute.xlu0 %799 }
 0x2c7   : > { %v4343_v1 = vpop.permute.xlu1 %1753 }
 0x2c8   : > { %5425 = vst [vmem:[#allocation78_spill] sm:$0xff] %v4343_v1  ;;  %763 = vrot.lane.b32.xlu0 %v3886_v31, %s3088_s23  ;;  %s5430_s23 = smov 17   ;;  %v5483_v1 = vld [vmem:[#allocation94_spill] sm:$0xff] }
 0x2c9   : > { %1193 = vrot.lane.b32.xlu1 %v1190_v10, %s5426_s18  ;;  %v1527_v10 = vcombine.high %v4229_v38, %v4229_v38 }
 0x2ca   : > { %v4348_v61 = vpop.permute.xlu0 %839 }
 0x2cb   : > { %v4352_v0 = vpop.permute.xlu1 %1793 }
 0x2cc   : > { %5427 = vst [vmem:[#allocation105_spill] sm:$0xff] %v4352_v0  ;;  %803 = vrot.lane.b32.xlu0 %v3892_v15, %s3090_s25  ;;  %s5433_s25 = smov 113  }
 0x2cd   : > { %1233 = vrot.lane.b32.xlu1 %v1230_v54, %s5428_s20  ;;  %v1567_v54 = vcombine.high %v4238_v37, %v4238_v37 }
 0x2ce   : > { %v4357_v59 = vpop.permute.xlu0 %895 }
 0x2cf   : > { %v4361_v31 = vpop.permute.xlu1 %1833 }
 0x2d0   : > { %5429 = vst [vmem:[#allocation106_spill] sm:$0xff] %v4361_v31  ;;  %843 = vrot.lane.b32.xlu0 %v3895_v60, %s3092_s27  ;;  %s5435_s27 = smov 97  }
 0x2d1   : > { %1273 = vrot.lane.b32.xlu1 %v1270_v29, %s5430_s23 }
 0x2d2   : > { %v4366_v35 = vpop.permute.xlu0 %935 }
 0x2d3   : > { %v4370_v15 = vpop.permute.xlu1 %1873 }
 0x2d4   : > { %5431 = vst [vmem:[#allocation107_spill] sm:$0xff] %v4370_v15  ;;  %899 = vrot.lane.b32.xlu0 %v3900_v14, %s3094_s11  ;;  %s5445_s11 = smov 112  }
 0x2d5   : > { %1313 = vrot.lane.b32.xlu1 %v1310_v22, %s3114_s21 }
 0x2d6   : > { %v4375_v26 = vpop.permute.xlu0 %975 }
 0x2d7   : > { %v4379_v60 = vpop.permute.xlu1 %1913 }
 0x2d8   : > { %5432 = vst [vmem:[#allocation108_spill] sm:$0xff] %v4379_v60  ;;  %939 = vrot.lane.b32.xlu0 %v3903_v6, %s3096_s28  ;;  %s5437_s28 = smov 81  }
 0x2d9   : > { %1353 = vrot.lane.b32.xlu1 %v1350_v23, %s5433_s25  ;;  %v5449_v23 = vld [vmem:[#allocation79_spill] sm:$0xff] }
 0x2da   : > { %v4384_v2 = vpop.permute.xlu0 %1015 }
 0x2db   : > { %v4388_v14 = vpop.permute.xlu1 %1953 }
 0x2dc   : > { %5434 = vst [vmem:[#allocation109_spill] sm:$0xff] %v4388_v14  ;;  %979 = vrot.lane.b32.xlu0 %v3906_v5, %s5416_s24  ;;  %s5439_s24 = smov 48  }
 0x2dd   : > { %1393 = vrot.lane.b32.xlu1 %v1390_v32, %s5435_s27  ;;  %v5452_v32 = vld [vmem:[#allocation80_spill] sm:$0xff] }
 0x2de   : > { %v4393_v50 = vpop.permute.xlu0 %1054 }
 0x2df   : > { %v4397_v6 = vpop.permute.xlu1 %1993 }
 0x2e0   : > { %5436 = vst [vmem:[#allocation110_spill] sm:$0xff] %v4397_v6  ;;  %1019 = vrot.lane.b32.xlu0 %v3909_v7, %s5417_s19  ;;  %s5441_s19 = smov 32  }
 0x2e1   : > { %1433 = vrot.lane.b32.xlu1 %v1430_v27, %s5437_s28 }
 0x2e2   : > { %v4402_v25 = vpop.permute.xlu0 %1094 }
 0x2e3   : > { %v4406_v5 = vpop.permute.xlu1 %2050 }
 0x2e4   : > { %5438 = vst [vmem:[#allocation111_spill] sm:$0xff] %v4406_v5  ;;  %1058 = vrot.lane.b32.xlu0 %v3912_v56, %s5419_s26  ;;  %s5443_s26 = smov 16   ;;  %v5466_v5 = vld [vmem:[#allocation88_spill] sm:$0xff] }
 0x2e5   : > { %1490 = vrot.lane.b32.xlu1 %v1487_v9, %s5439_s24  ;;  %v5455_v9 = vld [vmem:[#allocation82_spill] sm:$0xff] }
 0x2e6   : > { %v4411_v55 = vpop.permute.xlu0 %1134 }
 0x2e7   : > { %v4415_v7 = vpop.permute.xlu1 %2130 }
 0x2e8   : > { %5440 = vst [vmem:[#allocation112_spill] sm:$0xff] %v4415_v7  ;;  %1098 = vrot.lane.b32.xlu0 %v3915_v43, %s5422_s14  ;;  %s5447_s14 = smov 96  }
 0x2e9   : > { %1530 = vrot.lane.b32.xlu1 %v1527_v10, %s5441_s19  ;;  %v5457_v10 = vld [vmem:[#allocation83_spill] sm:$0xff] }
 0x2ea   : > { %v4420_v16 = vpop.permute.xlu0 %1191 }
 0x2eb   : > { %v4424_v56 = vpop.permute.xlu1 %2347 }
 0x2ec   : > { %5442 = vst [vmem:[#allocation113_spill] sm:$0xff] %v4424_v56  ;;  %1138 = vrot.lane.b32.xlu0 %v3918_v45, %s5424_s13  ;;  %s5450_s13 = smov 80  }
 0x2ed   : > { %1570 = vrot.lane.b32.xlu1 %v1567_v54, %s5443_s26 }
 0x2ee   : > { %v4429_v38 = vpop.permute.xlu0 %1231 }
 0x2ef   : > { %v4431_v29 = vpop.permute.xlu1 %2467 }
 0x2f0   : > { %5444 = vst [vmem:[#allocation114_spill] sm:$0xff] %v4431_v29  ;;  %1195 = vrot.lane.b32.xlu0 %v3921_v53, %s5426_s18  ;;  %s5453_s18 = smov 47  }
 0x2f1   : > { %1635 = vrot.lane.b32.xlu1 %v3927_v19, %s5445_s11 }
 0x2f2   : > { %v4437_v43 = vpop.permute.xlu0 %1271 }
 0x2f3   : > { %v4439_v37 = vpop.permute.xlu1 %2250 }
 0x2f4   : > { %5446 = vst [vmem:[#allocation115_spill] sm:$0xff] %v4439_v37  ;;  %1235 = vrot.lane.b32.xlu0 %v3930_v40, %s5428_s20  ;;  %v5454_v40 = vld [vmem:[#allocation81_spill] sm:$0xff]  ;;  %s5456_s20 = smov 31   ;;  %v5462_v37 = vld [vmem:[#allocation7_spill] sm:$0xff] }
 0x2f5   : > { %1675 = vrot.lane.b32.xlu1 %v3936_v46, %s5447_s14 }
 0x2f6   : > { %v4445_v45 = vpop.permute.xlu0 %1311 }
 0x2f7   : > { %v4447_v22 = vpop.permute.xlu1 %2290 }
 0x2f8   : > { %5448 = vst [vmem:[#allocation116_spill] sm:$0xff] %v4447_v22  ;;  %1275 = vrot.lane.b32.xlu0 %v5449_v23, %s5430_s23  ;;  %s5464_s23 = smov 127  }
 0x2f9   : > { %1715 = vrot.lane.b32.xlu1 %v3947_v47, %s5450_s13 }
 0x2fa   : > { %v4453_v53 = vpop.permute.xlu0 %1351 }
 0x2fb   : > { %v4455_v19 = vpop.permute.xlu1 %2587 }
 0x2fc   : > { %5451 = vst [vmem:[#allocation79_spill] sm:$0xff] %v4455_v19  ;;  %1315 = vrot.lane.b32.xlu0 %v5452_v32, %s3114_s21  ;;  %v5458_v32 = vld [vmem:[#allocation84_spill] sm:$0xff]  ;;  %s5459_s21 = smov 15  }
 0x2fd   : > { %1757 = vrot.lane.b32.xlu1 %v5454_v40, %s5453_s18  ;;  %v5460_v40 = vld [vmem:[#allocation85_spill] sm:$0xff] }
 0x2fe   : > { %v4461_v46 = vpop.permute.xlu0 %1391 }
 0x2ff   : > { %v602_v27 = vpop.permute.xlu1 %601 }
 0x300   : > { %1355 = vrot.lane.b32.xlu0 %v5455_v9, %s5433_s25  ;;  %v606_v19 = vsel %vm605_vm9, %v4307_v17, %v602_v27  ;;  %s5468_s25 = smov 111  }
 0x301   : > { %1797 = vrot.lane.b32.xlu1 %v5457_v10, %s5456_s20  ;;  %v610_v29 = vmul.f32 %v606_v19, %v5462_v37 }
 0x302   : > { %v4467_v47 = vpop.permute.xlu0 %1431 }
 0x303   : > { %v604_v54 = vpop.permute.xlu1 %603 }
 0x304   : > { %v4469_v23 = vsel %vm605_vm9, %v602_v27, %v604_v54  ;;  %1395 = vrot.lane.b32.xlu0 %v5458_v32, %s5435_s27  ;;  %v5461_v54 = vld [vmem:[#allocation86_spill] sm:$0xff]  ;;  %v5463_v32 = vld [vmem:[#allocation8_spill] sm:$0xff]  ;;  %s5472_s27 = smov 95   ;;  %vm1277_vm9 = vcmask 138240  }
 0x305   : > { %1837 = vrot.lane.b32.xlu1 %v5460_v40, %s5459_s21  ;;  %v5465_v40 = vld [vmem:[#allocation87_spill] sm:$0xff] }
 0x306   : > { %v4476_v22 = vpop.permute.xlu0 %1488 }
 0x307   : > { %v4478_v9 = vpop.permute.xlu1 %641 }
 0x308   : > { %v646_v10 = vsel %vm645_vm10, %v4299_v52, %v4478_v9  ;;  %1435 = vrot.lane.b32.xlu0 %v5461_v54, %s5437_s28  ;;  %v5467_v54 = vld [vmem:[#allocation9_spill] sm:$0xff]  ;;  %s5477_s28 = smov 79  }
 0x309   : > { %v650_v56 = vmul.f32 %v646_v10, %v5463_v32  ;;  %1877 = vrot.lane.b32.xlu1 %v5465_v40, %s5464_s23  ;;  %v5469_v10 = vld [vmem:[#allocation91_spill] sm:$0xff] }
 0x30a   : > { %v4489_v17 = vpop.permute.xlu0 %1528 }
 0x30b   : > { %v652_v27 = vadd.f32 %v650_v56, %v610_v29  ;;  %v4491_v7 = vpop.permute.xlu1 %681  ;;  %v5471_v29 = vld [vmem:[#allocation10_spill] sm:$0xff] }
 0x30c   : > { %v686_v52 = vsel %vm685_vm11, %v4312_v58, %v4491_v7  ;;  %1492 = vrot.lane.b32.xlu0 %v5466_v5, %s5439_s24  ;;  %v5470_v58 = vld [vmem:[#allocation89_spill] sm:$0xff]  ;;  %s5482_s24 = smov 46  }
 0x30d   : > { %v690_v19 = vmul.f32 %v686_v52, %v5467_v54  ;;  %1917 = vrot.lane.b32.xlu1 %v5469_v10, %s5468_s25  ;;  %v5473_v52 = vld [vmem:[#allocation92_spill] sm:$0xff] }
 0x30e   : > { %v4501_v40 = vpop.permute.xlu0 %1568 }
 0x30f   : > { %v692_v6 = vadd.f32 %v690_v19, %v652_v27  ;;  %v4503_v14 = vpop.permute.xlu1 %721  ;;  %v5476_v19 = vld [vmem:[#allocation12_spill] sm:$0xff] }
 0x310   : > { %v726_v56 = vsel %vm725_vm12, %v4321_v39, %v4503_v14  ;;  %1532 = vrot.lane.b32.xlu0 %v5470_v58, %s5441_s19  ;;  %v5475_v39 = vld [vmem:[#allocation90_spill] sm:$0xff]  ;;  %s5487_s19 = smov 30  }
 0x311   : > { %v730_v5 = vmul.f32 %v726_v56, %v5471_v29  ;;  %1957 = vrot.lane.b32.xlu1 %v5473_v52, %s5472_s27  ;;  %v5478_v56 = vld [vmem:[#allocation93_spill] sm:$0xff]  ;;  %v5479_v52 = vld [vmem:[#allocation66_spill] sm:$0xff] }
 0x312   : > { %v4513_v10 = vpop.permute.xlu0 %2090  ;;  %v1630_v31 = vcombine.high %v5479_v52, %v5479_v52 }
 0x313   : > { %5474 = vst [vmem:[#allocation80_spill] sm:$0xff] %v4513_v10  ;;  %v732_v60 = vadd.f32 %v730_v5, %v692_v6  ;;  %v4515_v15 = vpop.permute.xlu1 %761 }
 0x314   : > { %v766_v27 = vsel %vm765_vm13, %v4330_v21, %v4515_v15  ;;  %1572 = vrot.lane.b32.xlu0 %v5475_v39, %s5443_s26  ;;  %v5481_v39 = vld [vmem:[#allocation14_spill] sm:$0xff] }
 0x315   : > { %v770_v58 = vmul.f32 %v766_v27, %v5476_v19  ;;  %1997 = vrot.lane.b32.xlu1 %v5478_v56, %s5477_s28  ;;  %v5484_v56 = vld [vmem:[#allocation67_spill] sm:$0xff] }
 0x316   : > { %v4527_v10 = vpop.permute.xlu0 %2387  ;;  %v1670_v52 = vcombine.high %v5484_v56, %v5484_v56 }
 0x317   : > { %5480 = vst [vmem:[#allocation81_spill] sm:$0xff] %v4527_v10  ;;  %v772_v6 = vadd.f32 %v770_v58, %v732_v60  ;;  %v4529_v5 = vpop.permute.xlu1 %801  ;;  %v2089_v60 = vcombine.high %v4247_v3, %v4247_v3 }
 0x318   : > { %v806_v21 = vsel %vm805_vm14, %v4339_v18, %v4529_v5  ;;  %1633 = vrot.lane.b32.xlu0 %v1630_v31, %s5445_s11  ;;  %v5486_v31 = vld [vmem:[#allocation15_spill] sm:$0xff]  ;;  %s5490_s11 = smov 14  }
 0x319   : > { %v810_v27 = vmul.f32 %v806_v21, %v5481_v39  ;;  %2054 = vrot.lane.b32.xlu1 %v5483_v1, %s5482_s24  ;;  %v5488_v21 = vld [vmem:[#allocation68_spill] sm:$0xff] }
 0x31a   : > { %v4540_v0 = vpop.permute.xlu0 %2170  ;;  %v1710_v56 = vcombine.high %v5488_v21, %v5488_v21 }
 0x31b   : > { %5485 = vst [vmem:[#allocation82_spill] sm:$0xff] %v4540_v0  ;;  %v812_v58 = vadd.f32 %v810_v27, %v772_v6  ;;  %v4544_v10 = vpop.permute.xlu1 %841  ;;  %v5492_v6 = vld [vmem:[#allocation70_spill] sm:$0xff] }
 0x31c   : > { %v846_v18 = vsel %vm845_vm15, %v4348_v61, %v4544_v10  ;;  %1673 = vrot.lane.b32.xlu0 %v1670_v52, %s5447_s14  ;;  %v5491_v61 = vld [vmem:[#allocation95_spill] sm:$0xff]  ;;  %v1752_v27 = vcombine.high %v5492_v6, %v5492_v6  ;;  %s5496_s14 = smov 45   ;;  %v5497_v6 = vld [vmem:[#allocation96_spill] sm:$0xff] }
 0x31d   : > { %v850_v1 = vmul.f32 %v846_v18, %v5486_v31  ;;  %2092 = vrot.lane.b32.xlu1 %v2089_v60, %s5487_s19 }
 0x31e   : > { %v4554_v0 = vpop.permute.xlu0 %2427 }
 0x31f   : > { %5489 = vst [vmem:[#allocation83_spill] sm:$0xff] %v4554_v0  ;;  %v4556_v51 = vadd.f32 %v850_v1, %v812_v58  ;;  %v4558_v3 = vpop.permute.xlu1 %897  ;;  %v5494_v1 = vld [vmem:[#allocation16_spill] sm:$0xff] }
 0x320   : > { %1713 = vrot.lane.b32.xlu0 %v1710_v56, %s5450_s13  ;;  %v902_v52 = vsel %vm901_vm1, %v4357_v59, %v4558_v3  ;;  %v5495_v56 = vld [vmem:[#allocation17_spill] sm:$0xff]  ;;  %v5498_v0 = vld [vmem:[#allocation72_spill] sm:$0xff]  ;;  %s5501_s13 = smov 29  }
 0x321   : > { %2134 = vrot.lane.b32.xlu1 %v5491_v61, %s5490_s11  ;;  %v906_v21 = vmul.f32 %v902_v52, %v5494_v1  ;;  %v1792_v59 = vcombine.high %v5498_v0, %v5498_v0  ;;  %v5500_v52 = vld [vmem:[#allocation18_spill] sm:$0xff] }
 0x322   : > { %v4568_v60 = vpop.permute.xlu0 %2210 }
 0x323   : > { %5493 = vst [vmem:[#allocation84_spill] sm:$0xff] %v4568_v60  ;;  %v4570_v58 = vpop.permute.xlu1 %937 }
 0x324   : > { %v942_v18 = vsel %vm941_vm2, %v4366_v35, %v4570_v58  ;;  %1755 = vrot.lane.b32.xlu0 %v1752_v27, %s5453_s18  ;;  %s5505_s18 = smov 126  }
 0x325   : > { %v946_v61 = vmul.f32 %v942_v18, %v5495_v56  ;;  %2351 = vrot.lane.b32.xlu1 %v5497_v6, %s5496_s14  ;;  %v5502_v6 = vld [vmem:[#allocation74_spill] sm:$0xff] }
 0x326   : > { %v4582_v60 = vpop.permute.xlu0 %2507  ;;  %v1832_v0 = vcombine.high %v5502_v6, %v5502_v6 }
 0x327   : > { %5499 = vst [vmem:[#allocation85_spill] sm:$0xff] %v4582_v60  ;;  %v948_v13 = vadd.f32 %v946_v61, %v906_v21  ;;  %v4586_v35 = vpop.permute.xlu1 %977  ;;  %v2169_v21 = vcombine.high %v4265_v8, %v4265_v8  ;;  %v5504_v61 = vld [vmem:[#allocation19_spill] sm:$0xff] }
 0x328   : > { %v982_v27 = vsel %vm981_vm3, %v4375_v26, %v4586_v35  ;;  %1795 = vrot.lane.b32.xlu0 %v1792_v59, %s5456_s20  ;;  %s5508_s20 = smov 13  }
 0x329   : > { %v986_v18 = vmul.f32 %v982_v27, %v5500_v52  ;;  %2389 = vrot.lane.b32.xlu1 %v2386_v12, %s5501_s13  ;;  %v5506_v12 = vld [vmem:[#allocation75_spill] sm:$0xff] }
 0x32a   : > { %v4596_v60 = vpop.permute.xlu0 %2547  ;;  %v1872_v27 = vcombine.high %v5506_v12, %v5506_v12 }
 0x32b   : > { %5503 = vst [vmem:[#allocation86_spill] sm:$0xff] %v4596_v60  ;;  %v988_v42 = vadd.f32 %v986_v18, %v948_v13  ;;  %v4598_v33 = vpop.permute.xlu1 %1017 }
 0x32c   : > { %v1021_v26 = vsel %vm368_vm0, %v4384_v2, %v4598_v33  ;;  %1835 = vrot.lane.b32.xlu0 %v1832_v0, %s5459_s21  ;;  %v2426_v2 = vcombine.high %v4274_v20, %v4274_v20  ;;  %v611_v0 = vmul.f32 %v4469_v23, %v5462_v37  ;;  %s5511_s21 = smov 110  }
 0x32d   : > { %v1025_v59 = vmul.f32 %v1021_v26, %v5504_v61  ;;  %2172 = vrot.lane.b32.xlu1 %v2169_v21, %s5505_s18 }
 0x32e   : > { %v644_v13 = vpop.permute.xlu0 %643 }
 0x32f   : > { %v1027_v18 = vadd.f32 %v1025_v59, %v988_v42  ;;  %v647_v6 = vsel %vm645_vm10, %v4478_v9, %v644_v13  ;;  %v4612_v8 = vpop.permute.xlu1 %1056  ;;  %v5507_v42 = vld [vmem:[#allocation20_spill] sm:$0xff]  ;;  %vm1317_vm10 = vcmask 7168  }
 0x330   : > { %v651_v26 = vmul.f32 %v647_v6, %v5463_v32  ;;  %v1061_v21 = vsel %vm1060_vm4, %v4393_v50, %v4612_v8  ;;  %1875 = vrot.lane.b32.xlu0 %v1872_v27, %s5464_s23  ;;  %v5509_v13 = vld [vmem:[#allocation76_spill] sm:$0xff]  ;;  %v2209_v50 = vcombine.high %v4283_v63, %v4283_v63  ;;  %v5510_v6 = vld [vmem:[#allocation21_spill] sm:$0xff]  ;;  %s305_s23 = sld [smem:[#allocation3]] }
 0x331   : > { %v1065_v59 = vmul.f32 %v1061_v21, %v5507_v42  ;;  %2429 = vrot.lane.b32.xlu1 %v2426_v2, %s5508_s20  ;;  %v1912_v20 = vcombine.high %v5509_v13, %v5509_v13  ;;  %v5513_v13 = vld [vmem:[#allocation13_spill] sm:$0xff] }
 0x332   : > { %v653_v9 = vadd.f32 %v651_v26, %v611_v0  ;;  %v684_v12 = vpop.permute.xlu0 %683 }
 0x333   : > { %v1067_v60 = vadd.f32 %v1065_v59, %v1027_v18  ;;  %v687_v37 = vsel %vm685_vm11, %v4491_v7, %v684_v12  ;;  %v4629_v23 = vpop.permute.xlu1 %1096  ;;  %v4643_v7 = vld [vmem:[%s5140_s6] ss:$8 sm:$0x3]  ;;  %vm1357_vm11 = vcmask 924672  }
 0x334   : > { %v691_v32 = vmul.f32 %v687_v37, %v5467_v54  ;;  %v1101_v27 = vsel %vm1100_vm5, %v4402_v25, %v4629_v23  ;;  %1915 = vrot.lane.b32.xlu0 %v1912_v20, %s5468_s25  ;;  %v4648_v54 = vld [vmem:[%s5140_s6 + $0x1] ss:$8 sm:$0x3]  ;;  %v5512_v25 = vld [vmem:[#allocation77_spill] sm:$0xff]  ;;  %v859_v20 = vrot.slane %v4643_v7, %v5513_v13  ;;  %s5525_s25 = smov 78  }
 0x335   : > { %v1105_v2 = vmul.f32 %v1101_v27, %v5510_v6  ;;  %2212 = vrot.lane.b32.xlu1 %v2209_v50, %s5511_s21  ;;  %v1952_v0 = vcombine.high %v5512_v25, %v5512_v25  ;;  %v1155_v37 = vrot.slane %v4648_v54, %v5513_v13 }
 0x336   : > { %v693_v18 = vadd.f32 %v691_v32, %v653_v9  ;;  %v724_v63 = vpop.permute.xlu0 %723 }
 0x337   : > { %v1107_v26 = vadd.f32 %v1105_v2, %v1067_v60  ;;  %v727_v21 = vsel %vm725_vm12, %v4503_v14, %v724_v63  ;;  %v4654_v59 = vpop.permute.xlu1 %1136  ;;  %v5514_v60 = vld [vmem:[#allocation22_spill] sm:$0xff]  ;;  %v5516_v14 = vld [vmem:[#allocation99_spill] sm:$0xff]  ;;  %vm1397_vm12 = vcmask 793600  }
 0x338   : > { %v731_v12 = vmul.f32 %v727_v21, %v5471_v29  ;;  %v1141_v9 = vsel %vm1140_vm6, %v4411_v55, %v4654_v59  ;;  %1955 = vrot.lane.b32.xlu0 %v1952_v0, %s5472_s27  ;;  %v5517_v29 = vld [vmem:[#allocation97_spill] sm:$0xff]  ;;  %v866_v21 = vmul.f32 %v859_v20, %v4556_v51  ;;  %v2506_v20 = vcombine.high %v4292_v48, %v4292_v48  ;;  %s5528_s27 = smov 93  }
 0x339   : > { %v1145_v50 = vmul.f32 %v1141_v9, %v5514_v60  ;;  %2471 = vrot.lane.b32.xlu1 %v5516_v14, %s5515_s0  ;;  %v1992_v2 = vcombine.high %v5517_v29, %v5517_v29 }
 0x33a   : > { %v733_v32 = vadd.f32 %v731_v12, %v693_v18  ;;  %v764_v27 = vpop.permute.xlu0 %763  ;;  %v5519_v18 = vld [vmem:[#allocation100_spill] sm:$0xff] }
 0x33b   : > { %v1147_v63 = vadd.f32 %v1145_v50, %v1107_v26  ;;  %v767_v55 = vsel %vm765_vm13, %v4515_v15, %v764_v27  ;;  %v4672_v25 = vpop.permute.xlu1 %1193  ;;  %v2049_v50 = vcombine.high %v4095_v24, %v4095_v24  ;;  %v5521_v27 = vld [vmem:[#allocation25_spill] sm:$0xff]  ;;  %vm1437_vm13 = vcmask 662528  }
 0x33c   : > { %v771_v0 = vmul.f32 %v767_v55, %v5476_v19  ;;  %1995 = vrot.lane.b32.xlu0 %v1992_v2, %s5477_s28  ;;  %v1198_v26 = vsel %vm1197_vm7, %v4420_v16, %v4672_v25  ;;  %s5530_s28 = smov 77  }
 0x33d   : > { %v1162_v9 = vmul.f32 %v1155_v37, %v1147_v63  ;;  %2254 = vrot.lane.b32.xlu1 %v5519_v18, %s5518_s1  ;;  %v5526_v18 = vld [vmem:[#allocation101_spill] sm:$0xff] }
 0x33e   : > { %v773_v12 = vadd.f32 %v771_v0, %v733_v32  ;;  %v804_v15 = vpop.permute.xlu0 %803  ;;  %v5520_v32 = vld [vmem:[#allocation23_spill] sm:$0xff]  ;;  %v5523_v0 = vld [vmem:[#allocation98_spill] sm:$0xff] }
 0x33f   : > { %v4684_v14 = vadd.f32 %v1162_v9, %v866_v21  ;;  %v807_v19 = vsel %vm805_vm14, %v4529_v5, %v804_v15  ;;  %v4688_v51 = vpop.permute.xlu1 %1233  ;;  %v1202_v24 = vmul.f32 %v1198_v26, %v5520_v32  ;;  %v5524_v21 = vld [vmem:[#allocation27_spill] sm:$0xff]  ;;  %v2129_v26 = vcombine.high %v4132_v4, %v4132_v4 }
 0x340   : > { %v811_v37 = vmul.f32 %v807_v19, %v5481_v39  ;;  %v1238_v16 = vsel %vm1237_vm8, %v4429_v38, %v4688_v51  ;;  %2052 = vrot.lane.b32.xlu0 %v2049_v50, %s5482_s24  ;;  %v2546_v50 = vcombine.high %v4303_v41, %v4303_v41  ;;  %vm1534_vm14 = vcmask 261120  }
 0x341   : > { %v1242_v29 = vmul.f32 %v1238_v16, %v5521_v27  ;;  %2509 = vrot.lane.b32.xlu1 %v2506_v20, %s5522_s2  ;;  %v5527_v20 = vld [vmem:[#allocation29_spill] sm:$0xff] }
 0x342   : > { %v813_v5 = vadd.f32 %v811_v37, %v773_v12  ;;  %v844_v2 = vpop.permute.xlu0 %843 }
 0x343   : > { %v1244_v63 = vadd.f32 %v1242_v29, %v1202_v24  ;;  %v847_v48 = vsel %vm845_vm15, %v4544_v10, %v844_v2  ;;  %v4702_v39 = vpop.permute.xlu1 %1273  ;;  %v5529_v2 = vld [vmem:[#allocation31_spill] sm:$0xff]  ;;  %vm1574_vm15 = vcmask 130048  }
 0x344   : > { %v851_v55 = vmul.f32 %v847_v48, %v5486_v31  ;;  %v1278_v38 = vsel %vm1277_vm9, %v4437_v43, %v4702_v39  ;;  %2094 = vrot.lane.b32.xlu0 %v5523_v0, %s5487_s19  ;;  %v5532_v0 = vld [vmem:[#allocation102_spill] sm:$0xff] }
 0x345   : > { %v1282_v9 = vmul.f32 %v1278_v38, %v5524_v21  ;;  %2294 = vrot.lane.b32.xlu1 %v5526_v18, %s5525_s25 }
 0x346   : > { %v4713_v12 = vadd.f32 %v851_v55, %v813_v5  ;;  %v900_v10 = vpop.permute.xlu0 %899 }
 0x347   : > { %v1284_v31 = vadd.f32 %v1282_v9, %v1244_v63  ;;  %v903_v15 = vsel %vm901_vm1, %v4558_v3, %v900_v10  ;;  %v4719_v43 = vpop.permute.xlu1 %1313  ;;  %v2346_v3 = vcombine.high %v4147_v30, %v4147_v30  ;;  %v5531_v30 = vld [vmem:[#allocation103_spill] sm:$0xff]  ;;  %v5533_v9 = vld [vmem:[#allocation33_spill] sm:$0xff]  ;;  %vm1637_vm1 = vcmask 916480  }
 0x348   : > { %v1318_v19 = vsel %vm1317_vm10, %v4445_v45, %v4719_v43  ;;  %2132 = vrot.lane.b32.xlu0 %v2129_v26, %s5490_s11  ;;  %v907_v29 = vmul.f32 %v903_v15, %v5494_v1 }
 0x349   : > { %v1322_v37 = vmul.f32 %v1318_v19, %v5527_v20  ;;  %2549 = vrot.lane.b32.xlu1 %v2546_v50, %s5528_s27 }
 0x34a   : > { %v940_v4 = vpop.permute.xlu0 %939 }
 0x34b   : > { %v1324_v16 = vadd.f32 %v1322_v37, %v1284_v31  ;;  %v943_v24 = vsel %vm941_vm2, %v4570_v58, %v940_v4  ;;  %v4733_v41 = vpop.permute.xlu1 %1353  ;;  %v5534_v37 = vld [vmem:[#allocation35_spill] sm:$0xff]  ;;  %vm1677_vm2 = vcmask 785408  }
 0x34c   : > { %v947_v45 = vmul.f32 %v943_v24, %v5495_v56  ;;  %v1358_v5 = vsel %vm1357_vm11, %v4453_v53, %v4733_v41  ;;  %2349 = vrot.lane.b32.xlu0 %v2346_v3, %s5496_s14 }
 0x34d   : > { %v1362_v63 = vmul.f32 %v1358_v5, %v5529_v2  ;;  %2591 = vrot.lane.b32.xlu1 %v5531_v30, %s5530_s28 }
 0x34e   : > { %v949_v48 = vadd.f32 %v947_v45, %v907_v29  ;;  %v980_v58 = vpop.permute.xlu0 %979 }
 0x34f   : > { %v1364_v55 = vadd.f32 %v1362_v63, %v1324_v16  ;;  %v983_v1 = vsel %vm981_vm3, %v4586_v35, %v980_v58  ;;  %v4746_v38 = vpop.permute.xlu1 %1393  ;;  %v4758_v35 = vld [vmem:[%s5140_s6 + $0x2] ss:$8 sm:$0x3]  ;;  %vm1717_vm3 = vcmask 654336  }
 0x350   : > { %v987_v56 = vmul.f32 %v983_v1, %v5500_v52  ;;  %v1398_v53 = vsel %vm1397_vm12, %v4461_v46, %v4746_v38  ;;  %2391 = vrot.lane.b32.xlu0 %v5532_v0, %s5501_s13  ;;  %v1452_v19 = vrot.slane %v4758_v35, %v5513_v13 }
 0x351   : > { %v1402_v18 = vmul.f32 %v1398_v53, %v5533_v9  ;;  %v2466_v53 = vcombine.high %v4159_v57, %v4159_v57  ;;  %v5538_v57 = vld [vmem:[#allocation41_spill] sm:$0xff] }
 0x352   : > { %v989_v10 = vadd.f32 %v987_v56, %v949_v48  ;;  %v1020_v26 = vpop.permute.xlu0 %1019 }
 0x353   : > { %v1404_v31 = vadd.f32 %v1402_v18, %v1364_v55  ;;  %v1022_v52 = vsel %vm368_vm0, %v4598_v33, %v1020_v26  ;;  %v4762_v15 = vpop.permute.xlu1 %1433  ;;  %vm1494_vm0 = vcmask 392192  }
 0x354   : > { %v1026_v46 = vmul.f32 %v1022_v52, %v5504_v61  ;;  %v1438_v50 = vsel %vm1437_vm13, %v4467_v47, %v4762_v15  ;;  %2174 = vrot.lane.b32.xlu0 %v4113_v36, %s5505_s18 }
 0x355   : > { %v1442_v4 = vmul.f32 %v1438_v50, %v5534_v37 }
 0x356   : > { %v1028_v3 = vadd.f32 %v1026_v46, %v989_v10  ;;  %v1059_v16 = vpop.permute.xlu0 %1058  ;;  %v2249_v46 = vcombine.high %v4171_v11, %v4171_v11 }
 0x357   : > { %v1444_v24 = vadd.f32 %v1442_v4, %v1404_v31  ;;  %v1062_v33 = vsel %vm1060_vm4, %v4612_v8, %v1059_v16  ;;  %v4775_v61 = vpop.permute.xlu1 %1490  ;;  %vm1759_vm4 = vcmask 384000  }
 0x358   : > { %v1066_v29 = vmul.f32 %v1062_v33, %v5507_v42  ;;  %2431 = vrot.lane.b32.xlu0 %v4116_v34, %s5508_s20  ;;  %v1495_v45 = vsel %vm1494_vm0, %v4476_v22, %v4775_v61  ;;  %v5535_v42 = vld [vmem:[#allocation11_spill] sm:$0xff]  ;;  %v5536_v22 = vld [vmem:[#allocation37_spill] sm:$0xff] }
 0x359   : > { %v1459_v36 = vmul.f32 %v1452_v19, %v1444_v24  ;;  %v4791_v48 = vsub.s32 1, %v5535_v42  ;;  %v1499_v55 = vmul.f32 %v1495_v45, %v5536_v22 }
 0x35a   : > { %v1068_v47 = vadd.f32 %v1066_v29, %v1028_v3  ;;  %v1099_v5 = vpop.permute.xlu0 %1098 }
 0x35b   : > { %v1102_v63 = vsel %vm1100_vm5, %v4629_v23, %v1099_v5  ;;  %v4785_v8 = vpop.permute.xlu1 %1530  ;;  %v4788_v30 = vadd.f32 %v1459_v36, %v4684_v14  ;;  %v5537_v23 = vld [vmem:[#allocation39_spill] sm:$0xff]  ;;  %v5539_v5 = vld [vmem:[#allocation104_spill] sm:$0xff]  ;;  %vm1799_vm5 = vcmask 252928  }
 0x35c   : > { %v1106_v34 = vmul.f32 %v1102_v63, %v5510_v6  ;;  %v1535_v58 = vsel %vm1534_vm14, %v4489_v17, %v4785_v8  ;;  %2214 = vrot.lane.b32.xlu0 %v4119_v28, %s5511_s21  ;;  %v863_v17 = vrot.slane %v4643_v7, %v4791_v48  ;;  %v1159_v28 = vrot.slane %v4648_v54, %v4791_v48 }
 0x35d   : > { %v1539_v1 = vmul.f32 %v1535_v58, %v5537_v23  ;;  %v2586_v63 = vcombine.high %v5539_v5, %v5539_v5 }
 0x35e   : > { %v1108_v56 = vadd.f32 %v1106_v34, %v1068_v47  ;;  %v1139_v14 = vpop.permute.xlu0 %1138 }
 0x35f   : > { %v1541_v0 = vadd.f32 %v1539_v1, %v1499_v55  ;;  %v1142_v6 = vsel %vm1140_vm6, %v4654_v59, %v1139_v14  ;;  %v4805_v18 = vpop.permute.xlu1 %1570  ;;  %v1456_v14 = vrot.slane %v4758_v35, %v4791_v48  ;;  %vm1839_vm6 = vcmask 121856  }
 0x360   : > { %v1146_v10 = vmul.f32 %v1142_v6, %v5514_v60  ;;  %v1575_v26 = vsel %vm1574_vm15, %v4501_v40, %v4805_v18  ;;  %2469 = vrot.lane.b32.xlu0 %v2466_v53, %s5515_s0  ;;  %v867_v60 = vmul.f32 %v863_v17, %v4713_v12  ;;  %v2289_v12 = vcombine.high %v4183_v44, %v4183_v44  ;;  %s297_s0 = sand.u32 1, %s3068_s30  }
 0x361   : > { %v1579_v31 = vmul.f32 %v1575_v26, %v5538_v57  ;;  %s5092_s19 = scalar_lea.sflag [#allocation5], %s297_s0 }
 0x362   : > { %v1148_v52 = vadd.f32 %v1146_v10, %v1108_v56  ;;  %v1196_v59 = vpop.permute.xlu0 %1195  ;;  %v2791_v10 = vld.sshfl [vmem:[#allocation2 + $0x2] sm:$0x33 pattern:$0x76325410] }
 0x363   : > { %v4819_v50 = vadd.f32 %v1579_v31, %v1541_v0  ;;  %v1199_v7 = vsel %vm1197_vm7, %v4672_v25, %v1196_v59  ;;  %v4823_v54 = vpop.permute.xlu1 %1635  ;;  %vm1879_vm7 = vcmask 1039360  }
 0x364   : > { %v1163_v19 = vmul.f32 %v1159_v28, %v1148_v52  ;;  %2252 = vrot.lane.b32.xlu0 %v2249_v46, %s5518_s1  ;;  %v1203_v11 = vmul.f32 %v1199_v7, %v5520_v32  ;;  %v5540_v7 = vld [vmem:[#allocation43_spill] sm:$0xff]  ;;  %s2758_s1 = sshll.u32 %s297_s0, 6 }
 0x366   : > { %v1165_v40 = vadd.f32 %v1163_v19, %v867_v60  ;;  %v1236_v4 = vpop.permute.xlu0 %1235  ;;  %v1602_v60 = vmul.f32 %v2791_v10, %v5540_v7 }
 0x367   : > { %v1239_v3 = vsel %vm1237_vm8, %v4688_v51, %v1236_v4  ;;  %v4829_v16 = vpop.permute.xlu1 %1675  ;;  %vm1919_vm8 = vcmask 908288  }
 0x368   : > { %v1243_v24 = vmul.f32 %v1239_v3, %v5521_v27  ;;  %2511 = vrot.lane.b32.xlu0 %v4128_v49, %s5522_s2  ;;  %s2827_s2 = sshll.u32 %s3201_s7, 10 }
 0x369   : > { %s5074_s24 = scalar_lea.hbm %s5142_s8, %s2827_s2 }
 0x36a   : > { %v1245_v25 = vadd.f32 %v1243_v24, %v1203_v11  ;;  %v1276_v33 = vpop.permute.xlu0 %1275  ;;  %v1604_v11 = vadd.f32 %v1602_v60, %v4819_v50 }
 0x36b   : > { %v1279_v29 = vsel %vm1277_vm9, %v4702_v39, %v1276_v33  ;;  %v4839_v36 = vpop.permute.xlu1 %1715  ;;  %vm1959_vm9 = vcmask 777216  }
 0x36c   : > { %v1283_v51 = vmul.f32 %v1279_v29, %v5524_v21  ;;  %2292 = vrot.lane.b32.xlu0 %v2289_v12, %s5525_s25  ;;  %s5060_s25 = scalar_lea.vmem [#allocation4], %s2758_s1 }
 0x36e   : > { %v1285_v32 = vadd.f32 %v1283_v51, %v1245_v25  ;;  %v1316_v47 = vpop.permute.xlu0 %1315  ;;  %v5543_v51 = vld [vmem:[#allocation71_spill] sm:$0xff] }
 0x36f   : > { %v1319_v27 = vsel %vm1317_vm10, %v4719_v43, %v1316_v47  ;;  %v4845_v49 = vpop.permute.xlu1 %1757  ;;  %vm1999_vm10 = vcmask 646144  }
 0x370   : > { %v1323_v45 = vmul.f32 %v1319_v27, %v5527_v20  ;;  %2551 = vrot.lane.b32.xlu0 %v4135_v62, %s5528_s27  ;;  %v5544_v27 = vld [vmem:[#allocation26_spill] sm:$0xff]  ;;  %s2692_s27 = sshll.u32 %s5060_s25, 4  ;;  %s5080_s27 = int_to_ptr.vmem [resolvable:$true] %s2692_s27 }
 0x371   : > { %s3014_s11 = scalar_lea.vmem %s5080_s27, 1024 }
 0x372   : > { %v1325_v44 = vadd.f32 %v1323_v45, %v1285_v32  ;;  %v1356_v39 = vpop.permute.xlu0 %1355  ;;  %p3015_p11 = scmp.ne.s32.totalorder %s5080_s27, %s3014_s11 }
 0x373   : > { %v1359_v21 = vsel %vm1357_vm11, %v4733_v41, %v1356_v39  ;;  %v4854_v42 = vpop.permute.xlu1 %1797  ;;  %vm2056_vm11 = vcmask 375808  }
 0x374   : > { %v1363_v34 = vmul.f32 %v1359_v21, %v5529_v2  ;;  %2589 = vrot.lane.b32.xlu0 %v2586_v63, %s5530_s28  ;;  %v5545_v63 = vld [vmem:[#allocation73_spill] sm:$0xff]  ;;  %p3016_p12 = pnand %p3015_p11, %p3218_p5 }
 0x376   : > { %v1365_v43 = vadd.f32 %v1363_v34, %v1325_v44  ;;  %v1396_v58 = vpop.permute.xlu0 %1395  ;;  %p3017_p13 = pneg %p3016_p12 }
 0x377   : > { %v1399_v20 = vsel %vm1397_vm12, %v4746_v38, %v1396_v58  ;;  %v4861_v55 = vpop.permute.xlu1 %1837  ;;  %vm2096_vm12 = vcmask 244736  }
 0x378   : > { %v1403_v62 = vmul.f32 %v1399_v20, %v5533_v9 }
 0x37a   : > { %v1405_v1 = vadd.f32 %v1403_v62, %v1365_v43  ;;  %v1436_v56 = vpop.permute.xlu0 %1435  ;;  %v5546_v43 = vld [vmem:[#allocation28_spill] sm:$0xff] }
 0x37b   : > { %v1439_v41 = vsel %vm1437_vm13, %v4762_v15, %v1436_v56  ;;  %v4868_v6 = vpop.permute.xlu1 %1877  ;;  %vm2136_vm13 = vcmask 113664  }
 0x37c   : > { %v1443_v2 = vmul.f32 %v1439_v41, %v5534_v37  ;;  %v1599_v37 = vcombine.high %v2791_v10, %v2791_v10 }
 0x37e   : > { %v1445_v53 = vadd.f32 %v1443_v2, %v1405_v1  ;;  %v1493_v0 = vpop.permute.xlu0 %1492  ;;  %v1603_v19 = vmul.f32 %v1599_v37, %v5540_v7  ;;  %v5550_v37 = vld [vmem:[#allocation32_spill] sm:$0xff]  ;;  %v5552_v7 = vld [vmem:[#allocation30_spill] sm:$0xff] }
 0x37f   : > { %v1496_v38 = vsel %vm1494_vm0, %v4775_v61, %v1493_v0  ;;  %v4876_v31 = vpop.permute.xlu1 %1917  ;;  %vm2353_vm0 = vcmask 367616  }
 0x380   : > { %v1460_v9 = vmul.f32 %v1456_v14, %v1445_v53  ;;  %v1500_v15 = vmul.f32 %v1496_v38, %v5536_v22  ;;  %v5547_v38 = vld [vmem:[#allocation105_spill] sm:$0xff] }
 0x382   : > { %v1533_v17 = vpop.permute.xlu0 %1532  ;;  %v1462_v28 = vadd.f32 %v1460_v9, %v1165_v40 }
 0x383   : > { %v1536_v26 = vsel %vm1534_vm14, %v4785_v8, %v1533_v17  ;;  %v4883_v22 = vpop.permute.xlu1 %1957  ;;  %vm2393_vm14 = vcmask 236544  }
 0x384   : > { %v1540_v35 = vmul.f32 %v1536_v26, %v5537_v23  ;;  %v5541_v23 = vld [vmem:[#allocation69_spill] sm:$0xff] }
 0x386   : > { %v1542_v52 = vadd.f32 %v1540_v35, %v1500_v15  ;;  %v1573_v59 = vpop.permute.xlu0 %1572  ;;  %v5549_v15 = vld [vmem:[#allocation106_spill] sm:$0xff] }
 0x387   : > { %v1576_v46 = vsel %vm1574_vm15, %v4805_v18, %v1573_v59  ;;  %v5542_v18 = vld [vmem:[#allocation24_spill] sm:$0xff]  ;;  %vm2176_vm15 = vcmask 1031168  }
 0x388   : > { %v1580_v61 = vmul.f32 %v1576_v46, %v5538_v57  ;;  %v5551_v46 = vld [vmem:[#allocation107_spill] sm:$0xff] }
 0x38a   : > { %v1582_v8 = vadd.f32 %v1580_v61, %v1542_v52  ;;  %v1634_v40 = vpop.permute.xlu0 %1633 }
 0x38b   : > { %v1638_v4 = vsel %vm1637_vm1, %v5541_v23, %v1634_v40  ;;  %v1639_v3 = vsel %vm1637_vm1, %v1634_v40, %v4823_v54  ;;  %v4894_v54 = vpop.permute.xlu1 %1997  ;;  %vm2433_vm1 = vcmask 105472  }
 0x38c   : > { %v1605_v24 = vadd.f32 %v1603_v19, %v1582_v8  ;;  %v1642_v25 = vmul.f32 %v1638_v4, %v5542_v18  ;;  %v1643_v57 = vmul.f32 %v1639_v3, %v5542_v18  ;;  %v5553_v8 = vld [vmem:[#allocation34_spill] sm:$0xff]  ;;  %v5554_v3 = vld [vmem:[#allocation108_spill] sm:$0xff] }
 0x38e   : > { %v1644_v33 = vadd.f32 %v1642_v25, %v1604_v11  ;;  %v1645_v12 = vadd.f32 %v1643_v57, %v1605_v24  ;;  %v1674_v29 = vpop.permute.xlu0 %1673  ;;  %v5555_v25 = vld [vmem:[#allocation36_spill] sm:$0xff] }
 0x38f   : > { %v1678_v32 = vsel %vm1677_vm2, %v5543_v51, %v1674_v29  ;;  %v1679_v47 = vsel %vm1677_vm2, %v1674_v29, %v4829_v16  ;;  %v4900_v56 = vpop.permute.xlu1 %2054  ;;  %v5556_v51 = vld [vmem:[#allocation38_spill] sm:$0xff]  ;;  %vm2216_vm2 = vcmask 900096  }
 0x390   : > { %v1682_v45 = vmul.f32 %v1678_v32, %v5544_v27  ;;  %v1683_v44 = vmul.f32 %v1679_v47, %v5544_v27 }
 0x392   : > { %v1684_v50 = vadd.f32 %v1682_v45, %v1644_v33  ;;  %v1685_v39 = vadd.f32 %v1683_v44, %v1645_v12  ;;  %v1714_v5 = vpop.permute.xlu0 %1713  ;;  %v5557_v45 = vld [vmem:[#allocation109_spill] sm:$0xff] }
 0x393   : > { %v1718_v21 = vsel %vm1717_vm3, %v5545_v63, %v1714_v5  ;;  %v1719_v34 = vsel %vm1717_vm3, %v1714_v5, %v4839_v36  ;;  %v4909_v36 = vpop.permute.xlu1 %2092  ;;  %v5558_v5 = vld [vmem:[#allocation40_spill] sm:$0xff]  ;;  %vm2513_vm3 = vcmask 891904  }
 0x394   : > { %v1722_v58 = vmul.f32 %v1718_v21, %v5546_v43  ;;  %v1723_v20 = vmul.f32 %v1719_v34, %v5546_v43  ;;  %v2802_v34 = vld [vmem:[%s5140_s6 + $0x4] ss:$8 sm:$0x3] }
 0x396   : > { %v1724_v16 = vadd.f32 %v1722_v58, %v1684_v50  ;;  %v1725_v62 = vadd.f32 %v1723_v20, %v1685_v39  ;;  %v1756_v1 = vpop.permute.xlu0 %1755 }
 0x397   : > { %v1761_v41 = vsel %vm1759_vm4, %v1756_v1, %v4845_v49  ;;  %v4913_v26 = vpop.permute.xlu1 %2134  ;;  %v5548_v49 = vld [vmem:[#allocation78_spill] sm:$0xff] }
 0x398   : > { %v4905_v14 = vadd.f32 %v1724_v16, %v4788_v30  ;;  %v4907_v2 = vadd.f32 %v1725_v62, %v1462_v28  ;;  %v1760_v30 = vsel %vm1759_vm4, %v5548_v49, %v1756_v1  ;;  %v1765_v19 = vmul.f32 %v1761_v41, %v5552_v7  ;;  %v5559_v1 = vld [vmem:[#allocation110_spill] sm:$0xff] }
 0x399   : > { %v1764_v60 = vmul.f32 %v1760_v30, %v5552_v7  ;;  %v2014_v62 = vrot.slane %v2802_v34, %v5513_v13  ;;  %vm2473_vm4 = vcmask 1022976  }
 0x39a   : > { %v1796_v53 = vpop.permute.xlu0 %1795 }
 0x39b   : > { %v1800_v9 = vsel %vm1799_vm5, %v5547_v38, %v1796_v53  ;;  %v1801_v17 = vsel %vm1799_vm5, %v1796_v53, %v4854_v42  ;;  %v4931_v33 = vpop.permute.xlu1 %2351  ;;  %vm2256_vm5 = vcmask 769024  }
 0x39c   : > { %v1804_v52 = vmul.f32 %v1800_v9, %v5550_v37  ;;  %v1805_v59 = vmul.f32 %v1801_v17, %v5550_v37  ;;  %v5560_v9 = vld [vmem:[#allocation42_spill] sm:$0xff] }
 0x39e   : > { %v1836_v0 = vpop.permute.xlu0 %1835  ;;  %v1806_v24 = vadd.f32 %v1804_v52, %v1764_v60  ;;  %v1807_v18 = vadd.f32 %v1805_v59, %v1765_v19 }
 0x39f   : > { %v1840_v28 = vsel %vm1839_vm6, %v5549_v15, %v1836_v0  ;;  %v1841_v35 = vsel %vm1839_vm6, %v1836_v0, %v4861_v55  ;;  %v4942_v16 = vpop.permute.xlu1 %2389  ;;  %vm2296_vm6 = vcmask 637952  }
 0x3a0   : > { %v1844_v40 = vmul.f32 %v1840_v28, %v5553_v8  ;;  %v1845_v23 = vmul.f32 %v1841_v35, %v5553_v8 }
 0x3a2   : > { %v1876_v10 = vpop.permute.xlu0 %1875  ;;  %v1846_v12 = vadd.f32 %v1844_v40, %v1806_v24  ;;  %v1847_v29 = vadd.f32 %v1845_v23, %v1807_v18  ;;  %v5561_v23 = vld [vmem:[#allocation111_spill] sm:$0xff]  ;;  %v5564_v18 = vld [vmem:[#allocation44_spill] sm:$0xff] }
 0x3a3   : > { %v1880_v61 = vsel %vm1879_vm7, %v5551_v46, %v1876_v10  ;;  %v1881_v42 = vsel %vm1879_vm7, %v1876_v10, %v4868_v6  ;;  %v2173_v37 = vpop.permute.xlu1 %2172  ;;  %vm2553_vm7 = vcmask 760832  }
 0x3a4   : > { %v1884_v57 = vmul.f32 %v1880_v61, %v5555_v25  ;;  %v1885_v6 = vmul.f32 %v1881_v42, %v5555_v25 }
 0x3a6   : > { %v1916_v4 = vpop.permute.xlu0 %1915  ;;  %v1886_v50 = vadd.f32 %v1884_v57, %v1846_v12  ;;  %v1887_v39 = vadd.f32 %v1885_v6, %v1847_v29  ;;  %v5565_v57 = vld [vmem:[#allocation45_spill] sm:$0xff]  ;;  %v5566_v12 = vld [vmem:[#allocation46_spill] sm:$0xff] }
 0x3a7   : > { %v1920_v55 = vsel %vm1919_vm8, %v5554_v3, %v1916_v4  ;;  %v1921_v11 = vsel %vm1919_vm8, %v1916_v4, %v4876_v31  ;;  %v4956_v61 = vpop.permute.xlu1 %2429  ;;  %vm2593_vm8 = vcmask 629760  }
 0x3a8   : > { %v1924_v32 = vmul.f32 %v1920_v55, %v5556_v51  ;;  %v1925_v47 = vmul.f32 %v1921_v11, %v5556_v51  ;;  %v5563_v55 = vld [vmem:[#allocation112_spill] sm:$0xff]  ;;  %v5567_v51 = vld [vmem:[#allocation113_spill] sm:$0xff] }
 0x3aa   : > { %v1956_v27 = vpop.permute.xlu0 %1955  ;;  %v1926_v43 = vadd.f32 %v1924_v32, %v1886_v50  ;;  %v1927_v58 = vadd.f32 %v1925_v47, %v1887_v39  ;;  %v5569_v39 = vld [vmem:[#allocation82_spill] sm:$0xff] }
 0x3ab   : > { %v1960_v44 = vsel %vm1959_vm9, %v5557_v45, %v1956_v27  ;;  %v1961_v31 = vsel %vm1959_vm9, %v1956_v27, %v4883_v22  ;;  %v2018_v22 = vrot.slane %v2802_v34, %v4791_v48  ;;  %v2213_v7 = vpop.permute.xlu1 %2212  ;;  %v5568_v27 = vld [vmem:[#allocation81_spill] sm:$0xff] }
 0x3ac   : > { %v1964_v63 = vmul.f32 %v1960_v44, %v5558_v5  ;;  %v1965_v21 = vmul.f32 %v1961_v31, %v5558_v5  ;;  %v2394_v45 = vsel %vm2393_vm14, %v5568_v27, %v4942_v16  ;;  %v2177_v5 = vsel %vm2176_vm15, %v5569_v39, %v2173_v37  ;;  %v5581_v27 = vld [vmem:[#allocation54_spill] sm:$0xff] }
 0x3ae   : > { %v1996_v20 = vpop.permute.xlu0 %1995  ;;  %v1966_v0 = vadd.f32 %v1964_v63, %v1926_v43  ;;  %v1967_v38 = vadd.f32 %v1965_v21, %v1927_v58  ;;  %v5570_v63 = vld [vmem:[#allocation83_spill] sm:$0xff] }
 0x3af   : > { %v2000_v41 = vsel %vm1999_vm10, %v5559_v1, %v1996_v20  ;;  %v2001_v53 = vsel %vm1999_vm10, %v1996_v20, %v4894_v54  ;;  %v4958_v8 = vpop.permute.xlu1 %2471  ;;  %v2434_v21 = vsel %vm2433_vm1, %v5570_v63, %v4956_v61  ;;  %v5571_v20 = vld [vmem:[#allocation47_spill] sm:$0xff] }
 0x3b0   : > { %v2004_v17 = vmul.f32 %v2000_v41, %v5560_v9  ;;  %v2005_v10 = vmul.f32 %v2001_v53, %v5560_v9  ;;  %v5573_v53 = vld [vmem:[#allocation49_spill] sm:$0xff] }
 0x3b2   : > { %v2006_v49 = vadd.f32 %v2004_v17, %v1966_v0  ;;  %v2007_v30 = vadd.f32 %v2005_v10, %v1967_v38  ;;  %v2053_v15 = vpop.permute.xlu0 %2052  ;;  %v2181_v0 = vmul.f32 %v2177_v5, %v5573_v53  ;;  %v5574_v38 = vld [vmem:[#allocation50_spill] sm:$0xff]  ;;  %v5575_v17 = vld [vmem:[#allocation84_spill] sm:$0xff] }
 0x3b3   : > { %v2255_v4 = vpop.permute.xlu1 %2254  ;;  %v2058_v34 = vsel %vm2056_vm11, %v2053_v15, %v4900_v56  ;;  %v2438_v9 = vmul.f32 %v2434_v21, %v5574_v38  ;;  %v2217_v10 = vsel %vm2216_vm2, %v5575_v17, %v2213_v7 }
 0x3b4   : > { %v2021_v28 = vmul.f32 %v2014_v62, %v2006_v49  ;;  %v2022_v35 = vmul.f32 %v2018_v22, %v2007_v30  ;;  %v5572_v22 = vld [vmem:[#allocation48_spill] sm:$0xff]  ;;  %v2062_v49 = vmul.f32 %v2058_v34, %v5564_v18 }
 0x3b5   : > { %v5582_v34 = vld [vmem:[#allocation116_spill] sm:$0xff] }
 0x3b6   : > { %v4951_v52 = vadd.f32 %v2021_v28, %v4905_v14  ;;  %v4954_v59 = vadd.f32 %v2022_v35, %v4907_v2  ;;  %v2095_v46 = vpop.permute.xlu0 %2094  ;;  %v2057_v14 = vsel %vm2056_vm11, %v5561_v23, %v2053_v15  ;;  %v5562_v2 = vld [vmem:[#allocation80_spill] sm:$0xff]  ;;  %v5576_v15 = vld [vmem:[#allocation114_spill] sm:$0xff] }
 0x3b7   : > { %v2097_v3 = vsel %vm2096_vm12, %v5562_v2, %v4909_v36  ;;  %v2061_v25 = vmul.f32 %v2057_v14, %v5564_v18  ;;  %v2510_v31 = vpop.permute.xlu1 %2509  ;;  %v2098_v50 = vsel %vm2096_vm12, %v4909_v36, %v2095_v46  ;;  %v2398_v36 = vmul.f32 %v2394_v45, %v5572_v22  ;;  %v5577_v14 = vld [vmem:[#allocation115_spill] sm:$0xff] }
 0x3b8   : > { %v2101_v6 = vmul.f32 %v2097_v3, %v5565_v57  ;;  %v2102_v1 = vmul.f32 %v2098_v50, %v5565_v57  ;;  %v2810_v50 = vld [vmem:[%s5140_s6 + $0x5] ss:$8 sm:$0x3] }
 0x3ba   : > { %v2133_v54 = vpop.permute.xlu0 %2132  ;;  %v2103_v44 = vadd.f32 %v2101_v6, %v2061_v25  ;;  %v5579_v25 = vld [vmem:[#allocation52_spill] sm:$0xff] }
 0x3bb   : > { %v2137_v11 = vsel %vm2136_vm13, %v5563_v55, %v2133_v54  ;;  %v2138_v43 = vsel %vm2136_vm13, %v2133_v54, %v4913_v26  ;;  %v2295_v35 = vpop.permute.xlu1 %2294  ;;  %v5578_v55 = vld [vmem:[#allocation51_spill] sm:$0xff] }
 0x3bc   : > { %v2141_v29 = vmul.f32 %v2137_v11, %v5566_v12  ;;  %v2142_v30 = vmul.f32 %v2138_v43, %v5566_v12  ;;  %v2221_v11 = vmul.f32 %v2217_v10, %v5578_v55  ;;  %v2315_v10 = vrot.slane %v2810_v50, %v4791_v48 }
 0x3be   : > { %v2350_v42 = vpop.permute.xlu0 %2349  ;;  %v2143_v58 = vadd.f32 %v2141_v29, %v2103_v44 }
 0x3bf   : > { %v2354_v32 = vsel %vm2353_vm0, %v5567_v51, %v2350_v42  ;;  %v2355_v54 = vsel %vm2353_vm0, %v2350_v42, %v4931_v33  ;;  %v5580_v42 = vld [vmem:[#allocation85_spill] sm:$0xff]  ;;  %v2550_v5 = vpop.permute.xlu1 %2549 }
 0x3c0   : > { %v2358_v62 = vmul.f32 %v2354_v32, %v5571_v20  ;;  %v2183_v46 = vadd.f32 %v2181_v0, %v2143_v58  ;;  %v2359_v6 = vmul.f32 %v2355_v54, %v5571_v20  ;;  %v5583_v20 = vld [vmem:[#allocation55_spill] sm:$0xff]  ;;  %v5585_v0 = vld [vmem:[#allocation86_spill] sm:$0xff] }
 0x3c2   : > { %v2392_v60 = vpop.permute.xlu0 %2391  ;;  %v2400_v23 = vadd.f32 %v2398_v36, %v2358_v62  ;;  %v2223_v32 = vadd.f32 %v2221_v11, %v2183_v46  ;;  %v5584_v36 = vld [vmem:[#allocation53_spill] sm:$0xff] }
 0x3c3   : > { %v2395_v56 = vsel %vm2393_vm14, %v4942_v16, %v2392_v60  ;;  %v2104_v60 = vadd.f32 %v2102_v1, %v2062_v49  ;;  %v5586_v46 = vld [vmem:[#allocation57_spill] sm:$0xff] }
 0x3c4   : > { %v2440_v29 = vadd.f32 %v2438_v9, %v2400_v23 }
 0x3c6   : > { %v2175_v19 = vpop.permute.xlu0 %2174 }
 0x3c7   : > { %v2178_v26 = vsel %vm2176_vm15, %v2173_v37, %v2175_v19  ;;  %v2399_v37 = vmul.f32 %v2395_v56, %v5572_v22 }
 0x3c8   : > { %v2182_v19 = vmul.f32 %v2178_v26, %v5573_v53  ;;  %v2311_v53 = vrot.slane %v2810_v50, %v5513_v13 }
 0x3ca   : > { %v2432_v40 = vpop.permute.xlu0 %2431 }
 0x3cb   : > { %v2435_v18 = vsel %vm2433_vm1, %v4956_v61, %v2432_v40  ;;  %v2401_v61 = vadd.f32 %v2399_v37, %v2359_v6 }
 0x3cc   : > { %v2439_v44 = vmul.f32 %v2435_v18, %v5574_v38 }
 0x3ce   : > { %v2215_v24 = vpop.permute.xlu0 %2214  ;;  %v2441_v38 = vadd.f32 %v2439_v44, %v2401_v61 }
 0x3cf   : > { %v2218_v16 = vsel %vm2216_vm2, %v2213_v7, %v2215_v24  ;;  %v2514_v7 = vsel %vm2513_vm3, %v5580_v42, %v2510_v31  ;;  %v2144_v24 = vadd.f32 %v2142_v30, %v2104_v60 }
 0x3d0   : > { %v2222_v12 = vmul.f32 %v2218_v16, %v5578_v55  ;;  %v2518_v1 = vmul.f32 %v2514_v7, %v5584_v36  ;;  %v2592_v16 = vpop.permute.xlu1 %2591  ;;  %v5587_v55 = vld [vmem:[#allocation79_spill] sm:$0xff] }
 0x3d1   : > { %v2184_v40 = vadd.f32 %v2182_v19, %v2144_v24 }
 0x3d2   : > { %v2470_v47 = vpop.permute.xlu0 %2469 }
 0x3d3   : > { %v2474_v28 = vsel %vm2473_vm4, %v5576_v15, %v2470_v47  ;;  %v2475_v51 = vsel %vm2473_vm4, %v2470_v47, %v4958_v8  ;;  %v2224_v43 = vadd.f32 %v2222_v12, %v2184_v40  ;;  %v2818_v15 = vld [vmem:[%s5140_s6 + $0x6] ss:$8 sm:$0x3]  ;;  %v2627_v40 = vstv %s305_s23 }
 0x3d4   : > { %v2478_v57 = vmul.f32 %v2474_v28, %v5579_v25  ;;  %v2479_v58 = vmul.f32 %v2475_v51, %v5579_v25  ;;  %v2608_v37 = vrot.slane %v2818_v15, %v5513_v13  ;;  %v2612_v19 = vrot.slane %v2818_v15, %v4791_v48  ;;  %v5596_v15 = vld [vmem:[#allocation65_spill] sm:$0xff] }
 0x3d6   : > { %v2253_v41 = vpop.permute.xlu0 %2252  ;;  %v2480_v63 = vadd.f32 %v2478_v57, %v2440_v29  ;;  %v2481_v28 = vadd.f32 %v2479_v58, %v2441_v38 }
 0x3d7   : > { %v2257_v2 = vsel %vm2256_vm5, %v5577_v14, %v2253_v41  ;;  %v2258_v33 = vsel %vm2256_vm5, %v2253_v41, %v2255_v4 }
 0x3d8   : > { %v2261_v45 = vmul.f32 %v2257_v2, %v5581_v27  ;;  %v2262_v4 = vmul.f32 %v2258_v33, %v5581_v27  ;;  %v2520_v17 = vadd.f32 %v2518_v1, %v2480_v63  ;;  %v5588_v33 = vld [vmem:[#allocation56_spill] sm:$0xff] }
 0x3d9   : > { %v5589_v1 = vld [vmem:[#allocation60_spill] sm:$0xff] }
 0x3da   : > { %v2512_v3 = vpop.permute.xlu0 %2511  ;;  %v2263_v41 = vadd.f32 %v2261_v45, %v2223_v32  ;;  %v2264_v9 = vadd.f32 %v2262_v4, %v2224_v43 }
 0x3db   : > { %v2515_v21 = vsel %vm2513_vm3, %v2510_v31, %v2512_v3  ;;  %v2554_v31 = vsel %vm2553_vm7, %v5585_v0, %v2550_v5 }
 0x3dc   : > { %v2519_v56 = vmul.f32 %v2515_v21, %v5584_v36  ;;  %v2558_v23 = vmul.f32 %v2554_v31, %v5586_v46  ;;  %v5591_v31 = vld [vmem:[#allocation62_spill] sm:$0xff] }
 0x3de   : > { %v2293_v39 = vpop.permute.xlu0 %2292  ;;  %v2521_v60 = vadd.f32 %v2519_v56, %v2481_v28  ;;  %v2560_v3 = vadd.f32 %v2558_v23, %v2520_v17 }
 0x3df   : > { %v2297_v8 = vsel %vm2296_vm6, %v5582_v34, %v2293_v39  ;;  %v2298_v47 = vsel %vm2296_vm6, %v2293_v39, %v2295_v35 }
 0x3e0   : > { %v2301_v62 = vmul.f32 %v2297_v8, %v5583_v20  ;;  %v2302_v22 = vmul.f32 %v2298_v47, %v5583_v20 }
 0x3e2   : > { %v2552_v26 = vpop.permute.xlu0 %2551  ;;  %v2303_v49 = vadd.f32 %v2301_v62, %v2263_v41  ;;  %v2304_v35 = vadd.f32 %v2302_v22, %v2264_v9  ;;  %v5592_v9 = vld [vmem:[#allocation64_spill] sm:$0xff] }
 0x3e3   : > { %v2555_v30 = vsel %vm2553_vm7, %v2550_v5, %v2552_v26  ;;  %v5593_v26 = vld [vmem:[#allocation61_spill] sm:$0xff] }
 0x3e4   : > { %v2559_v54 = vmul.f32 %v2555_v30, %v5586_v46  ;;  %v2318_v2 = vmul.f32 %v2311_v53, %v2303_v49  ;;  %v2319_v25 = vmul.f32 %v2315_v10, %v2304_v35  ;;  %v5590_v53 = vld [vmem:[#allocation58_spill] sm:$0xff]  ;;  %v5595_v49 = vld [vmem:[#allocation63_spill] sm:$0xff] }
 0x3e5   : > { %v3006_v35 = vld [vmem:[%s3233_s22] sm:$0xff] }
 0x3e6   : > { %v2590_v14 = vpop.permute.xlu0 %2589  ;;  %v2561_v57 = vadd.f32 %v2559_v54, %v2521_v60  ;;  %v2320_v12 = vadd.f32 %v2318_v2, %v4951_v52  ;;  %v2321_v29 = vadd.f32 %v2319_v25, %v4954_v59  ;;  %v3007_v54 = vld [vmem:[%s3233_s22 + $0x10] sm:$0xff]  ;;  %v3013_v25 = vld [vmem:[%s3233_s22 + $0x38] sm:$0xff] }
 0x3e7   : > { %v2594_v11 = vsel %vm2593_vm8, %v5587_v55, %v2590_v14  ;;  %v2595_v18 = vsel %vm2593_vm8, %v2590_v14, %v2592_v16  ;;  %v3008_v16 = vld [vmem:[%s3233_s22 + $0x20] sm:$0xff]  ;;  %v3010_v14 = vld [vmem:[%s3233_s22 + $0x8] sm:$0xff] }
 0x3e8   : > { %v2598_v42 = vmul.f32 %v2594_v11, %v5588_v33  ;;  %v2599_v7 = vmul.f32 %v2595_v18, %v5588_v33  ;;  %v3012_v11 = vld [vmem:[%s3233_s22 + $0x28] sm:$0xff] }
 0x3ea   : > { %v2600_v24 = vadd.f32 %v2598_v42, %v2560_v3  ;;  %v2601_v6 = vadd.f32 %v2599_v7, %v2561_v57  ;;  %v3011_v3 = vld [vmem:[%s3233_s22 + $0x18] sm:$0xff] }
 0x3ec   : > { %v2615_v48 = vmul.f32 %v2608_v37, %v2600_v24  ;;  %v2616_v51 = vmul.f32 %v2612_v19, %v2601_v6  ;;  %v3009_v37 = vld [vmem:[%s3233_s22 + $0x30] sm:$0xff]  ;;  %s3130_s22 = smov [#allocation4]  }
 0x3ed   : > { %s3018_s14 = sshll.u32 %s3130_s22, 4  ;;  %s3019_s14 = int_to_ptr.vmem [resolvable:$false] %s3018_s14 }
 0x3ee   : > { %v2617_v32 = vadd.f32 %v2615_v48, %v2320_v12  ;;  %v2618_v27 = vadd.f32 %v2616_v51, %v2321_v29  ;;  %s3020_s13 = scalar_lea.vmem %s3019_s14, 2048  ;;  %p3021_p0 = scmp.lt.s32.totalorder %s5080_s27, %s3019_s14 }
 0x3ef   : > { %p3022_p1 = scmp.lt.s32.totalorder %s3020_s13, %s3014_s11 }
 0x3f0   : > { %v2621_v45 = vrot.slane %v2617_v32, 1  ;;  %v2622_v61 = vrot.slane %v2618_v27, 1 }
 0x3f1   : > { %p3023_p2 = por %p3022_p1, %p3021_p0 }
 0x3f2   : > { %v2625_v44 = vadd.f32 %v2621_v45, %v2617_v32  ;;  %v2626_v4 = vadd.f32 %v2622_v61, %v2618_v27 }
 0x3f3   : > { %p3024_p3 = pnand %p3023_p2, %p3017_p13 }
 0x3f4   : > { %v2628_v50 = vadd.f32 %v2627_v40, %v2625_v44  ;;  %v2629_v39 = vadd.f32 %v2627_v40, %v2626_v4 }
 0x3f6   : > { %v2819_v5 = vmul.f32 -1.442695, %v2628_v50  ;;  %v2820_v63 = vmul.f32 -1.442695, %v2629_v39 }
 0x3f8   : > { %2994 = vpow2.f32 %v2819_v5 }
 0x3f9   : > { %2996 = vpow2.f32 %v2820_v63 }
 0x402   : > { %v2995_v52 = vpop.eup %2994 }
 0x403   : > { %v2997_v21 = vpop.eup %2996  ;;  %v2636_v59 = vadd.f32 1.0, %v2995_v52 }
 0x404   : > { %v2637_v34 = vadd.f32 1.0, %v2997_v21 }
 0x405   : > { %2998 = vrcp.f32 %v2636_v59 }
 0x406   : > { %3000 = vrcp.f32 %v2637_v34 }
 0x40f   : > { %v2999_v8 = vpop.eup %2998 }
 0x410   : > { %v3001_v47 = vpop.eup %3000  ;;  %v2642_v43 = vmul.f32 1.442695, %v2999_v8 }
 0x411   : > { %v2644_v58 = vmul.f32 1.442695, %v3001_v47 }
 0x412   : > { %3002 = vpow2.f32 %v2642_v43 }
 0x413   : > { %3004 = vpow2.f32 %v2644_v58 }
 0x41c   : > { %v3003_v20 = vpop.eup %3002 }
 0x41d   : > { %v3005_v62 = vpop.eup %3004  ;;  %v2649_v22 = vrot.slane %v3003_v20, %v5513_v13 }
 0x41e   : > { %v2653_v36 = vrot.slane %v3005_v62, %v5513_v13  ;;  %v5594_v13 = vld [vmem:[#allocation59_spill] sm:$0xff] }
 0x41f   : > { %v2654_v41 = vmul.f32 %v2649_v22, %v5589_v1  ;;  %v2656_v0 = vmul.f32 %v2649_v22, %v5590_v53  ;;  %v2658_v38 = vmul.f32 %v2649_v22, %v5591_v31  ;;  %v2660_v56 = vmul.f32 %v2649_v22, %v5592_v9 }
 0x420   : > { %v2655_v17 = vmul.f32 %v2653_v36, %v5593_v26  ;;  %v2657_v10 = vmul.f32 %v2653_v36, %v5594_v13  ;;  %v2659_v30 = vmul.f32 %v2653_v36, %v5595_v49  ;;  %v2661_v28 = vmul.f32 %v2653_v36, %v5596_v15 }
 0x421   : > { %v2662_v46 = vadd.f32 %v3006_v35, %v2654_v41  ;;  %v2664_v23 = vadd.f32 %v3007_v54, %v2656_v0  ;;  %v2666_v60 = vadd.f32 %v3008_v16, %v2658_v38  ;;  %v2668_v19 = vadd.f32 %v3009_v37, %v2660_v56 }
 0x422   : > { %v2663_v2 = vadd.f32 %v3010_v14, %v2655_v17  ;;  %v2665_v55 = vadd.f32 %v3011_v3, %v2657_v10  ;;  %v2667_v18 = vadd.f32 %v3012_v11, %v2659_v30  ;;  %v2669_v57 = vadd.f32 %v3013_v25, %v2661_v28 }
 0x423   : > { %2670 = vst [vmem:[%s5060_s25] sm:$0xff] %v2662_v46  ;;  %2672 = vst [vmem:[%s5060_s25 + $0x10] sm:$0xff] %v2664_v23 }
 0x424   : > { %2674 = vst [vmem:[%s5060_s25 + $0x20] sm:$0xff] %v2666_v60  ;;  %2676 = vst [vmem:[%s5060_s25 + $0x30] sm:$0xff] %v2668_v19 }
 0x425   : > { %2671 = vst [vmem:[%s5060_s25 + $0x8] sm:$0xff] %v2663_v2  ;;  %2673 = vst [vmem:[%s5060_s25 + $0x18] sm:$0xff] %v2665_v55 }
 0x426   : > { %2675 = vst [vmem:[%s5060_s25 + $0x28] sm:$0xff] %v2667_v18  ;;  %2677 = vst [vmem:[%s5060_s25 + $0x38] sm:$0xff] %v2669_v57 }
 0x427   : > { %3027 = shalt.err (!%p3024_p3)
}
 0x428   : > { %s3028_s18 = scalar_lea.hbm %s5074_s24, 1024  ;;  %s3032_s23 = scalar_lea.hbm %s5142_s8, 2048 }
 0x429   : > { %p3029_p4 = scmp.ne.s32.totalorder %s5074_s24, %s3028_s18  ;;  %p3033_p9 = scmp.lt.u32.totalorder %s5074_s24, %s5142_s8 }
 0x42a   : > { %p3034_p10 = scmp.lt.u32.totalorder %s3032_s23, %s3028_s18  ;;  %p3036_p12 = scmp.lt.u32.totalorder %s3028_s18, %s5074_s24 }
 0x42b   : > { %p3030_p7 = pnand %p3029_p4, %p3218_p5 }
 0x42c   : > { %p3035_p11 = por %p3034_p10, %p3033_p9 }
 0x42d   : > { %p3031_p8 = pneg %p3030_p7 }
 0x42e   : > { %p3037_p13 = por %p3036_p12, %p3035_p11 }
 0x430   : > { %p3038_p0 = pnand %p3037_p13, %p3031_p8 }
 0x432   : > { %3041 = shalt.err (!%p3038_p0)
}
 0x433   : > { %s3131_s2 = smov 256  }
 0x434   : > { %2828 = dma.vmem_to_hbm [thread:$0]  (%p3218_p5), %s5080_s27, 1024, %s5074_s24, %s5092_s19, %s3131_s2, %s3131_s2, %s5443_s26  }
 0x435 PF: > { %p2834_p1 = scmp.ge.s32.totalorder %s3076_s10, 2  ;;  %s2707_s25 = sand.u32 1, %s3064_s29  }
 0x436   : > { %s2708_s7 = scalar_lea.sflag [#allocation5], %s2707_s25 }
 0x437   : > { %p2831_p2 = pnand %p2834_p1, %p3222_p6 }
 0x439   : > { %3059 = dma.done.wait (!%p2831_p2), %s2708_s7, 1024  }
 0x43a   : > { %3061 = vsyncadd (!%p2831_p2), %s2708_s7, 4294966272  ;;  %p19_p3 = scmp.ge.s32.totalorder %s3205_s12, 4   ;;  %s5597_s29 = smov %s3068_s30 }
 0x43b   : > { %s5598_s30 = smov %s3072_s9  ;;  %s5599_s9 = smov %s3216_s15 }
 0x43c   : > { %s5600_s10 = smov %s3205_s12  ;;  %21 = sbr.rel (!%p19_p3) target bundleno = 8 (0x8), region = 142 }
 0x443   :  { %2713 = vsyncpa [#allocation5], 1 }
 0x444   :  { %2715 = vsyncpa [#allocation5 + $0x1], 1 }

</bundles_post_ra>
